<compile_context>
chip_gen: v7x
topology: tpu7x:2x2x1
jax: 0.10.0
libtpu: 0.0.40
codegen_flags: <defaults>
</compile_context>

<pallas_src>
import functools

import jax
import jax.numpy as jnp
import numpy as np
from jax import lax
from jax.experimental import pallas as pl
from jax.experimental.pallas import tpu as pltpu

LANES = 128          # lane-dense output width for every layer (6/16/120/84/100 -> 128)
KSIZE = 5            # both convs are 5x5, padding=0
C2_PAD = 8           # conv2 input channels: 6 real, padded to 8
K2 = 256             # conv2 contraction: 25 * 8 = 200, padded to 256
K3 = 512             # fc1  contraction: 25 * 16 = 400, padded to 512


# --------------------------------------------------------------------------
# In-kernel helpers (traced inside the Pallas kernel; everything lives in VMEM)
# --------------------------------------------------------------------------
def _maxpool2x2(x):
    """x: (B, H, W, 128) NHWC, H and W even -> (B, H//2, W//2, 128).

    2x2 / stride-2 max pool via lane-aligned folds: adjacent W (then H) elements
    are folded into the lane axis (C == 128, every split offset is 128-aligned)
    and reduced with a single jnp.maximum each.  Same proven pattern as before.
    """
    B, H, W, C = x.shape
    x = x.reshape(B * H * (W // 2), 2 * C)
    x = jnp.maximum(x[:, :C], x[:, C:])                          # pool along W
    x = x.reshape(B * (H // 2), 2 * (W // 2) * C)
    x = jnp.maximum(x[:, :(W // 2) * C], x[:, (W // 2) * C:])    # pool along H
    return x.reshape(B, H // 2, W // 2, C)


def _lenet5_kernel(x_ref, w1_ref, b1_ref, w2_ref, b2_ref,
                   w3_ref, b3_ref, w4_ref, b4_ref, w5_ref, b5_ref, out_ref):
    f32, bf16 = jnp.float32, jnp.bfloat16
    TB = x_ref.shape[0] // (28 * 28)          # images in this batch tile (static)

    # ---- conv1 (patches pre-built in the wrapper, bf16) + bias + ReLU ------
    h = jnp.dot(x_ref[...], w1_ref[...], preferred_element_type=f32)
    h = jnp.maximum(h + b1_ref[...], 0.0)                        # (TB*784, 128); lanes 6.. are 0

    # ---- pool1 (128-lane aligned folds) ------------------------------------
    h = _maxpool2x2(h.reshape(TB, 28, 28, LANES))                # (TB, 14, 14, 128)

    # ---- conv2: compact 128 -> 8 channels (6 real + 2 zero), bf16 im2col ---
    hc = h[..., :C2_PAD].astype(bf16)                            # (TB, 14, 14, 8)
    xk = jnp.concatenate([hc[:, kh:kh + 10] for kh in range(KSIZE)], axis=-1)       # (TB,10,14,40)
    patches = jnp.concatenate([xk[:, :, kw:kw + 10] for kw in range(KSIZE)], axis=-1)  # (TB,10,10,200)
    patches = patches.reshape(TB * 100, KSIZE * KSIZE * C2_PAD)  # (TB*100, 200), cols (kw,kh,c)
    patches = jnp.concatenate(
        [patches, jnp.zeros((TB * 100, K2 - KSIZE * KSIZE * C2_PAD), bf16)], axis=-1)  # (TB*100, 256)
    h = jnp.dot(patches, w2_ref[...], preferred_element_type=f32)
    h = jnp.maximum(h + b2_ref[...], 0.0)                        # (TB*100, 128); lanes 16.. are 0

    # ---- pool2 + compacted (h, w, c) flatten (matches torch NCHW .view) ----
    h = _maxpool2x2(h.reshape(TB, 10, 10, LANES))                # (TB, 5, 5, 128)
    hc = h[..., :16]                                             # (TB, 5, 5, 16) real channels
    rows = jnp.concatenate([hc[:, :, ww, :] for ww in range(5)], axis=-1)   # (TB, 5, 80)
    flat = jnp.concatenate([rows[:, hh, :] for hh in range(5)], axis=-1)    # (TB, 400)
    flat = jnp.concatenate([flat, jnp.zeros((TB, K3 - 400), f32)], axis=-1) # (TB, 512)
    flat = flat.astype(bf16)

    # ---- fc1 -> fc2 -> fc3 (bf16 MXU operands, f32 accumulate + epilogue) --
    h = jnp.maximum(jnp.dot(flat, w3_ref[...],
                            preferred_element_type=f32) + b3_ref[...], 0.0)
    h = jnp.maximum(jnp.dot(h.astype(bf16), w4_ref[...],
                            preferred_element_type=f32) + b4_ref[...], 0.0)
    h = jnp.dot(h.astype(bf16), w5_ref[...],
                preferred_element_type=f32) + b5_ref[...]
    out_ref[...] = h.astype(out_ref.dtype)                       # (TB, 128) lane-dense


# --------------------------------------------------------------------------
# One-time parameter repacking (outside the jitted forward)
# --------------------------------------------------------------------------
def _pad_to(a, shape):
    return jnp.pad(a, [(0, s - d) for d, s in zip(a.shape, shape)])


def prepare_params(p):
    """Repack PyTorch-layout LeNet5 params into de-padded, MXU-friendly slabs.

    Conv weights become (K, 128) matmul operands whose row order matches the
    im2col column order (kw, kh, c); fc1 is permuted to consume the kernel's
    (h, w, c)-ordered flatten (== torch's NCHW .view flatten).  Output dims are
    zero-padded to 128 lanes and contraction dims only to the next clean tile
    (128 / 256 / 512), so padded activation lanes stay exact zeros everywhere.
    """
    f32, bf16 = jnp.float32, jnp.bfloat16

    # conv1: (6, 3, 5, 5) -> (kw, kh, c, oc) -> (75, 6) -> (128, 128) bf16.
    w1 = jnp.transpose(p["w1"], (3, 2, 1, 0)).reshape(25 * 3, 6)
    w1 = _pad_to(w1, (LANES, LANES)).astype(bf16)
    b1 = _pad_to(p["b1"].reshape(1, 6), (1, LANES)).astype(f32)

    # conv2: (16, 6, 5, 5) -> (kw, kh, c, oc), c padded 6->8 -> (200, 16) -> (256, 128).
    w2 = jnp.transpose(p["w2"], (3, 2, 1, 0))                    # (5, 5, 6, 16)
    w2 = _pad_to(w2, (5, 5, C2_PAD, 16)).reshape(25 * C2_PAD, 16)
    w2 = _pad_to(w2, (K2, LANES)).astype(bf16)
    b2 = _pad_to(p["b2"].reshape(1, 16), (1, LANES)).astype(f32)

    # fc1: (120, 400); torch flattens NCHW as (c, h, w) -> permute to (h, w, c).
    w3 = jnp.transpose(p["fc1_w"].reshape(120, 16, 5, 5), (2, 3, 1, 0)).reshape(400, 120)
    w3 = _pad_to(w3, (K3, LANES)).astype(bf16)
    b3 = _pad_to(p["fc1_b"].reshape(1, 120), (1, LANES)).astype(f32)

    # fc2 / fc3: stored pre-transposed as (in, out), zero-padded to 128x128.
    w4 = _pad_to(p["fc2_w"].T, (LANES, LANES)).astype(bf16)
    b4 = _pad_to(p["fc2_b"].reshape(1, 84), (1, LANES)).astype(f32)
    w5 = _pad_to(p["fc3_w"].T, (LANES, LANES)).astype(bf16)
    b5 = _pad_to(p["fc3_b"].reshape(1, 100), (1, LANES)).astype(f32)

    return (w1, b1, w2, b2, w3, b3, w4, b4, w5, b5)


# --------------------------------------------------------------------------
# Forward wrapper: XLA-side conv1 im2col + single batch-gridded pallas_call
# --------------------------------------------------------------------------
def _conv1_im2col(x_nhwc_bf16):
    """(B, 32, 32, 3) bf16 -> (B*784, 128) bf16 patch slab, columns (kw, kh, c)."""
    B = x_nhwc_bf16.shape[0]
    xk = jnp.concatenate([x_nhwc_bf16[:, kh:kh + 28] for kh in range(KSIZE)], axis=-1)
    p = jnp.concatenate([xk[:, :, kw:kw + 28] for kw in range(KSIZE)], axis=-1)
    p = p.reshape(B * 28 * 28, KSIZE * KSIZE * 3)                # (B*784, 75)
    return jnp.pad(p, ((0, 0), (0, LANES - KSIZE * KSIZE * 3)))  # pad 75 -> 128 lanes


def lenet5_forward(packed, img, *, batch_tile=8):
    """img: (B, 3, 32, 32) NCHW float32 -> logits (B, 100).

    batch_tile: images per grid block.  Use <=16 on v7x (64 MiB VMEM), ~32-64 on
    v5e/v6e; for tiny batches pick 1 so v7x's two TensorCores both get work.
    """
    B = img.shape[0]
    TB = max(1, min(batch_tile, B))
    G = pl.cdiv(B, TB)
    B_pad = G * TB

    # Boundary layout plumbing (pure XLA): NCHW -> NHWC, bf16, conv1 im2col.
    x = jnp.transpose(img, (0, 2, 3, 1)).astype(jnp.bfloat16)
    if B_pad != B:
        x = jnp.pad(x, ((0, B_pad - B), (0, 0), (0, 0), (0, 0)))
    p1 = _conv1_im2col(x)                                        # (B_pad*784, 128) bf16

    flops = 2 * B_pad * (784 * LANES * LANES          # conv1
                         + 100 * K2 * LANES           # conv2
                         + K3 * LANES                 # fc1
                         + 2 * LANES * LANES)         # fc2 + fc3
    bytes_accessed = int(p1.size * p1.dtype.itemsize
                         + sum(a.size * a.dtype.itemsize for a in packed)
                         + B_pad * LANES * 4)

    # Weights/biases: full-array blocks with constant index_map -> DMA'd once,
    # VMEM-resident across all batch blocks.
    weight_specs = [pl.BlockSpec(a.shape, lambda i: (0, 0)) for a in packed]

    out = pl.pallas_call(
        _lenet5_kernel,
        out_shape=jax.ShapeDtypeStruct((G, TB, LANES), jnp.float32),
        grid=(G,),
        in_specs=[pl.BlockSpec((TB * 784, LANES), lambda i: (i, 0))] + weight_specs,
        out_specs=pl.BlockSpec((None, TB, LANES), lambda i: (i, 0, 0)),
        compiler_params=pltpu.CompilerParams(
            dimension_semantics=("parallel",),        # batch blocks -> both TCs on v7x
            vmem_limit_bytes=32 * 1024 * 1024),       # sized for v7x's 64 MiB VMEM
        cost_estimate=pl.CostEstimate(flops=flops, transcendentals=0,
                                      bytes_accessed=bytes_accessed),
    )(p1, *packed)

    return out.reshape(B_pad, LANES)[:B, :100]                   # strip batch/lane padding


# --------------------------------------------------------------------------
# Pure-XLA f32 reference (matches the PyTorch module semantics)
# --------------------------------------------------------------------------
def _reference_forward(p, img):
    def conv(x, w, b):
        y = lax.conv_general_dilated(x, w, (1, 1), "VALID",
                                     dimension_numbers=("NCHW", "OIHW", "NCHW"))
        return jax.nn.relu(y + b[None, :, None, None])

    def pool(x):
        return jnp.maximum(jnp.maximum(x[:, :, 0::2, 0::2], x[:, :, 0::2, 1::2]),
                           jnp.maximum(x[:, :, 1::2, 0::2], x[:, :, 1::2, 1::2]))

    x = pool(conv(img, p["w1"], p["b1"]))
    x = pool(conv(x, p["w2"], p["b2"]))
    x = x.reshape(x.shape[0], -1)
    x = jax.nn.relu(x @ p["fc1_w"].T + p["fc1_b"])
    x = jax.nn.relu(x @ p["fc2_w"].T + p["fc2_b"])
    return x @ p["fc3_w"].T + p["fc3_b"]


# --------------------------------------------------------------------------
# Deterministic synthetic parameters (PyTorch shapes, uniform +/- 1/sqrt(fan_in))
# --------------------------------------------------------------------------
def init_params(key):
    ks = jax.random.split(key, 10)

    def u(k, shape, fan_in):
        bound = 1.0 / np.sqrt(fan_in)
        return jax.random.uniform(k, shape, jnp.float32, -bound, bound)

    return {
        "w1": u(ks[0], (6, 3, 5, 5), 3 * 5 * 5),
        "b1": u(ks[1], (6,), 3 * 5 * 5),
        "w2": u(ks[2], (16, 6, 5, 5), 6 * 5 * 5),
        "b2": u(ks[3], (16,), 6 * 5 * 5),
        "fc1_w": u(ks[4], (120, 400), 400),
        "fc1_b": u(ks[5], (120,), 400),
        "fc2_w": u(ks[6], (84, 120), 120),
        "fc2_b": u(ks[7], (84,), 120),
        "fc3_w": u(ks[8], (100, 84), 84),
        "fc3_b": u(ks[9], (100,), 84),
    }


if __name__ == "__main__":
    key = jax.random.PRNGKey(0)
    pkey, xkey = jax.random.split(key)
    params = init_params(pkey)
    packed = prepare_params(params)          # one-time repack, outside the jit

    # LeNet5's fc1 (16*5*5) fixes the spatial size at 32x32; keep batch small.
    x = jax.random.normal(xkey, (2, 3, 32, 32), jnp.float32)

    # batch_tile=1 -> grid=(2,) "parallel": exercises the batch grid and lets
    # v7x run one image per TensorCore.  Use larger tiles for real batches.
    fwd = jax.jit(functools.partial(lenet5_forward, batch_tile=1))
    out = jax.block_until_ready(fwd(packed, x))
    assert out.shape == (2, 100), out.shape
    assert bool(jnp.all(jnp.isfinite(out)))

    # Numerical check vs. the pure-XLA f32 reference (bf16 MXU operands in the
    # kernel -> loose tolerance).
    ref = _reference_forward(params, x)
    max_err = float(jnp.max(jnp.abs(out - ref)))
    assert max_err < 5e-2, max_err

    print("KERNEL_OK")
</pallas_src>

<mosaic_0001>
module attributes {stable_mosaic.version = 11 : i64} {
  func.func @_lenet5_kernel(%arg0: i32, %arg1: memref<784x128xbf16, #tpu.memory_space<vmem>>, %arg2: memref<128x128xbf16, #tpu.memory_space<vmem>>, %arg3: memref<1x128xf32, #tpu.memory_space<vmem>>, %arg4: memref<256x128xbf16, #tpu.memory_space<vmem>>, %arg5: memref<1x128xf32, #tpu.memory_space<vmem>>, %arg6: memref<512x128xbf16, #tpu.memory_space<vmem>>, %arg7: memref<1x128xf32, #tpu.memory_space<vmem>>, %arg8: memref<128x128xbf16, #tpu.memory_space<vmem>>, %arg9: memref<1x128xf32, #tpu.memory_space<vmem>>, %arg10: memref<128x128xbf16, #tpu.memory_space<vmem>>, %arg11: memref<1x128xf32, #tpu.memory_space<vmem>>, %arg12: memref<1x1x128xf32, #tpu.memory_space<vmem>>) attributes {dimension_semantics = [#tpu.dimension_semantics<parallel>], iteration_bounds = array<i64: 2>, scalar_prefetch = 0 : i64, scratch_operands = 0 : i64, tpu.core_type = #tpu.core_type<tc>, window_params = [{transform_indices = @transform_0, window_bounds = array<i64: 784, 128>}, {pipeline_mode = #tpu.pipeline_mode<synchronous>, transform_indices = @transform_1, window_bounds = array<i64: 128, 128>}, {pipeline_mode = #tpu.pipeline_mode<synchronous>, transform_indices = @transform_2, window_bounds = array<i64: 1, 128>}, {pipeline_mode = #tpu.pipeline_mode<synchronous>, transform_indices = @transform_3, window_bounds = array<i64: 256, 128>}, {pipeline_mode = #tpu.pipeline_mode<synchronous>, transform_indices = @transform_4, window_bounds = array<i64: 1, 128>}, {pipeline_mode = #tpu.pipeline_mode<synchronous>, transform_indices = @transform_5, window_bounds = array<i64: 512, 128>}, {pipeline_mode = #tpu.pipeline_mode<synchronous>, transform_indices = @transform_6, window_bounds = array<i64: 1, 128>}, {pipeline_mode = #tpu.pipeline_mode<synchronous>, transform_indices = @transform_7, window_bounds = array<i64: 128, 128>}, {pipeline_mode = #tpu.pipeline_mode<synchronous>, transform_indices = @transform_8, window_bounds = array<i64: 1, 128>}, {pipeline_mode = #tpu.pipeline_mode<synchronous>, transform_indices = @transform_9, window_bounds = array<i64: 128, 128>}, {pipeline_mode = #tpu.pipeline_mode<synchronous>, transform_indices = @transform_10, window_bounds = array<i64: 1, 128>}, {transform_indices = @transform_11, window_bounds = array<i64: 1, 1, 128>}]} {
    %c0 = arith.constant 0 : index
    %c0_0 = arith.constant 0 : index
    %0 = vector.load %arg1[%c0, %c0_0] : memref<784x128xbf16, #tpu.memory_space<vmem>>, vector<784x128xbf16>
    %c0_1 = arith.constant 0 : index
    %c0_2 = arith.constant 0 : index
    %1 = vector.load %arg2[%c0_1, %c0_2] : memref<128x128xbf16, #tpu.memory_space<vmem>>, vector<128x128xbf16>
    %cst = arith.constant dense<0.000000e+00> : vector<784x128xf32>
    %2 = tpu.matmul %0, %1, %cst {dimension_numbers = #tpu.dot_dimension_numbers<[1], [0], [0], [1], [0, 0, 1, 1], [], []>} : vector<784x128xbf16>, vector<128x128xbf16>, vector<784x128xf32> -> vector<784x128xf32>
    %c0_3 = arith.constant 0 : index
    %c0_4 = arith.constant 0 : index
    %3 = vector.load %arg3[%c0_3, %c0_4] : memref<1x128xf32, #tpu.memory_space<vmem>>, vector<1x128xf32>
    %4 = vector.broadcast %3 : vector<1x128xf32> to vector<784x128xf32>
    %5 = arith.addf %2, %4 : vector<784x128xf32>
    %cst_5 = arith.constant 0.000000e+00 : f32
    %6 = vector.broadcast %cst_5 : f32 to vector<784x128xf32>
    %7 = arith.maximumf %5, %6 : vector<784x128xf32>
    %8 = vector.shape_cast %7 : vector<784x128xf32> to vector<1x28x28x128xf32>
    %9 = vector.shape_cast %8 : vector<1x28x28x128xf32> to vector<392x256xf32>
    %10 = vector.extract_strided_slice %9 {offsets = [0, 0], sizes = [392, 128], strides = [1, 1]} : vector<392x256xf32> to vector<392x128xf32>
    %11 = vector.extract_strided_slice %9 {offsets = [0, 128], sizes = [392, 128], strides = [1, 1]} : vector<392x256xf32> to vector<392x128xf32>
    %12 = arith.maximumf %10, %11 : vector<392x128xf32>
    %13 = vector.shape_cast %12 : vector<392x128xf32> to vector<14x3584xf32>
    %14 = vector.extract_strided_slice %13 {offsets = [0, 0], sizes = [14, 1792], strides = [1, 1]} : vector<14x3584xf32> to vector<14x1792xf32>
    %15 = vector.extract_strided_slice %13 {offsets = [0, 1792], sizes = [14, 1792], strides = [1, 1]} : vector<14x3584xf32> to vector<14x1792xf32>
    %16 = arith.maximumf %14, %15 : vector<14x1792xf32>
    %17 = vector.shape_cast %16 : vector<14x1792xf32> to vector<1x14x14x128xf32>
    %18 = vector.extract_strided_slice %17 {offsets = [0, 0, 0, 0], sizes = [1, 14, 14, 8], strides = [1, 1, 1, 1]} : vector<1x14x14x128xf32> to vector<1x14x14x8xf32>
    %19 = arith.truncf %18 : vector<1x14x14x8xf32> to vector<1x14x14x8xbf16>
    %20 = vector.extract_strided_slice %19 {offsets = [0, 0, 0, 0], sizes = [1, 10, 14, 8], strides = [1, 1, 1, 1]} : vector<1x14x14x8xbf16> to vector<1x10x14x8xbf16>
    %21 = vector.extract_strided_slice %19 {offsets = [0, 1, 0, 0], sizes = [1, 10, 14, 8], strides = [1, 1, 1, 1]} : vector<1x14x14x8xbf16> to vector<1x10x14x8xbf16>
    %22 = vector.extract_strided_slice %19 {offsets = [0, 2, 0, 0], sizes = [1, 10, 14, 8], strides = [1, 1, 1, 1]} : vector<1x14x14x8xbf16> to vector<1x10x14x8xbf16>
    %23 = vector.extract_strided_slice %19 {offsets = [0, 3, 0, 0], sizes = [1, 10, 14, 8], strides = [1, 1, 1, 1]} : vector<1x14x14x8xbf16> to vector<1x10x14x8xbf16>
    %24 = vector.extract_strided_slice %19 {offsets = [0, 4, 0, 0], sizes = [1, 10, 14, 8], strides = [1, 1, 1, 1]} : vector<1x14x14x8xbf16> to vector<1x10x14x8xbf16>
    %25 = tpu.concatenate %20, %21, %22, %23, %24 in 3 : vector<1x10x14x8xbf16>, vector<1x10x14x8xbf16>, vector<1x10x14x8xbf16>, vector<1x10x14x8xbf16>, vector<1x10x14x8xbf16> -> vector<1x10x14x40xbf16>
    %26 = vector.extract_strided_slice %25 {offsets = [0, 0, 0, 0], sizes = [1, 10, 10, 40], strides = [1, 1, 1, 1]} : vector<1x10x14x40xbf16> to vector<1x10x10x40xbf16>
    %27 = vector.extract_strided_slice %25 {offsets = [0, 0, 1, 0], sizes = [1, 10, 10, 40], strides = [1, 1, 1, 1]} : vector<1x10x14x40xbf16> to vector<1x10x10x40xbf16>
    %28 = vector.extract_strided_slice %25 {offsets = [0, 0, 2, 0], sizes = [1, 10, 10, 40], strides = [1, 1, 1, 1]} : vector<1x10x14x40xbf16> to vector<1x10x10x40xbf16>
    %29 = vector.extract_strided_slice %25 {offsets = [0, 0, 3, 0], sizes = [1, 10, 10, 40], strides = [1, 1, 1, 1]} : vector<1x10x14x40xbf16> to vector<1x10x10x40xbf16>
    %30 = vector.extract_strided_slice %25 {offsets = [0, 0, 4, 0], sizes = [1, 10, 10, 40], strides = [1, 1, 1, 1]} : vector<1x10x14x40xbf16> to vector<1x10x10x40xbf16>
    %31 = tpu.concatenate %26, %27, %28, %29, %30 in 3 : vector<1x10x10x40xbf16>, vector<1x10x10x40xbf16>, vector<1x10x10x40xbf16>, vector<1x10x10x40xbf16>, vector<1x10x10x40xbf16> -> vector<1x10x10x200xbf16>
    %32 = vector.shape_cast %31 : vector<1x10x10x200xbf16> to vector<100x200xbf16>
    %cst_6 = arith.constant 0.000000e+00 : bf16
    %33 = vector.broadcast %cst_6 : bf16 to vector<100x56xbf16>
    %34 = tpu.concatenate %32, %33 in 1 : vector<100x200xbf16>, vector<100x56xbf16> -> vector<100x256xbf16>
    %c0_7 = arith.constant 0 : index
    %c0_8 = arith.constant 0 : index
    %35 = vector.load %arg4[%c0_7, %c0_8] : memref<256x128xbf16, #tpu.memory_space<vmem>>, vector<256x128xbf16>
    %cst_9 = arith.constant dense<0.000000e+00> : vector<100x128xf32>
    %36 = tpu.matmul %34, %35, %cst_9 {dimension_numbers = #tpu.dot_dimension_numbers<[1], [0], [0], [1], [0, 0, 1, 1], [], []>} : vector<100x256xbf16>, vector<256x128xbf16>, vector<100x128xf32> -> vector<100x128xf32>
    %c0_10 = arith.constant 0 : index
    %c0_11 = arith.constant 0 : index
    %37 = vector.load %arg5[%c0_10, %c0_11] : memref<1x128xf32, #tpu.memory_space<vmem>>, vector<1x128xf32>
    %38 = vector.broadcast %37 : vector<1x128xf32> to vector<100x128xf32>
    %39 = arith.addf %36, %38 : vector<100x128xf32>
    %cst_12 = arith.constant 0.000000e+00 : f32
    %40 = vector.broadcast %cst_12 : f32 to vector<100x128xf32>
    %41 = arith.maximumf %39, %40 : vector<100x128xf32>
    %42 = vector.shape_cast %41 : vector<100x128xf32> to vector<1x10x10x128xf32>
    %43 = vector.shape_cast %42 : vector<1x10x10x128xf32> to vector<50x256xf32>
    %44 = vector.extract_strided_slice %43 {offsets = [0, 0], sizes = [50, 128], strides = [1, 1]} : vector<50x256xf32> to vector<50x128xf32>
    %45 = vector.extract_strided_slice %43 {offsets = [0, 128], sizes = [50, 128], strides = [1, 1]} : vector<50x256xf32> to vector<50x128xf32>
    %46 = arith.maximumf %44, %45 : vector<50x128xf32>
    %47 = vector.shape_cast %46 : vector<50x128xf32> to vector<5x1280xf32>
    %48 = vector.extract_strided_slice %47 {offsets = [0, 0], sizes = [5, 640], strides = [1, 1]} : vector<5x1280xf32> to vector<5x640xf32>
    %49 = vector.extract_strided_slice %47 {offsets = [0, 640], sizes = [5, 640], strides = [1, 1]} : vector<5x1280xf32> to vector<5x640xf32>
    %50 = arith.maximumf %48, %49 : vector<5x640xf32>
    %51 = vector.shape_cast %50 : vector<5x640xf32> to vector<1x5x5x128xf32>
    %52 = vector.extract_strided_slice %51 {offsets = [0, 0, 0, 0], sizes = [1, 5, 5, 16], strides = [1, 1, 1, 1]} : vector<1x5x5x128xf32> to vector<1x5x5x16xf32>
    %53 = vector.extract_strided_slice %52 {offsets = [0, 0, 0, 0], sizes = [1, 5, 1, 16], strides = [1, 1, 1, 1]} : vector<1x5x5x16xf32> to vector<1x5x1x16xf32>
    %54 = vector.shape_cast %53 : vector<1x5x1x16xf32> to vector<1x5x16xf32>
    %55 = vector.extract_strided_slice %52 {offsets = [0, 0, 1, 0], sizes = [1, 5, 1, 16], strides = [1, 1, 1, 1]} : vector<1x5x5x16xf32> to vector<1x5x1x16xf32>
    %56 = vector.shape_cast %55 : vector<1x5x1x16xf32> to vector<1x5x16xf32>
    %57 = vector.extract_strided_slice %52 {offsets = [0, 0, 2, 0], sizes = [1, 5, 1, 16], strides = [1, 1, 1, 1]} : vector<1x5x5x16xf32> to vector<1x5x1x16xf32>
    %58 = vector.shape_cast %57 : vector<1x5x1x16xf32> to vector<1x5x16xf32>
    %59 = vector.extract_strided_slice %52 {offsets = [0, 0, 3, 0], sizes = [1, 5, 1, 16], strides = [1, 1, 1, 1]} : vector<1x5x5x16xf32> to vector<1x5x1x16xf32>
    %60 = vector.shape_cast %59 : vector<1x5x1x16xf32> to vector<1x5x16xf32>
    %61 = vector.extract_strided_slice %52 {offsets = [0, 0, 4, 0], sizes = [1, 5, 1, 16], strides = [1, 1, 1, 1]} : vector<1x5x5x16xf32> to vector<1x5x1x16xf32>
    %62 = vector.shape_cast %61 : vector<1x5x1x16xf32> to vector<1x5x16xf32>
    %63 = tpu.concatenate %54, %56, %58, %60, %62 in 2 : vector<1x5x16xf32>, vector<1x5x16xf32>, vector<1x5x16xf32>, vector<1x5x16xf32>, vector<1x5x16xf32> -> vector<1x5x80xf32>
    %64 = vector.extract_strided_slice %63 {offsets = [0, 0, 0], sizes = [1, 1, 80], strides = [1, 1, 1]} : vector<1x5x80xf32> to vector<1x1x80xf32>
    %65 = vector.shape_cast %64 : vector<1x1x80xf32> to vector<1x80xf32>
    %66 = vector.extract_strided_slice %63 {offsets = [0, 1, 0], sizes = [1, 1, 80], strides = [1, 1, 1]} : vector<1x5x80xf32> to vector<1x1x80xf32>
    %67 = vector.shape_cast %66 : vector<1x1x80xf32> to vector<1x80xf32>
    %68 = vector.extract_strided_slice %63 {offsets = [0, 2, 0], sizes = [1, 1, 80], strides = [1, 1, 1]} : vector<1x5x80xf32> to vector<1x1x80xf32>
    %69 = vector.shape_cast %68 : vector<1x1x80xf32> to vector<1x80xf32>
    %70 = vector.extract_strided_slice %63 {offsets = [0, 3, 0], sizes = [1, 1, 80], strides = [1, 1, 1]} : vector<1x5x80xf32> to vector<1x1x80xf32>
    %71 = vector.shape_cast %70 : vector<1x1x80xf32> to vector<1x80xf32>
    %72 = vector.extract_strided_slice %63 {offsets = [0, 4, 0], sizes = [1, 1, 80], strides = [1, 1, 1]} : vector<1x5x80xf32> to vector<1x1x80xf32>
    %73 = vector.shape_cast %72 : vector<1x1x80xf32> to vector<1x80xf32>
    %74 = tpu.concatenate %65, %67, %69, %71, %73 in 1 : vector<1x80xf32>, vector<1x80xf32>, vector<1x80xf32>, vector<1x80xf32>, vector<1x80xf32> -> vector<1x400xf32>
    %cst_13 = arith.constant 0.000000e+00 : f32
    %75 = vector.broadcast %cst_13 : f32 to vector<1x112xf32>
    %76 = tpu.concatenate %74, %75 in 1 : vector<1x400xf32>, vector<1x112xf32> -> vector<1x512xf32>
    %77 = arith.truncf %76 : vector<1x512xf32> to vector<1x512xbf16>
    %c0_14 = arith.constant 0 : index
    %c0_15 = arith.constant 0 : index
    %78 = vector.load %arg6[%c0_14, %c0_15] : memref<512x128xbf16, #tpu.memory_space<vmem>>, vector<512x128xbf16>
    %cst_16 = arith.constant dense<0.000000e+00> : vector<1x128xf32>
    %79 = tpu.matmul %77, %78, %cst_16 {dimension_numbers = #tpu.dot_dimension_numbers<[1], [0], [0], [1], [0, 0, 1, 1], [], []>} : vector<1x512xbf16>, vector<512x128xbf16>, vector<1x128xf32> -> vector<1x128xf32>
    %c0_17 = arith.constant 0 : index
    %c0_18 = arith.constant 0 : index
    %80 = vector.load %arg7[%c0_17, %c0_18] : memref<1x128xf32, #tpu.memory_space<vmem>>, vector<1x128xf32>
    %81 = arith.addf %79, %80 : vector<1x128xf32>
    %cst_19 = arith.constant 0.000000e+00 : f32
    %82 = vector.broadcast %cst_19 : f32 to vector<1x128xf32>
    %83 = arith.maximumf %81, %82 : vector<1x128xf32>
    %84 = arith.truncf %83 : vector<1x128xf32> to vector<1x128xbf16>
    %c0_20 = arith.constant 0 : index
    %c0_21 = arith.constant 0 : index
    %85 = vector.load %arg8[%c0_20, %c0_21] : memref<128x128xbf16, #tpu.memory_space<vmem>>, vector<128x128xbf16>
    %cst_22 = arith.constant dense<0.000000e+00> : vector<1x128xf32>
    %86 = tpu.matmul %84, %85, %cst_22 {dimension_numbers = #tpu.dot_dimension_numbers<[1], [0], [0], [1], [0, 0, 1, 1], [], []>} : vector<1x128xbf16>, vector<128x128xbf16>, vector<1x128xf32> -> vector<1x128xf32>
    %c0_23 = arith.constant 0 : index
    %c0_24 = arith.constant 0 : index
    %87 = vector.load %arg9[%c0_23, %c0_24] : memref<1x128xf32, #tpu.memory_space<vmem>>, vector<1x128xf32>
    %88 = arith.addf %86, %87 : vector<1x128xf32>
    %cst_25 = arith.constant 0.000000e+00 : f32
    %89 = vector.broadcast %cst_25 : f32 to vector<1x128xf32>
    %90 = arith.maximumf %88, %89 : vector<1x128xf32>
    %91 = arith.truncf %90 : vector<1x128xf32> to vector<1x128xbf16>
    %c0_26 = arith.constant 0 : index
    %c0_27 = arith.constant 0 : index
    %92 = vector.load %arg10[%c0_26, %c0_27] : memref<128x128xbf16, #tpu.memory_space<vmem>>, vector<128x128xbf16>
    %cst_28 = arith.constant dense<0.000000e+00> : vector<1x128xf32>
    %93 = tpu.matmul %91, %92, %cst_28 {dimension_numbers = #tpu.dot_dimension_numbers<[1], [0], [0], [1], [0, 0, 1, 1], [], []>} : vector<1x128xbf16>, vector<128x128xbf16>, vector<1x128xf32> -> vector<1x128xf32>
    %c0_29 = arith.constant 0 : index
    %c0_30 = arith.constant 0 : index
    %94 = vector.load %arg11[%c0_29, %c0_30] : memref<1x128xf32, #tpu.memory_space<vmem>>, vector<1x128xf32>
    %95 = arith.addf %93, %94 : vector<1x128xf32>
    %c0_31 = arith.constant 0 : index
    %c0_32 = arith.constant 0 : index
    %c0_33 = arith.constant 0 : index
    %96 = vector.load %arg12[%c0_31, %c0_32, %c0_33] : memref<1x1x128xf32, #tpu.memory_space<vmem>>, vector<1x1x128xf32>
    %97 = vector.shape_cast %96 : vector<1x1x128xf32> to vector<1x128xf32>
    %98 = vector.shape_cast %95 : vector<1x128xf32> to vector<1x1x128xf32>
    tpu.vector_store %arg12[%c0_31, %c0_32, %c0_33], %98 {strides = array<i32>} : memref<1x1x128xf32, #tpu.memory_space<vmem>>, vector<1x1x128xf32>,
    return
  }
  func.func @transform_0(%arg0: i32) -> (i32, i32) {
    %c0_i32 = arith.constant 0 : i32
    %c0_i32_0 = arith.constant 0 : i32
    return %arg0, %c0_i32 : i32, i32
  }
  func.func @transform_1(%arg0: i32) -> (i32, i32) {
    %c0_i32 = arith.constant 0 : i32
    %c0_i32_0 = arith.constant 0 : i32
    %c0_i32_1 = arith.constant 0 : i32
    return %c0_i32, %c0_i32_0 : i32, i32
  }
  func.func @transform_2(%arg0: i32) -> (i32, i32) {
    %c0_i32 = arith.constant 0 : i32
    %c0_i32_0 = arith.constant 0 : i32
    %c0_i32_1 = arith.constant 0 : i32
    return %c0_i32, %c0_i32_0 : i32, i32
  }
  func.func @transform_3(%arg0: i32) -> (i32, i32) {
    %c0_i32 = arith.constant 0 : i32
    %c0_i32_0 = arith.constant 0 : i32
    %c0_i32_1 = arith.constant 0 : i32
    return %c0_i32, %c0_i32_0 : i32, i32
  }
  func.func @transform_4(%arg0: i32) -> (i32, i32) {
    %c0_i32 = arith.constant 0 : i32
    %c0_i32_0 = arith.constant 0 : i32
    %c0_i32_1 = arith.constant 0 : i32
    return %c0_i32, %c0_i32_0 : i32, i32
  }
  func.func @transform_5(%arg0: i32) -> (i32, i32) {
    %c0_i32 = arith.constant 0 : i32
    %c0_i32_0 = arith.constant 0 : i32
    %c0_i32_1 = arith.constant 0 : i32
    return %c0_i32, %c0_i32_0 : i32, i32
  }
  func.func @transform_6(%arg0: i32) -> (i32, i32) {
    %c0_i32 = arith.constant 0 : i32
    %c0_i32_0 = arith.constant 0 : i32
    %c0_i32_1 = arith.constant 0 : i32
    return %c0_i32, %c0_i32_0 : i32, i32
  }
  func.func @transform_7(%arg0: i32) -> (i32, i32) {
    %c0_i32 = arith.constant 0 : i32
    %c0_i32_0 = arith.constant 0 : i32
    %c0_i32_1 = arith.constant 0 : i32
    return %c0_i32, %c0_i32_0 : i32, i32
  }
  func.func @transform_8(%arg0: i32) -> (i32, i32) {
    %c0_i32 = arith.constant 0 : i32
    %c0_i32_0 = arith.constant 0 : i32
    %c0_i32_1 = arith.constant 0 : i32
    return %c0_i32, %c0_i32_0 : i32, i32
  }
  func.func @transform_9(%arg0: i32) -> (i32, i32) {
    %c0_i32 = arith.constant 0 : i32
    %c0_i32_0 = arith.constant 0 : i32
    %c0_i32_1 = arith.constant 0 : i32
    return %c0_i32, %c0_i32_0 : i32, i32
  }
  func.func @transform_10(%arg0: i32) -> (i32, i32) {
    %c0_i32 = arith.constant 0 : i32
    %c0_i32_0 = arith.constant 0 : i32
    %c0_i32_1 = arith.constant 0 : i32
    return %c0_i32, %c0_i32_0 : i32, i32
  }
  func.func @transform_11(%arg0: i32) -> (i32, i32, i32) {
    %c0_i32 = arith.constant 0 : i32
    %c0_i32_0 = arith.constant 0 : i32
    %c0_i32_1 = arith.constant 0 : i32
    return %arg0, %c0_i32, %c0_i32_0 : i32, i32, i32
  }
}

</mosaic_0001>

<bundles_post_ra>
// kernel: lenet5_forward.1
= control target key start
LH: loop header
LB: loop body
LE: loop exit
PB: predicated region body
PF: predicated region fallthrough
CT: control target
= control target key end

     0   :  { %s10384_s0 = inlined_call_operand.vmem [shape: bf16[1568,128], index: 0, kind: input, shape index: {}]   ;;  %s10385_s1 = inlined_call_operand.vmem [shape: bf16[128,128], index: 1, kind: input, shape index: {}]   ;;  %s10386_s2 = inlined_call_operand.vmem [shape: f32[1,128], index: 2, kind: input, shape index: {}]   ;;  %s10387_s3 = inlined_call_operand.vmem [shape: bf16[256,128], index: 3, kind: input, shape index: {}]   ;;  %s10388_s4 = inlined_call_operand.vmem [shape: f32[1,128], index: 4, kind: input, shape index: {}]   ;;  %s10389_s5 = inlined_call_operand.vmem [shape: bf16[512,128], index: 5, kind: input, shape index: {}]   ;;  %s10390_s6 = inlined_call_operand.vmem [shape: f32[1,128], index: 6, kind: input, shape index: {}]   ;;  %s10391_s7 = inlined_call_operand.vmem [shape: bf16[128,128], index: 7, kind: input, shape index: {}]   ;;  %s10392_s8 = inlined_call_operand.vmem [shape: f32[1,128], index: 8, kind: input, shape index: {}]   ;;  %s10393_s9 = inlined_call_operand.vmem [shape: bf16[128,128], index: 9, kind: input, shape index: {}]   ;;  %s10394_s10 = inlined_call_operand.vmem [shape: f32[1,128], index: 10, kind: input, shape index: {}]   ;;  %s10395_s11 = inlined_call_operand.hbm [shape: f32[2,1,128], index: 11, kind: output, shape index: {}]  }
   0x1   :  { %10424 = sst [smem:[#allocation19_spill]] %s10384_s0 }
   0x2   :  { %10425 = sst [smem:[#allocation20_spill]] %s10385_s1 }
   0x3   :  { %16 = vsyncpa [#allocation3], 0 }
   0x4   :  { %18 = vsyncpa [#allocation3 + $0x1], 0  ;;  %s7457_s17 = smov 0   ;;  %s7459_s18 = smov 0  }
   0x5   :  { %s7461_s19 = smov 0   ;;  %s7463_s20 = smov 0  }
   0x6 LB: > { %s7478_s21 = sadd.s32 4294967295, %s7379_s20   ;;  %s6548_s22 = sadd.s32 4294967294, %s7379_s20   ;;  %s7379_s20 = sphi %s7463_s20, %s10489_s20   ;;  %s7375_s19 = sphi %s7461_s19, %s10488_s19   ;;  %s7371_s18 = sphi %s7459_s18, %s10487_s18   ;;  %s7367_s17 = sphi %s7457_s17, %s10486_s17  }
   0x7   : > { %s7482_s23 = sadd.s32 1, %s7379_s20   ;;  %s267_s24 = sadd.s32 1, %s7375_s19 }
   0x8   : > { %s264_s25 = ssub.s32 %s7379_s20, %s7482_s23  ;;  %p277_p0 = scmp.ne.s32.totalorder %s7375_s19, %s7371_s18 }
   0x9   : > { %p265_p1 = scmp.eq.s32.totalorder %s264_s25, 0  ;;  %p278_p2 = scmp.eq.s32.totalorder %s7478_s21, 1 }
   0xa   : > { %p283_p3 = scmp.ne.s32.totalorder %s7371_s18, %s7367_s17  ;;  %p284_p4 = scmp.eq.s32.totalorder %s6548_s22, 1 }
   0xb   : > { %s7493_s26 = scalar_select %p265_p1, %s7375_s19, %s267_s24  }
   0xc   : > { %p7495_p5 = por %p278_p2, %p277_p0  ;;  %p7499_p6 = por %p284_p4, %p283_p3 }
   0xd   : > { %p6551_p7 = scmp.ge.s32.totalorder %s7379_s20, 1  ;;  %p341_p8 = scmp.lt.s32.totalorder %s7379_s20, 3 }
   0xf   : > { %p342_p9 = pnand %p6551_p7, %p341_p8 }
  0x11   : > { %345 = sbr.rel (%p342_p9) target bundleno = 2165 (0x875), region = 64 }
  0x18   : > { %s10428_s1 = sld [smem:[#allocation20_spill]]  ;;  %v10396_v1 = vmov 0.0   ;;  %vm7382_vm0 = vmmov 0   ;;  %s380_s14 = smul.u32 98, %s7478_s21  ;;  %v7383_v50 = vmov 1966171168   ;;  %v1376_v52 = vlaneseq }
  0x19   : > { %6872 = vmatprep.subr.bf16.mxu0 %v10396_v1  ;;  %7124 = vmatprep.subr.bf16.mxu1 %v10396_v1  ;;  %s10429_s0 = sld [smem:[#allocation19_spill]]  ;;  %v1374_v51 = vunpack.c.l.s4 %v7383_v50  ;;  %v7679_v55 = vld [vmem:[%s10386_s2] ss:$0 sm:$0xff]  ;;  %vm2647_vm1 = vcmask 1040384   ;;  %vm2650_vm2 = vcmask 1041409   ;;  %vm2653_vm3 = vcmask 1042434  }
  0x1a   : > { %6888 = vmatprep.mubr.msk.bf16.mxu0 %vm7382_vm0, %v10396_v1  ;;  %p381_p10 = scmp.lt.s32.totalorder %s380_s14, 195  ;;  %7028 = vmatprep.mubr.msk.bf16.mxu1 %vm7382_vm0, %v10396_v1  ;;  %v7674_v54 = vshrl.u32 %v1376_v52, 7  ;;  %vm2656_vm4 = vcmask 1043459   ;;  %vm2659_vm5 = vcmask 1044484   ;;  %vm2662_vm6 = vcmask 1045509   ;;  %s7387_s24 = smov 8  }
  0x1b   : > { %v1375_v53 = vunpack.c.0.s8 %v1374_v51  ;;  %vm2665_vm7 = vcmask 1046534   ;;  %vm2668_vm8 = vcmask 1047559   ;;  %s7388_s25 = smov 24   ;;  %s10419_s30 = smov 32   ;;  %vm4008_vm9 = vcmask 64512  }
  0x1c   : > { %s10491_s14 = smov (!%p381_p10, %s380_s14), 195  ;;  %vm4039_vm10 = vcmask 130048   ;;  %vm4060_vm11 = vcmask 195584   ;;  %vm4081_vm12 = vcmask 261120   ;;  %s10421_s15 = smov 80   ;;  %vm4302_vm13 = vcmask 326656  }
  0x1d   : > { %s6552_s22 = sshll.u32 %s10491_s14, 2  ;;  %v7685_v58 = vsub.s32 %v1375_v53, %v7674_v54  ;;  %s10417_s13 = smov 40   ;;  %vm4323_vm14 = vcmask 654336   ;;  %vm4344_vm15 = vcmask 982016  }
  0x1e   : > { %v7194_v0 = vld [vmem:[%s10428_s1] sm:$0xff]   ;;  %v7195_v2 = vld [vmem:[%s10428_s1 + $0x8] sm:$0xff]   ;;  %v7196_v3 = vld [vmem:[%s10428_s1 + $0x10] sm:$0xff]   ;;  %s10423_s12 = smov 64   ;;  %s7394_s16 = smov 48  }
  0x1f   : > { %6873 = vmatpush3.bf16.msra.mxu0 %v7194_v0  ;;  %7132 = vmatpush3.bf16.msra.mxu1 %v7194_v0  ;;  %s7528_s29 = scalar_lea.vmem %s10429_s0, %s6552_s22  ;;  %v7197_v4 = vld [vmem:[%s10428_s1 + $0x18] sm:$0xff]   ;;  %v7198_v5 = vld [vmem:[%s10428_s1 + $0x20] sm:$0xff]   ;;  %v7199_v6 = vld [vmem:[%s10428_s1 + $0x28] sm:$0xff]   ;;  %10430 = vst [vmem:[#allocation5_spill] sm:$0xff] %v7685_v58  ;;  %s10416_s22 = smov 16  }
  0x20   : > { %6874 = vmatprep.subr.bf16.mxu0 %v10396_v1  ;;  %7125 = vmatprep.subr.bf16.mxu1 %v10396_v1  ;;  %v7200_v7 = vld [vmem:[%s10428_s1 + $0x30] sm:$0xff]   ;;  %v7201_v8 = vld [vmem:[%s10428_s1 + $0x38] sm:$0xff]   ;;  %v7202_v9 = vld [vmem:[%s7528_s29] sm:$0xff]   ;;  %s10485_s0 = smov 64   ;;  %s7396_s1 = smov [#allocation2]  }
  0x21   : > { %v7203_v10 = vld [vmem:[%s7528_s29 + $0x8] sm:$0xff]   ;;  %v7204_v11 = vld [vmem:[%s7528_s29 + $0x10] sm:$0xff]   ;;  %v7205_v12 = vld [vmem:[%s7528_s29 + $0x18] sm:$0xff]  }
  0x22   : > { %v7206_v13 = vld [vmem:[%s7528_s29 + $0x20] sm:$0xff]   ;;  %v7207_v14 = vld [vmem:[%s7528_s29 + $0x28] sm:$0xff]   ;;  %v7224_v15 = vld [vmem:[%s7528_s29 + $0x118] sm:$0xff]  }
  0x23   : > { %6875 = vmatpush3.bf16.msra.mxu0 %v7195_v2  ;;  %7133 = vmatpush3.bf16.msra.mxu1 %v7195_v2  ;;  %v7208_v16 = vld [vmem:[%s7528_s29 + $0x30] sm:$0xff]   ;;  %v7226_v17 = vld [vmem:[%s7528_s29 + $0x120] sm:$0xff]   ;;  %v7209_v18 = vld [vmem:[%s7528_s29 + $0x38] sm:$0xff]  }
  0x24   : > { %6876 = vmatprep.subr.bf16.mxu0 %v10396_v1  ;;  %7126 = vmatprep.subr.bf16.mxu1 %v10396_v1  ;;  %v7228_v19 = vld [vmem:[%s7528_s29 + $0x128] sm:$0xff]   ;;  %v7210_v20 = vld [vmem:[%s7528_s29 + $0x40] sm:$0xff]   ;;  %v7230_v21 = vld [vmem:[%s7528_s29 + $0x130] sm:$0xff]  }
  0x25   : > { %v7211_v22 = vld [vmem:[%s7528_s29 + $0x48] sm:$0xff]   ;;  %v7232_v23 = vld [vmem:[%s7528_s29 + $0x138] sm:$0xff]   ;;  %v7212_v24 = vld [vmem:[%s7528_s29 + $0x50] sm:$0xff]  }
  0x26   : > { %v7234_v25 = vld [vmem:[%s7528_s29 + $0x140] sm:$0xff]   ;;  %v7213_v26 = vld [vmem:[%s7528_s29 + $0x58] sm:$0xff]   ;;  %v7236_v27 = vld [vmem:[%s7528_s29 + $0x148] sm:$0xff]  }
  0x27   : > { %6877 = vmatpush3.bf16.msra.mxu0 %v7196_v3  ;;  %7134 = vmatpush3.bf16.msra.mxu1 %v7196_v3  ;;  %v7214_v28 = vld [vmem:[%s7528_s29 + $0x60] sm:$0xff]   ;;  %v7238_v29 = vld [vmem:[%s7528_s29 + $0x150] sm:$0xff]   ;;  %v7215_v30 = vld [vmem:[%s7528_s29 + $0x68] sm:$0xff]  }
  0x28   : > { %6878 = vmatprep.subr.bf16.mxu0 %v10396_v1  ;;  %7127 = vmatprep.subr.bf16.mxu1 %v10396_v1  ;;  %v7240_v31 = vld [vmem:[%s7528_s29 + $0x158] sm:$0xff]   ;;  %v7216_v32 = vld [vmem:[%s7528_s29 + $0x70] sm:$0xff]   ;;  %v7242_v33 = vld [vmem:[%s7528_s29 + $0x160] sm:$0xff]  }
  0x29   : > { %v7217_v34 = vld [vmem:[%s7528_s29 + $0x78] sm:$0xff]   ;;  %v7244_v35 = vld [vmem:[%s7528_s29 + $0x168] sm:$0xff]   ;;  %v7218_v36 = vld [vmem:[%s7528_s29 + $0x80] sm:$0xff]  }
  0x2a   : > { %v7246_v37 = vld [vmem:[%s7528_s29 + $0x170] sm:$0xff]   ;;  %v7219_v38 = vld [vmem:[%s7528_s29 + $0x88] sm:$0xff]   ;;  %v7248_v39 = vld [vmem:[%s7528_s29 + $0x178] sm:$0xff]  }
  0x2b   : > { %6879 = vmatpush3.bf16.msra.mxu0 %v7197_v4  ;;  %7135 = vmatpush3.bf16.msra.mxu1 %v7197_v4  ;;  %v7220_v40 = vld [vmem:[%s7528_s29 + $0x90] sm:$0xff]   ;;  %v7250_v41 = vld [vmem:[%s7528_s29 + $0x180] sm:$0xff]   ;;  %v7221_v42 = vld [vmem:[%s7528_s29 + $0x98] sm:$0xff]  }
  0x2c   : > { %6880 = vmatprep.subr.bf16.mxu0 %v10396_v1  ;;  %7128 = vmatprep.subr.bf16.mxu1 %v10396_v1  ;;  %v7222_v43 = vld [vmem:[%s7528_s29 + $0xa0] sm:$0xff]   ;;  %v7223_v44 = vld [vmem:[%s7528_s29 + $0xa8] sm:$0xff]   ;;  %v7225_v45 = vld [vmem:[%s7528_s29 + $0xb0] sm:$0xff]  }
  0x2d   : > { %v7227_v46 = vld [vmem:[%s7528_s29 + $0xb8] sm:$0xff]   ;;  %v7229_v47 = vld [vmem:[%s7528_s29 + $0xc0] sm:$0xff]   ;;  %v7231_v48 = vld [vmem:[%s7528_s29 + $0xc8] sm:$0xff]  }
  0x2e   : > { %v7233_v49 = vld [vmem:[%s7528_s29 + $0xd0] sm:$0xff]   ;;  %v7235_v60 = vld [vmem:[%s7528_s29 + $0xd8] sm:$0xff]  }
  0x2f   : > { %6881 = vmatpush3.bf16.msra.mxu0 %v7198_v5  ;;  %7136 = vmatpush3.bf16.msra.mxu1 %v7198_v5 }
  0x30   : > { %6882 = vmatprep.subr.bf16.mxu0 %v10396_v1  ;;  %7129 = vmatprep.subr.bf16.mxu1 %v10396_v1 }
  0x33   : > { %6883 = vmatpush3.bf16.msra.mxu0 %v7199_v6  ;;  %7137 = vmatpush3.bf16.msra.mxu1 %v7199_v6 }
  0x34   : > { %6884 = vmatprep.subr.bf16.mxu0 %v10396_v1  ;;  %7130 = vmatprep.subr.bf16.mxu1 %v10396_v1 }
  0x37   : > { %6885 = vmatpush3.bf16.msra.mxu0 %v7200_v7  ;;  %7138 = vmatpush3.bf16.msra.mxu1 %v7200_v7 }
  0x38   : > { %6886 = vmatprep.subr.bf16.mxu0 %v10396_v1  ;;  %7131 = vmatprep.subr.bf16.mxu1 %v10396_v1 }
  0x3b   : > { %6887 = vmatpush3.bf16.msra.mxu0 %v7201_v8  ;;  %7139 = vmatpush3.bf16.msra.mxu1 %v7201_v8 }
  0x3e   : > { %6889 = vmatmul.mubr.bf16.vlgmr.msra.gmra.mrb[0].mxu0 %v7202_v9  ;;  %7029 = vmatmul.mubr.bf16.vlgmr.msra.gmra.mrb[0].mxu1 %v7224_v15 }
  0x3f   : > { %6892 = vmatprep.mubr.msk.bf16.mxu0 %vm7382_vm0, %v10396_v1  ;;  %7032 = vmatprep.mubr.msk.bf16.mxu1 %vm7382_vm0, %v10396_v1 }
  0x46   : > { %6893 = vmatmul.mubr.bf16.gmra.mrb[4].mxu0 %v7203_v10  ;;  %7033 = vmatmul.mubr.bf16.gmra.mrb[4].mxu1 %v7226_v17  ;;  %v7237_v10 = vld [vmem:[%s7528_s29 + $0xe0] sm:$0xff]  }
  0x47   : > { %6896 = vmatprep.mubr.msk.bf16.mxu0 %vm7382_vm0, %v10396_v1  ;;  %7036 = vmatprep.mubr.msk.bf16.mxu1 %vm7382_vm0, %v10396_v1 }
  0x4e   : > { %6897 = vmatmul.mubr.bf16.gmra.mrb[8].mxu0 %v7204_v11  ;;  %7037 = vmatmul.mubr.bf16.gmra.mrb[8].mxu1 %v7228_v19 }
  0x4f   : > { %6900 = vmatprep.mubr.msk.bf16.mxu0 %vm7382_vm0, %v10396_v1  ;;  %7040 = vmatprep.mubr.msk.bf16.mxu1 %vm7382_vm0, %v10396_v1 }
  0x56   : > { %6901 = vmatmul.mubr.bf16.gmra.mrb[12].mxu0 %v7205_v12  ;;  %7041 = vmatmul.mubr.bf16.gmra.mrb[12].mxu1 %v7230_v21 }
  0x57   : > { %6904 = vmatprep.mubr.msk.bf16.mxu0 %vm7382_vm0, %v10396_v1  ;;  %7044 = vmatprep.mubr.msk.bf16.mxu1 %vm7382_vm0, %v10396_v1 }
  0x5e   : > { %6905 = vmatmul.mubr.bf16.gmra.mrb[16].mxu0 %v7206_v13  ;;  %7045 = vmatmul.mubr.bf16.gmra.mrb[16].mxu1 %v7232_v23 }
  0x5f   : > { %6908 = vmatprep.mubr.msk.bf16.mxu0 %vm7382_vm0, %v10396_v1  ;;  %7048 = vmatprep.mubr.msk.bf16.mxu1 %vm7382_vm0, %v10396_v1 }
  0x66   : > { %6909 = vmatmul.mubr.bf16.gmra.mrb[20].mxu0 %v7207_v14  ;;  %7049 = vmatmul.mubr.bf16.gmra.mrb[20].mxu1 %v7234_v25 }
  0x67   : > { %6912 = vmatprep.mubr.msk.bf16.mxu0 %vm7382_vm0, %v10396_v1  ;;  %7052 = vmatprep.mubr.msk.bf16.mxu1 %vm7382_vm0, %v10396_v1 }
  0x6e   : > { %6913 = vmatmul.mubr.bf16.gmra.mrb[24].mxu0 %v7208_v16  ;;  %7053 = vmatmul.mubr.bf16.gmra.mrb[24].mxu1 %v7236_v27 }
  0x6f   : > { %6916 = vmatprep.mubr.msk.bf16.mxu0 %vm7382_vm0, %v10396_v1  ;;  %7056 = vmatprep.mubr.msk.bf16.mxu1 %vm7382_vm0, %v10396_v1 }
  0x76   : > { %6917 = vmatmul.mubr.bf16.gmra.mrb[28].mxu0 %v7209_v18  ;;  %7057 = vmatmul.mubr.bf16.gmra.mrb[28].mxu1 %v7238_v29 }
  0x77   : > { %6920 = vmatprep.mubr.msk.bf16.mxu0 %vm7382_vm0, %v10396_v1  ;;  %7060 = vmatprep.mubr.msk.bf16.mxu1 %vm7382_vm0, %v10396_v1 }
  0x7e   : > { %6921 = vmatmul.mubr.bf16.gmra.mrb[32].mxu0 %v7210_v20  ;;  %7061 = vmatmul.mubr.bf16.gmra.mrb[32].mxu1 %v7240_v31 }
  0x7f   : > { %6924 = vmatprep.mubr.msk.bf16.mxu0 %vm7382_vm0, %v10396_v1  ;;  %7064 = vmatprep.mubr.msk.bf16.mxu1 %vm7382_vm0, %v10396_v1 }
  0x86   : > { %6925 = vmatmul.mubr.bf16.gmra.mrb[36].mxu0 %v7211_v22  ;;  %7065 = vmatmul.mubr.bf16.gmra.mrb[36].mxu1 %v7242_v33 }
  0x87   : > { %6928 = vmatprep.mubr.msk.bf16.mxu0 %vm7382_vm0, %v10396_v1  ;;  %7068 = vmatprep.mubr.msk.bf16.mxu1 %vm7382_vm0, %v10396_v1 }
  0x8e   : > { %6929 = vmatmul.mubr.bf16.gmra.mrb[40].mxu0 %v7212_v24  ;;  %7069 = vmatmul.mubr.bf16.gmra.mrb[40].mxu1 %v7244_v35 }
  0x8f   : > { %6932 = vmatprep.mubr.msk.bf16.mxu0 %vm7382_vm0, %v10396_v1  ;;  %7072 = vmatprep.mubr.msk.bf16.mxu1 %vm7382_vm0, %v10396_v1 }
  0x96   : > { %6933 = vmatmul.mubr.bf16.gmra.mrb[44].mxu0 %v7213_v26  ;;  %7073 = vmatmul.mubr.bf16.gmra.mrb[44].mxu1 %v7246_v37  ;;  %v7239_v26 = vld [vmem:[%s7528_s29 + $0xe8] sm:$0xff]  }
  0x97   : > { %6936 = vmatprep.mubr.msk.bf16.mxu0 %vm7382_vm0, %v10396_v1  ;;  %7076 = vmatprep.mubr.msk.bf16.mxu1 %vm7382_vm0, %v10396_v1 }
  0x9e   : > { %6937 = vmatmul.mubr.bf16.gmra.mrb[48].mxu0 %v7214_v28  ;;  %7077 = vmatmul.mubr.bf16.gmra.mrb[48].mxu1 %v7248_v39 }
  0x9f   : > { %6940 = vmatprep.mubr.msk.bf16.mxu0 %vm7382_vm0, %v10396_v1  ;;  %7080 = vmatprep.mubr.msk.bf16.mxu1 %vm7382_vm0, %v10396_v1 }
  0xa6   : > { %6941 = vmatmul.mubr.bf16.gmra.mrb[52].mxu0 %v7215_v30  ;;  %7081 = vmatmul.mubr.bf16.gmra.mrb[52].mxu1 %v7250_v41 }
  0xa7   : > { %6944 = vmatprep.mubr.msk.bf16.mxu0 %vm7382_vm0, %v10396_v1 }
  0xae   : > { %6945 = vmatmul.mubr.bf16.gmra.mrb[56].mxu0 %v7216_v32 }
  0xaf   : > { %6948 = vmatprep.mubr.msk.bf16.mxu0 %vm7382_vm0, %v10396_v1 }
  0xb6   : > { %6949 = vmatmul.mubr.bf16.gmra.mrb[60].mxu0 %v7217_v34 }
  0xb7   : > { %6952 = vmatprep.mubr.msk.bf16.mxu0 %vm7382_vm0, %v10396_v1 }
  0xbe   : > { %6953 = vmatmul.mubr.bf16.gmra.mrb[64].mxu0 %v7218_v36 }
  0xbf   : > { %6956 = vmatprep.mubr.msk.bf16.mxu0 %vm7382_vm0, %v10396_v1 }
  0xc6   : > { %6957 = vmatmul.mubr.bf16.gmra.mrb[68].mxu0 %v7219_v38 }
  0xc7   : > { %6960 = vmatprep.mubr.msk.bf16.mxu0 %vm7382_vm0, %v10396_v1 }
  0xce   : > { %6961 = vmatmul.mubr.bf16.gmra.mrb[72].mxu0 %v7220_v40 }
  0xcf   : > { %6964 = vmatprep.mubr.msk.bf16.mxu0 %vm7382_vm0, %v10396_v1 }
  0xd6   : > { %6965 = vmatmul.mubr.bf16.gmra.mrb[76].mxu0 %v7221_v42 }
  0xd7   : > { %6968 = vmatprep.mubr.msk.bf16.mxu0 %vm7382_vm0, %v10396_v1 }
  0xde   : > { %6969 = vmatmul.mubr.bf16.gmra.mrb[80].mxu0 %v7222_v43  ;;  %v7241_v43 = vld [vmem:[%s7528_s29 + $0xf0] sm:$0xff]  }
  0xdf   : > { %6972 = vmatprep.mubr.msk.bf16.mxu0 %vm7382_vm0, %v10396_v1 }
  0xe6   : > { %6973 = vmatmul.mubr.bf16.gmra.mrb[84].mxu0 %v7223_v44 }
  0xe7   : > { %6976 = vmatprep.mubr.msk.bf16.mxu0 %vm7382_vm0, %v10396_v1 }
  0xee   : > { %6977 = vmatmul.mubr.bf16.gmra.mrb[88].mxu0 %v7225_v45 }
  0xef   : > { %6980 = vmatprep.mubr.msk.bf16.mxu0 %vm7382_vm0, %v10396_v1 }
  0xf6   : > { %6981 = vmatmul.mubr.bf16.gmra.mrb[92].mxu0 %v7227_v46 }
  0xf7   : > { %6984 = vmatprep.mubr.msk.bf16.mxu0 %vm7382_vm0, %v10396_v1 }
  0xfe   : > { %6985 = vmatmul.mubr.bf16.gmra.mrb[96].mxu0 %v7229_v47 }
  0xff   : > { %6988 = vmatprep.mubr.msk.bf16.mxu0 %vm7382_vm0, %v10396_v1 }
 0x106   : > { %6989 = vmatmul.mubr.bf16.gmra.mrb[100].mxu0 %v7231_v48 }
 0x107   : > { %6992 = vmatprep.mubr.msk.bf16.mxu0 %vm7382_vm0, %v10396_v1 }
 0x10e   : > { %6993 = vmatmul.mubr.bf16.gmra.mrb[104].mxu0 %v7233_v49 }
 0x10f   : > { %6996 = vmatprep.mubr.msk.bf16.mxu0 %vm7382_vm0, %v10396_v1 }
 0x111   : > { %v884_v56 = vpop.f32.mrb[0].mxu0 }
 0x112   : > { %v885_v57 = vadd.f32 %v7679_v55, %v884_v56  ;;  %v6890_v59 = vpop.f32.mrb[1].mxu0 }
 0x113   : > { %v887_v61 = vpop.f32.mrb[2].mxu0 }
 0x114   : > { %v1275_v62 = vmax.f32 %v885_v57, 0.0  ;;  %v888_v63 = vadd.f32 %v7679_v55, %v887_v61  ;;  %v6891_v0 = vpop.f32.mrb[3].mxu0 }
 0x116   : > { %v1379_v2 = vrot.slane %v1275_v62, %v7685_v58  ;;  %v1276_v3 = vmax.f32 %v888_v63, 0.0  ;;  %6997 = vmatmul.mubr.bf16.gmra.mrb[108].mxu0 %v7235_v60 }
 0x117   : > { %7000 = vmatprep.mubr.msk.bf16.mxu0 %vm7382_vm0, %v10396_v1 }
 0x118   : > { %v2157_v4 = vrot.slane %v1379_v2, 4  ;;  %v1386_v5 = vrot.slane %v1276_v3, %v7685_v58 }
 0x119   : > { %v892_v6 = vpop.f32.mrb[4].mxu0 }
 0x11a   : > { %v2158_v7 = vrot.slane %v1386_v5, 4  ;;  %v893_v8 = vadd.f32 %v7679_v55, %v892_v6  ;;  %v6894_v9 = vpop.f32.mrb[5].mxu0  ;;  %v2353_v12 = vmax.f32 %v1379_v2, %v2157_v4 }
 0x11b   : > { %v895_v11 = vpop.f32.mrb[6].mxu0 }
 0x11c   : > { %v2354_v13 = vmax.f32 %v1386_v5, %v2158_v7  ;;  %v1277_v14 = vmax.f32 %v893_v8, 0.0  ;;  %v896_v15 = vadd.f32 %v7679_v55, %v895_v11  ;;  %v6895_v16 = vpop.f32.mrb[7].mxu0 }
 0x11e   : > { %v7696_v17 = vcombine.low %v2353_v12, %v2354_v13  ;;  %v1393_v18 = vrot.slane %v1277_v14, %v7685_v58  ;;  %v1278_v19 = vmax.f32 %v896_v15, 0.0  ;;  %7001 = vmatmul.mubr.bf16.gmra.mrb[112].mxu0 %v7237_v10 }
 0x11f   : > { %7004 = vmatprep.mubr.msk.bf16.mxu0 %vm7382_vm0, %v10396_v1 }
 0x120   : > { %v2159_v20 = vrot.slane %v1393_v18, 4  ;;  %v1400_v21 = vrot.slane %v1278_v19, %v7685_v58  ;;  %v2670_v39 = vrot.slane %v7696_v17, 1  ;;  %v2685_v45 = vrot.slane %v7696_v17, 2 }
 0x121   : > { %v900_v22 = vpop.f32.mrb[8].mxu0  ;;  %v2700_v46 = vrot.slane %v7696_v17, 3  ;;  %v2715_v47 = vrot.slane %v7696_v17, 4  ;;  %v2730_v48 = vrot.slane %v7696_v17, 5  ;;  %v7721_v56 = vsel %vm2647_vm1, %v7696_v17, 0.0 }
 0x122   : > { %v2160_v23 = vrot.slane %v1400_v21, 4  ;;  %v901_v24 = vadd.f32 %v7679_v55, %v900_v22  ;;  %v6898_v25 = vpop.f32.mrb[9].mxu0  ;;  %v2355_v28 = vmax.f32 %v1393_v18, %v2159_v20  ;;  %v7724_v57 = vsel %vm2647_vm1, %v2670_v39, 0.0 }
 0x123   : > { %v903_v27 = vpop.f32.mrb[10].mxu0  ;;  %v2745_v59 = vrot.slane %v7696_v17, 6  ;;  %v2760_v63 = vrot.slane %v7696_v17, 7  ;;  %v2686_v0 = vsel %vm2647_vm1, %v2685_v45, 0.0  ;;  %v2701_v2 = vsel %vm2647_vm1, %v2700_v46, 0.0  ;;  %v7243_v17 = vld [vmem:[%s7528_s29 + $0xf8] sm:$0xff]  }
 0x124   : > { %v2356_v29 = vmax.f32 %v1400_v21, %v2160_v23  ;;  %v1279_v30 = vmax.f32 %v901_v24, 0.0  ;;  %v904_v31 = vadd.f32 %v7679_v55, %v903_v27  ;;  %v6899_v32 = vpop.f32.mrb[11].mxu0  ;;  %v7739_v7 = vsel %vm2647_vm1, %v2715_v47, 0.0 }
 0x125   : > { %v7742_v8 = vsel %vm2647_vm1, %v2730_v48, 0.0  ;;  %v7745_v10 = vsel %vm2647_vm1, %v2745_v59, 0.0  ;;  %v7753_v18 = vsel %vm2647_vm1, %v2760_v63, 0.0  ;;  %v7245_v59 = vld [vmem:[%s7528_s29 + $0x100] sm:$0xff]  }
 0x126   : > { %v7705_v33 = vcombine.low %v2355_v28, %v2356_v29  ;;  %v1407_v34 = vrot.slane %v1279_v30, %v7685_v58  ;;  %v1280_v35 = vmax.f32 %v904_v31, 0.0  ;;  %7005 = vmatmul.mubr.bf16.gmra.mrb[116].mxu0 %v7239_v26 }
 0x127   : > { %7008 = vmatprep.mubr.msk.bf16.mxu0 %vm7382_vm0, %v10396_v1 }
 0x128   : > { %v2161_v36 = vrot.slane %v1407_v34, 4  ;;  %v1414_v37 = vrot.slane %v1280_v35, %v7685_v58  ;;  %v2790_v3 = vrot.slane %v7705_v33, 1  ;;  %v2805_v4 = vrot.slane %v7705_v33, 2 }
 0x129   : > { %v908_v38 = vpop.f32.mrb[12].mxu0  ;;  %v2820_v11 = vrot.slane %v7705_v33, 3  ;;  %v2835_v12 = vrot.slane %v7705_v33, 4  ;;  %v2850_v13 = vrot.slane %v7705_v33, 5  ;;  %v2865_v19 = vrot.slane %v7705_v33, 6 }
 0x12a   : > { %v2162_v40 = vrot.slane %v1414_v37, 4  ;;  %v909_v41 = vadd.f32 %v7679_v55, %v908_v38  ;;  %v6902_v42 = vpop.f32.mrb[13].mxu0  ;;  %v2357_v49 = vmax.f32 %v1407_v34, %v2161_v36  ;;  %v7758_v21 = vsel %vm2647_vm1, %v7705_v33, 0.0 }
 0x12b   : > { %v911_v44 = vpop.f32.mrb[14].mxu0  ;;  %v7761_v22 = vsel %vm2647_vm1, %v2790_v3, 0.0  ;;  %v7764_v23 = vsel %vm2647_vm1, %v2805_v4, 0.0  ;;  %v2880_v24 = vrot.slane %v7705_v33, 7  ;;  %v7769_v30 = vsel %vm2647_vm1, %v2820_v11, 0.0  ;;  %v1164_v3 = vpop.f32.mrb[0].mxu1 }
 0x12c   : > { %v2358_v50 = vmax.f32 %v1414_v37, %v2162_v40  ;;  %v1281_v51 = vmax.f32 %v909_v41, 0.0  ;;  %v912_v52 = vadd.f32 %v7679_v55, %v911_v44  ;;  %v6903_v53 = vpop.f32.mrb[15].mxu0  ;;  %v7772_v31 = vsel %vm2647_vm1, %v2835_v12, 0.0 }
 0x12d   : > { %v7775_v32 = vsel %vm2647_vm1, %v2850_v13, 0.0  ;;  %v7782_v37 = vsel %vm2647_vm1, %v2865_v19, 0.0  ;;  %v7787_v38 = vsel %vm2647_vm1, %v2880_v24, 0.0  ;;  %v1165_v24 = vadd.f32 %v7679_v55, %v1164_v3 }
 0x12e   : > { %v7727_v60 = vcombine.low %v2357_v49, %v2358_v50  ;;  %v1421_v61 = vrot.slane %v1281_v51, %v7685_v58  ;;  %v1282_v62 = vmax.f32 %v912_v52, 0.0  ;;  %7009 = vmatmul.mubr.bf16.gmra.mrb[120].mxu0 %v7241_v43 }
 0x12f   : > { %7012 = vmatprep.mubr.msk.bf16.mxu0 %vm7382_vm0, %v10396_v1 }
 0x130   : > { %v2163_v5 = vrot.slane %v1421_v61, 4  ;;  %v1428_v6 = vrot.slane %v1282_v62, %v7685_v58  ;;  %v2910_v34 = vrot.slane %v7727_v60, 1  ;;  %v7791_v39 = vsel %vm2647_vm1, %v7727_v60, 0.0 }
 0x131   : > { %v916_v9 = vpop.f32.mrb[16].mxu0  ;;  %v2925_v40 = vrot.slane %v7727_v60, 2  ;;  %v2940_v41 = vrot.slane %v7727_v60, 3  ;;  %v2955_v49 = vrot.slane %v7727_v60, 4  ;;  %v2970_v50 = vrot.slane %v7727_v60, 5 }
 0x132   : > { %v2164_v14 = vrot.slane %v1428_v6, 4  ;;  %v917_v15 = vadd.f32 %v7679_v55, %v916_v9  ;;  %v6906_v16 = vpop.f32.mrb[17].mxu0  ;;  %v2359_v25 = vmax.f32 %v1421_v61, %v2163_v5  ;;  %v7800_v48 = vsel %vm2647_vm1, %v2910_v34, 0.0 }
 0x133   : > { %v919_v20 = vpop.f32.mrb[18].mxu0  ;;  %v3000_v9 = vrot.slane %v7727_v60, 7 }
 0x134   : > { %v2360_v26 = vmax.f32 %v1428_v6, %v2164_v14  ;;  %v1283_v27 = vmax.f32 %v917_v15, 0.0  ;;  %v920_v28 = vadd.f32 %v7679_v55, %v919_v20  ;;  %v6907_v29 = vpop.f32.mrb[19].mxu0  ;;  %v2985_v6 = vrot.slane %v7727_v60, 6  ;;  %v7030_v14 = vpop.f32.mrb[1].mxu1 }
 0x135   : > { %v1167_v16 = vpop.f32.mrb[2].mxu1  ;;  %v7848_v29 = vsel %vm2647_vm1, %v3000_v9, 0.0 }
 0x136   : > { %v7778_v35 = vcombine.low %v2359_v25, %v2360_v26  ;;  %v1435_v33 = vrot.slane %v1283_v27, %v7685_v58  ;;  %v1284_v36 = vmax.f32 %v920_v28, 0.0  ;;  %7013 = vmatmul.mubr.bf16.gmra.mrb[124].mxu0 %v7243_v17  ;;  %v7834_v17 = vsel %vm2647_vm1, %v2955_v49, 0.0  ;;  %v7031_v25 = vpop.f32.mrb[3].mxu1 }
 0x137   : > { %7016 = vmatprep.mubr.msk.bf16.mxu0 %vm7382_vm0, %v10396_v1  ;;  %v1168_v26 = vadd.f32 %v7679_v55, %v1167_v16  ;;  %v7842_v27 = vsel %vm2647_vm1, %v2970_v50, 0.0  ;;  %v7845_v28 = vsel %vm2647_vm1, %v2985_v6, 0.0  ;;  %v1172_v3 = vpop.f32.mrb[4].mxu1 }
 0x138   : > { %v2649_v42 = vrot.slane %v7778_v35, 3  ;;  %v2672_v43 = vrot.slane %v7778_v35, 4  ;;  %v2687_v44 = vrot.slane %v7778_v35, 5  ;;  %v2702_v45 = vrot.slane %v7778_v35, 6 }
 0x139   : > { %v2165_v46 = vrot.slane %v1435_v33, 4  ;;  %v924_v47 = vpop.f32.mrb[20].mxu0  ;;  %v1442_v51 = vrot.slane %v1284_v36, %v7685_v58  ;;  %v3030_v15 = vrot.slane %v7778_v35, 1 }
 0x13a   : > { %v925_v52 = vadd.f32 %v7679_v55, %v924_v47  ;;  %v6910_v53 = vpop.f32.mrb[21].mxu0  ;;  %v7811_v61 = vsel %vm2650_vm2, %v2649_v42, %v7721_v56  ;;  %v7815_v62 = vsel %vm2650_vm2, %v2672_v43, %v7724_v57  ;;  %v7818_v4 = vsel %vm2650_vm2, %v2687_v44, %v2686_v0 }
 0x13b   : > { %v927_v63 = vpop.f32.mrb[22].mxu0  ;;  %v7821_v5 = vsel %vm2650_vm2, %v2702_v45, %v2701_v2  ;;  %v2166_v11 = vrot.slane %v1442_v51, 4  ;;  %v7827_v57 = vsel %vm2647_vm1, %v2925_v40, 0.0  ;;  %v2361_v0 = vmax.f32 %v1435_v33, %v2165_v46 }
 0x13c   : > { %v1285_v12 = vmax.f32 %v925_v52, 0.0  ;;  %v928_v56 = vadd.f32 %v7679_v55, %v927_v63  ;;  %v6911_v13 = vpop.f32.mrb[23].mxu0  ;;  %v7831_v2 = vsel %vm2647_vm1, %v2940_v41, 0.0  ;;  %v1345_v40 = vmax.f32 %v1165_v24, 0.0  ;;  %v7247_v52 = vld [vmem:[%s7528_s29 + $0x108] sm:$0xff]  }
 0x13d   : > { %v2362_v60 = vmax.f32 %v1442_v51, %v2166_v11  ;;  %v7855_v41 = vsel %vm2647_vm1, %v7778_v35, 0.0  ;;  %v3045_v43 = vrot.slane %v7778_v35, 2  ;;  %v1346_v45 = vmax.f32 %v1168_v26, 0.0 }
 0x13e   : > { %v1449_v19 = vrot.slane %v1285_v12, %v7685_v58  ;;  %v1286_v20 = vmax.f32 %v928_v56, 0.0  ;;  %7017 = vmatmul.mubr.bf16.gmra.mrb[128].mxu0 %v7245_v59  ;;  %v7859_v46 = vsel %vm2647_vm1, %v3030_v15, 0.0  ;;  %v1869_v53 = vrot.slane %v1345_v40, %v7685_v58 }
 0x13f   : > { %7020 = vmatprep.mubr.msk.bf16.mxu0 %vm7382_vm0, %v10396_v1  ;;  %v7850_v34 = vcombine.low %v2361_v0, %v2362_v60  ;;  %v1876_v63 = vrot.slane %v1346_v45, %v7685_v58  ;;  %v7034_v0 = vpop.f32.mrb[5].mxu1 }
 0x140   : > { %v2167_v33 = vrot.slane %v1449_v19, 4  ;;  %v1456_v36 = vrot.slane %v1286_v20, %v7685_v58  ;;  %v2227_v15 = vrot.slane %v1869_v53, 4  ;;  %v1175_v60 = vpop.f32.mrb[6].mxu1 }
 0x141   : > { %v932_v44 = vpop.f32.mrb[24].mxu0  ;;  %v2717_v6 = vrot.slane %v7850_v34, 7  ;;  %v7869_v9 = vsel %vm2650_vm2, %v7850_v34, %v7742_v8  ;;  %v2747_v11 = vrot.slane %v7850_v34, 1  ;;  %v2228_v16 = vrot.slane %v1876_v63, 4 }
 0x142   : > { %v2363_v47 = vmax.f32 %v1449_v19, %v2167_v33  ;;  %v2168_v49 = vrot.slane %v1456_v36, 4  ;;  %v933_v50 = vadd.f32 %v7679_v55, %v932_v44  ;;  %v6914_v51 = vpop.f32.mrb[25].mxu0  ;;  %v2762_v8 = vrot.slane %v7850_v34, 2 }
 0x143   : > { %v935_v59 = vpop.f32.mrb[26].mxu0  ;;  %v7875_v19 = vsel %vm2650_vm2, %v2717_v6, %v7739_v7  ;;  %v7879_v20 = vsel %vm2650_vm2, %v2747_v11, %v7745_v10  ;;  %v2423_v33 = vmax.f32 %v1869_v53, %v2227_v15  ;;  %v2424_v40 = vmax.f32 %v1876_v63, %v2228_v16 }
 0x144   : > { %v2364_v12 = vmax.f32 %v1456_v36, %v2168_v49  ;;  %v1287_v56 = vmax.f32 %v933_v50, 0.0  ;;  %v936_v13 = vadd.f32 %v7679_v55, %v935_v59  ;;  %v6915_v14 = vpop.f32.mrb[27].mxu0  ;;  %v7035_v36 = vpop.f32.mrb[7].mxu1  ;;  %v1173_v7 = vadd.f32 %v7679_v55, %v1172_v3 }
 0x145   : > { %v1176_v10 = vadd.f32 %v7679_v55, %v1175_v60  ;;  %v7891_v44 = vsel %vm2650_vm2, %v2762_v8, %v7753_v18  ;;  %v2776_v49 = vrot.slane %v7850_v34, 3  ;;  %v2792_v50 = vrot.slane %v7850_v34, 4  ;;  %v1180_v0 = vpop.f32.mrb[8].mxu1 }
 0x146   : > { %v7882_v24 = vcombine.low %v2363_v47, %v2364_v12  ;;  %v1463_v25 = vrot.slane %v1287_v56, %v7685_v58  ;;  %v1288_v26 = vmax.f32 %v936_v13, 0.0  ;;  %7021 = vmatmul.mubr.bf16.gmra.mrb[132].mxu0 %v7247_v52  ;;  %v7896_v52 = vcombine.low %v2423_v33, %v2424_v40  ;;  %v7249_v12 = vld [vmem:[%s7528_s29 + $0x110] sm:$0xff]   ;;  %v7038_v33 = vpop.f32.mrb[9].mxu1 }
 0x147   : > { %7024 = vmatprep.mubr.msk.bf16.mxu0 %vm7382_vm0, %v10396_v1  ;;  %v1347_v53 = vmax.f32 %v1173_v7, 0.0  ;;  %v1348_v59 = vmax.f32 %v1176_v10, 0.0  ;;  %v7899_v63 = vsel %vm2647_vm1, %v3045_v43, 0.0  ;;  %v7905_v56 = vsel %vm2650_vm2, %v2776_v49, %v7758_v21  ;;  %v1183_v7 = vpop.f32.mrb[10].mxu1 }
 0x148   : > { %v2169_v45 = vrot.slane %v1463_v25, 4  ;;  %v1470_v47 = vrot.slane %v1288_v26, %v7685_v58  ;;  %10431 = vst [vmem:[#allocation6_spill] sm:$0xff] %v7896_v52  ;;  %v7911_v43 = vsel %vm2650_vm2, %v2792_v50, %v7761_v22  ;;  %v2807_v16 = vrot.slane %v7850_v34, 5 }
 0x149   : > { %v940_v51 = vpop.f32.mrb[28].mxu0  ;;  %v1883_v14 = vrot.slane %v1347_v53, %v7685_v58  ;;  %v1890_v15 = vrot.slane %v1348_v59, %v7685_v58  ;;  %v2822_v21 = vrot.slane %v7850_v34, 6  ;;  %v2837_v22 = vrot.slane %v7882_v24, 7 }
 0x14a   : > { %v2365_v3 = vmax.f32 %v1463_v25, %v2169_v45  ;;  %v2170_v6 = vrot.slane %v1470_v47, 4  ;;  %v941_v18 = vadd.f32 %v7679_v55, %v940_v51  ;;  %v6918_v11 = vpop.f32.mrb[29].mxu0  ;;  %v7918_v10 = vsel %vm2650_vm2, %v2807_v16, %v7764_v23  ;;  %v7039_v51 = vpop.f32.mrb[11].mxu1 }
 0x14b   : > { %v943_v13 = vpop.f32.mrb[30].mxu0  ;;  %v2229_v36 = vrot.slane %v1883_v14, 4  ;;  %v2230_v40 = vrot.slane %v1890_v15, 4  ;;  %v1181_v50 = vadd.f32 %v7679_v55, %v1180_v0  ;;  %v1184_v59 = vadd.f32 %v7679_v55, %v1183_v7  ;;  %v1188_v33 = vpop.f32.mrb[12].mxu1 }
 0x14c   : > { %v2366_v60 = vmax.f32 %v1470_v47, %v2170_v6  ;;  %v1289_v8 = vmax.f32 %v941_v18, 0.0  ;;  %v944_v25 = vadd.f32 %v7679_v55, %v943_v13  ;;  %v6919_v26 = vpop.f32.mrb[31].mxu0  ;;  %v7928_v23 = vsel %vm2650_vm2, %v2822_v21, %v7769_v30 }
 0x14d   : > { %v2425_v34 = vmax.f32 %v1883_v14, %v2229_v36  ;;  %v2426_v53 = vmax.f32 %v1890_v15, %v2230_v40  ;;  %v1349_v18 = vmax.f32 %v1181_v50, 0.0  ;;  %v7933_v11 = vsel %vm2650_vm2, %v2837_v22, %v7772_v31  ;;  %v7042_v50 = vpop.f32.mrb[13].mxu1 }
 0x14e   : > { %v7921_v45 = vcombine.low %v2365_v3, %v2366_v60  ;;  %v1477_v47 = vrot.slane %v1289_v8, %v7685_v58  ;;  %v1290_v49 = vmax.f32 %v944_v25, 0.0  ;;  %7025 = vmatmul.mubr.bf16.gmra.mrb[136].mxu0 %v7249_v12  ;;  %v1350_v0 = vmax.f32 %v1184_v59, 0.0 }
 0x14f   : > { %v7935_v13 = vcombine.low %v2425_v34, %v2426_v53  ;;  %v7940_v14 = vsel %vm2650_vm2, %v7882_v24, %v7775_v32  ;;  %v2867_v30 = vrot.slane %v7882_v24, 1  ;;  %v1897_v25 = vrot.slane %v1349_v18, %v7685_v58  ;;  %v1191_v34 = vpop.f32.mrb[14].mxu1 }
 0x150   : > { %v2171_v6 = vrot.slane %v1477_v47, 4  ;;  %v1484_v3 = vrot.slane %v1290_v49, %v7685_v58  ;;  %v1904_v26 = vrot.slane %v1350_v0, %v7685_v58  ;;  %v2882_v32 = vrot.slane %v7882_v24, 2  ;;  %v7043_v0 = vpop.f32.mrb[15].mxu1 }
 0x151   : > { %v948_v12 = vpop.f32.mrb[32].mxu0  ;;  %10432 = vst [vmem:[#allocation7_spill] sm:$0xff] %v7935_v13  ;;  %v7948_v21 = vsel %vm2650_vm2, %v2867_v30, %v7782_v37  ;;  %v2896_v36 = vrot.slane %v7882_v24, 3  ;;  %v2231_v49 = vrot.slane %v1897_v25, 4  ;;  %v2912_v59 = vrot.slane %v7882_v24, 4 }
 0x152   : > { %v2367_v15 = vmax.f32 %v1477_v47, %v2171_v6  ;;  %v2172_v16 = vrot.slane %v1484_v3, 4  ;;  %v949_v60 = vadd.f32 %v7679_v55, %v948_v12  ;;  %v6922_v8 = vpop.f32.mrb[33].mxu0  ;;  %v2232_v51 = vrot.slane %v1904_v26, 4 }
 0x153   : > { %v951_v31 = vpop.f32.mrb[34].mxu0  ;;  %v7955_v53 = vsel %vm2650_vm2, %v2882_v32, %v7787_v38  ;;  %v7959_v37 = vsel %vm2650_vm2, %v2896_v36, %v7791_v39  ;;  %v2427_v12 = vmax.f32 %v1897_v25, %v2231_v49  ;;  %v7969_v38 = vsel %vm2650_vm2, %v2912_v59, %v7800_v48 }
 0x154   : > { %v2368_v40 = vmax.f32 %v1484_v3, %v2172_v16  ;;  %v1291_v7 = vmax.f32 %v949_v60, 0.0  ;;  %v952_v22 = vadd.f32 %v7679_v55, %v951_v31  ;;  %v6923_v47 = vpop.f32.mrb[35].mxu0  ;;  %v2428_v30 = vmax.f32 %v1904_v26, %v2232_v51 }
 0x155   : > { %v1189_v16 = vadd.f32 %v7679_v55, %v1188_v33  ;;  %v1192_v60 = vadd.f32 %v7679_v55, %v1191_v34  ;;  %v1196_v34 = vpop.f32.mrb[16].mxu1 }
 0x156   : > { %v7962_v6 = vcombine.low %v2367_v15, %v2368_v40  ;;  %v1491_v3 = vrot.slane %v1291_v7, %v7685_v58  ;;  %v1292_v18 = vmax.f32 %v952_v22, 0.0  ;;  %v7974_v36 = vcombine.low %v2427_v12, %v2428_v30  ;;  %v7046_v30 = vpop.f32.mrb[17].mxu1 }
 0x157   : > { %v1351_v25 = vmax.f32 %v1189_v16, 0.0  ;;  %v1352_v26 = vmax.f32 %v1192_v60, 0.0 }
 0x158   : > { %v2173_v39 = vrot.slane %v1491_v3, 4  ;;  %v1498_v8 = vrot.slane %v1292_v18, %v7685_v58  ;;  %v2652_v15 = vrot.slane %v7962_v6, 6  ;;  %v2674_v31 = vrot.slane %v7962_v6, 7  ;;  %10433 = vst [vmem:[#allocation8_spill] sm:$0xff] %v7974_v36 }
 0x159   : > { %v956_v32 = vpop.f32.mrb[36].mxu0  ;;  %v7979_v33 = vsel %vm2653_vm3, %v7962_v6, %v7818_v4  ;;  %v1911_v50 = vrot.slane %v1351_v25, %v7685_v58  ;;  %v1918_v51 = vrot.slane %v1352_v26, %v7685_v58  ;;  %v2704_v4 = vrot.slane %v7962_v6, 1 }
 0x15a   : > { %v2369_v40 = vmax.f32 %v1491_v3, %v2173_v39  ;;  %v2174_v48 = vrot.slane %v1498_v8, 4  ;;  %v957_v7 = vadd.f32 %v7679_v55, %v956_v32  ;;  %v6926_v22 = vpop.f32.mrb[37].mxu0  ;;  %v7984_v47 = vsel %vm2653_vm3, %v2652_v15, %v7811_v61  ;;  %v1199_v39 = vpop.f32.mrb[18].mxu1 }
 0x15b   : > { %v959_v49 = vpop.f32.mrb[38].mxu0  ;;  %v7990_v59 = vsel %vm2653_vm3, %v2674_v31, %v7815_v62  ;;  %v2719_v61 = vrot.slane %v7962_v6, 2  ;;  %v2233_v16 = vrot.slane %v1911_v50, 4  ;;  %v2234_v60 = vrot.slane %v1918_v51, 4  ;;  %v7047_v26 = vpop.f32.mrb[19].mxu1 }
 0x15c   : > { %v2370_v3 = vmax.f32 %v1498_v8, %v2174_v48  ;;  %v1293_v18 = vmax.f32 %v957_v7, 0.0  ;;  %v960_v12 = vadd.f32 %v7679_v55, %v959_v49  ;;  %v6927_v0 = vpop.f32.mrb[39].mxu0  ;;  %v7997_v15 = vsel %vm2653_vm3, %v2704_v4, %v7821_v5  ;;  %v1204_v35 = vpop.f32.mrb[20].mxu1 }
 0x15d   : > { %v2733_v62 = vrot.slane %v7962_v6, 3  ;;  %v1197_v25 = vadd.f32 %v7679_v55, %v1196_v34  ;;  %v2429_v48 = vmax.f32 %v1911_v50, %v2233_v16  ;;  %v2430_v7 = vmax.f32 %v1918_v51, %v2234_v60 }
 0x15e   : > { %v8000_v31 = vcombine.low %v2369_v40, %v2370_v3  ;;  %v1505_v8 = vrot.slane %v1293_v18, %v7685_v58  ;;  %v1294_v32 = vmax.f32 %v960_v12, 0.0  ;;  %v1200_v22 = vadd.f32 %v7679_v55, %v1199_v39 }
 0x15f   : > { %v8007_v49 = vsel %vm2653_vm3, %v2719_v61, %v7875_v19  ;;  %v1353_v0 = vmax.f32 %v1197_v25, 0.0  ;;  %v8012_v40 = vsel %vm2653_vm3, %v2733_v62, %v7869_v9  ;;  %v8014_v18 = vcombine.low %v2429_v48, %v2430_v7  ;;  %v7050_v7 = vpop.f32.mrb[21].mxu1 }
 0x160   : > { %v2175_v5 = vrot.slane %v1505_v8, 4  ;;  %v1512_v4 = vrot.slane %v1294_v32, %v7685_v58  ;;  %v1354_v34 = vmax.f32 %v1200_v22, 0.0  ;;  %v2749_v50 = vrot.slane %v7962_v6, 4 }
 0x161   : > { %v964_v3 = vpop.f32.mrb[40].mxu0  ;;  %10434 = vst [vmem:[#allocation9_spill] sm:$0xff] %v8014_v18  ;;  %v8020_v51 = vsel %vm2647_vm1, %v2649_v42, 0.0  ;;  %v1925_v16 = vrot.slane %v1353_v0, %v7685_v58  ;;  %v2764_v48 = vrot.slane %v7962_v6, 5 }
 0x162   : > { %v2371_v19 = vmax.f32 %v1505_v8, %v2175_v5  ;;  %v2176_v12 = vrot.slane %v1512_v4, 4  ;;  %v965_v30 = vadd.f32 %v7679_v55, %v964_v3  ;;  %v6930_v61 = vpop.f32.mrb[41].mxu0  ;;  %v1932_v0 = vrot.slane %v1354_v34, %v7685_v58  ;;  %v1207_v3 = vpop.f32.mrb[22].mxu1 }
 0x163   : > { %v967_v9 = vpop.f32.mrb[42].mxu0  ;;  %v2235_v5 = vrot.slane %v1925_v16, 4  ;;  %v8034_v61 = vsel %vm2653_vm3, %v2749_v50, %v7879_v20  ;;  %v1208_v22 = vadd.f32 %v7679_v55, %v1207_v3  ;;  %v2778_v20 = vrot.slane %v8000_v31, 6 }
 0x164   : > { %v2372_v25 = vmax.f32 %v1512_v4, %v2176_v12  ;;  %v1295_v42 = vmax.f32 %v965_v30, 0.0  ;;  %v968_v8 = vadd.f32 %v7679_v55, %v967_v9  ;;  %v6931_v26 = vpop.f32.mrb[43].mxu0  ;;  %v1205_v30 = vadd.f32 %v7679_v55, %v1204_v35  ;;  %v7051_v9 = vpop.f32.mrb[23].mxu1 }
 0x165   : > { %v2431_v26 = vmax.f32 %v1925_v16, %v2235_v5  ;;  %v2236_v7 = vrot.slane %v1932_v0, 4  ;;  %v8046_v35 = vsel %vm2653_vm3, %v2764_v48, %v7891_v44  ;;  %v2794_v16 = vrot.slane %v8000_v31, 7 }
 0x166   : > { %v8036_v32 = vcombine.low %v2371_v19, %v2372_v25  ;;  %v1519_v4 = vrot.slane %v1295_v42, %v7685_v58  ;;  %v1296_v12 = vmax.f32 %v968_v8, 0.0  ;;  %v1355_v39 = vmax.f32 %v1205_v30, 0.0 }
 0x167   : > { %v2432_v19 = vmax.f32 %v1932_v0, %v2236_v7  ;;  %v1356_v25 = vmax.f32 %v1208_v22, 0.0  ;;  %v1212_v0 = vpop.f32.mrb[24].mxu1  ;;  %v8056_v22 = vsel %vm2653_vm3, %v2778_v20, %v7905_v56  ;;  %v8060_v44 = vsel %vm2653_vm3, %v2794_v16, %v7911_v43 }
 0x168   : > { %v2177_v34 = vrot.slane %v1519_v4, 4  ;;  %v1526_v62 = vrot.slane %v1296_v12, %v7685_v58  ;;  %v1939_v3 = vrot.slane %v1355_v39, %v7685_v58  ;;  %v2824_v56 = vrot.slane %v8000_v31, 1 }
 0x169   : > { %v972_v50 = vpop.f32.mrb[44].mxu0  ;;  %v8051_v30 = vcombine.low %v2431_v26, %v2432_v19  ;;  %v1946_v9 = vrot.slane %v1356_v25, %v7685_v58  ;;  %v8066_v25 = vsel %vm2653_vm3, %v8000_v31, %v7918_v10 }
 0x16a   : > { %v2373_v42 = vmax.f32 %v1519_v4, %v2177_v34  ;;  %v2178_v8 = vrot.slane %v1526_v62, 4  ;;  %v973_v6 = vadd.f32 %v7679_v55, %v972_v50  ;;  %v6934_v5 = vpop.f32.mrb[45].mxu0  ;;  %v2237_v39 = vrot.slane %v1939_v3, 4  ;;  %v7054_v50 = vpop.f32.mrb[25].mxu1 }
 0x16b   : > { %v975_v12 = vpop.f32.mrb[46].mxu0  ;;  %10435 = vst [vmem:[#allocation10_spill] sm:$0xff] %v8051_v30  ;;  %v2238_v26 = vrot.slane %v1946_v9, 4  ;;  %v1215_v19 = vpop.f32.mrb[26].mxu1  ;;  %v8077_v10 = vsel %vm2653_vm3, %v2824_v56, %v7928_v23 }
 0x16c   : > { %v2374_v48 = vmax.f32 %v1526_v62, %v2178_v8  ;;  %v1297_v4 = vmax.f32 %v973_v6, 0.0  ;;  %v976_v7 = vadd.f32 %v7679_v55, %v975_v12  ;;  %v6935_v34 = vpop.f32.mrb[47].mxu0  ;;  %v2433_v8 = vmax.f32 %v1939_v3, %v2237_v39  ;;  %v7055_v6 = vpop.f32.mrb[27].mxu1 }
 0x16d   : > { %v2434_v5 = vmax.f32 %v1946_v9, %v2238_v26  ;;  %v1213_v12 = vadd.f32 %v7679_v55, %v1212_v0  ;;  %v1216_v34 = vadd.f32 %v7679_v55, %v1215_v19 }
 0x16e   : > { %v8070_v43 = vcombine.low %v2373_v42, %v2374_v48  ;;  %v1533_v62 = vrot.slane %v1297_v4, %v7685_v58  ;;  %v1298_v16 = vmax.f32 %v976_v7, 0.0 }
 0x16f   : > { %v8082_v7 = vcombine.low %v2433_v8, %v2434_v5  ;;  %v1357_v3 = vmax.f32 %v1213_v12, 0.0  ;;  %v1358_v9 = vmax.f32 %v1216_v34, 0.0 }
 0x170   : > { %v2179_v42 = vrot.slane %v1533_v62, 4  ;;  %v1540_v48 = vrot.slane %v1298_v16, %v7685_v58  ;;  %v10398_v0 = vrot.slane %v8070_v43, 1  ;;  %v2676_v56 = vrot.slane %v8070_v43, 2  ;;  %v1220_v16 = vpop.f32.mrb[28].mxu1 }
 0x171   : > { %v980_v4 = vpop.f32.mrb[48].mxu0  ;;  %10436 = vst [vmem:[#allocation11_spill] sm:$0xff] %v8082_v7  ;;  %v1953_v1 = vrot.slane %v1357_v3, %v7685_v58  ;;  %v1960_v60 = vrot.slane %v1358_v9, %v7685_v58 }
 0x172   : > { %v2375_v39 = vmax.f32 %v1533_v62, %v2179_v42  ;;  %v2180_v26 = vrot.slane %v1540_v48, 4  ;;  %v981_v19 = vadd.f32 %v7679_v55, %v980_v4  ;;  %v6938_v23 = vpop.f32.mrb[49].mxu0  ;;  %v8093_v8 = vsel %vm2656_vm4, %v10398_v0, %v7984_v47  ;;  %v7058_v4 = vpop.f32.mrb[29].mxu1 }
 0x173   : > { %v983_v6 = vpop.f32.mrb[50].mxu0  ;;  %v2690_v62 = vrot.slane %v8070_v43, 3  ;;  %v8099_v3 = vsel %vm2656_vm4, %v2676_v56, %v7990_v59  ;;  %v2239_v9 = vrot.slane %v1953_v1, 4  ;;  %v2240_v23 = vrot.slane %v1960_v60, 4  ;;  %v1223_v50 = vpop.f32.mrb[30].mxu1 }
 0x174   : > { %v2376_v5 = vmax.f32 %v1540_v48, %v2180_v26  ;;  %v1299_v12 = vmax.f32 %v981_v19, 0.0  ;;  %v984_v34 = vadd.f32 %v7679_v55, %v983_v6  ;;  %v6939_v42 = vpop.f32.mrb[51].mxu0  ;;  %v2706_v47 = vrot.slane %v8070_v43, 4  ;;  %v7059_v6 = vpop.f32.mrb[31].mxu1 }
 0x175   : > { %v8103_v20 = vsel %vm2656_vm4, %v2690_v62, %v7979_v33  ;;  %v1221_v19 = vadd.f32 %v7679_v55, %v1220_v16  ;;  %v2435_v42 = vmax.f32 %v1953_v1, %v2239_v9  ;;  %v2436_v59 = vmax.f32 %v1960_v60, %v2240_v23 }
 0x176   : > { %v8106_v0 = vcombine.low %v2375_v39, %v2376_v5  ;;  %v1547_v48 = vrot.slane %v1299_v12, %v7685_v58  ;;  %v1300_v26 = vmax.f32 %v984_v34, 0.0  ;;  %v1224_v56 = vadd.f32 %v7679_v55, %v1223_v50 }
 0x177   : > { %v8113_v4 = vsel %vm2656_vm4, %v2706_v47, %v7997_v15  ;;  %v1359_v36 = vmax.f32 %v1221_v19, 0.0  ;;  %v8117_v12 = vcombine.low %v2435_v42, %v2436_v59  ;;  %v1228_v19 = vpop.f32.mrb[32].mxu1 }
 0x178   : > { %v2181_v33 = vrot.slane %v1547_v48, 4  ;;  %v1554_v62 = vrot.slane %v1300_v26, %v7685_v58  ;;  %v2721_v39 = vrot.slane %v8106_v0, 5  ;;  %v1360_v34 = vmax.f32 %v1224_v56, 0.0 }
 0x179   : > { %v988_v5 = vpop.f32.mrb[52].mxu0  ;;  %10437 = vst [vmem:[#allocation12_spill] sm:$0xff] %v8117_v12  ;;  %v2735_v16 = vrot.slane %v8106_v0, 6  ;;  %v2751_v1 = vrot.slane %v8106_v0, 7  ;;  %v1967_v23 = vrot.slane %v1359_v36, %v7685_v58 }
 0x17a   : > { %v2377_v60 = vmax.f32 %v1547_v48, %v2181_v33  ;;  %v2182_v50 = vrot.slane %v1554_v62, 4  ;;  %v989_v9 = vadd.f32 %v7679_v55, %v988_v5  ;;  %v6942_v15 = vpop.f32.mrb[53].mxu0  ;;  %v1974_v26 = vrot.slane %v1360_v34, %v7685_v58  ;;  %v7062_v34 = vpop.f32.mrb[33].mxu1 }
 0x17b   : > { %v991_v47 = vpop.f32.mrb[54].mxu0  ;;  %v8126_v6 = vsel %vm2656_vm4, %v2721_v39, %v8007_v49  ;;  %v8130_v42 = vsel %vm2656_vm4, %v2735_v16, %v8012_v40  ;;  %v8134_v48 = vsel %vm2656_vm4, %v2751_v1, %v8034_v61  ;;  %v2241_v5 = vrot.slane %v1967_v23, 4  ;;  %v1231_v12 = vpop.f32.mrb[34].mxu1 }
 0x17c   : > { %v2378_v59 = vmax.f32 %v1554_v62, %v2182_v50  ;;  %v1301_v56 = vmax.f32 %v989_v9, 0.0  ;;  %v992_v36 = vadd.f32 %v7679_v55, %v991_v47  ;;  %v6943_v33 = vpop.f32.mrb[55].mxu0  ;;  %v2242_v15 = vrot.slane %v1974_v26, 4  ;;  %v7063_v50 = vpop.f32.mrb[35].mxu1 }
 0x17d   : > { %v8140_v49 = vsel %vm2656_vm4, %v8106_v0, %v8046_v35  ;;  %v2780_v40 = vrot.slane %v8106_v0, 1  ;;  %v2796_v39 = vrot.slane %v8106_v0, 2  ;;  %v2437_v1 = vmax.f32 %v1967_v23, %v2241_v5 }
 0x17e   : > { %v8144_v61 = vcombine.low %v2377_v60, %v2378_v59  ;;  %v1561_v62 = vrot.slane %v1301_v56, %v7685_v58  ;;  %v1302_v16 = vmax.f32 %v992_v36, 0.0  ;;  %v2438_v9 = vmax.f32 %v1974_v26, %v2242_v15 }
 0x17f   : > { %v1229_v47 = vadd.f32 %v7679_v55, %v1228_v19  ;;  %v1232_v33 = vadd.f32 %v7679_v55, %v1231_v12  ;;  %v8151_v35 = vsel %vm2656_vm4, %v2780_v40, %v8056_v22  ;;  %v8156_v60 = vsel %vm2656_vm4, %v2796_v39, %v8060_v44 }
 0x180   : > { %v2183_v34 = vrot.slane %v1561_v62, 4  ;;  %v1568_v7 = vrot.slane %v1302_v16, %v7685_v58  ;;  %v2810_v59 = vrot.slane %v8106_v0, 3  ;;  %v8159_v56 = vcombine.low %v2437_v1, %v2438_v9  ;;  %v1236_v1 = vpop.f32.mrb[36].mxu1 }
 0x181   : > { %v996_v23 = vpop.f32.mrb[56].mxu0  ;;  %v1361_v26 = vmax.f32 %v1229_v47, 0.0  ;;  %v1362_v19 = vmax.f32 %v1232_v33, 0.0  ;;  %v2826_v12 = vrot.slane %v8106_v0, 4  ;;  %v10439_v0 = vrot.slane %v8000_v31, 2 }
 0x182   : > { %10438 = vst [vmem:[#allocation13_spill] sm:$0xff] %v8159_v56  ;;  %v2379_v36 = vmax.f32 %v1561_v62, %v2183_v34  ;;  %v2184_v5 = vrot.slane %v1568_v7, 4  ;;  %v997_v22 = vadd.f32 %v7679_v55, %v996_v23  ;;  %v6946_v15 = vpop.f32.mrb[57].mxu0  ;;  %v8165_v40 = vsel %vm2656_vm4, %v2810_v59, %v8066_v25  ;;  %v8180_v25 = vld [vmem:[%s10386_s2] ss:$0 sm:$0xff]  ;;  %v7066_v34 = vpop.f32.mrb[37].mxu1 }
 0x183   : > { %v999_v44 = vpop.f32.mrb[58].mxu0  ;;  %v1981_v39 = vrot.slane %v1361_v26, %v7685_v58  ;;  %v1988_v16 = vrot.slane %v1362_v19, %v7685_v58  ;;  %v8171_v50 = vsel %vm2656_vm4, %v2826_v12, %v8077_v10  ;;  %v2840_v55 = vsel %vm2653_vm3, %v10439_v0, %v7933_v11  ;;  %v1239_v26 = vpop.f32.mrb[38].mxu1 }
 0x184   : > { %v2380_v62 = vmax.f32 %v1568_v7, %v2184_v5  ;;  %v1303_v9 = vmax.f32 %v997_v22, 0.0  ;;  %v1000_v47 = vadd.f32 %v8180_v25, %v999_v44  ;;  %v6947_v33 = vpop.f32.mrb[59].mxu0  ;;  %v2841_v59 = vrot.slane %v8144_v61, 5  ;;  %v7067_v15 = vpop.f32.mrb[39].mxu1 }
 0x185   : > { %v2243_v10 = vrot.slane %v1981_v39, 4  ;;  %v2244_v23 = vrot.slane %v1988_v16, 4  ;;  %v2853_v19 = vrot.slane %v8000_v31, 3  ;;  %v2855_v11 = vrot.slane %v8144_v61, 6 }
 0x186   : > { %v8186_v7 = vcombine.low %v2379_v36, %v2380_v62  ;;  %v1575_v12 = vrot.slane %v1303_v9, %v7685_v58  ;;  %v1304_v5 = vmax.f32 %v1000_v47, 0.0  ;;  %v1237_v22 = vadd.f32 %v8180_v25, %v1236_v1 }
 0x187   : > { %v2439_v44 = vmax.f32 %v1981_v39, %v2243_v10  ;;  %v2440_v0 = vmax.f32 %v1988_v16, %v2244_v23  ;;  %v1240_v33 = vadd.f32 %v8180_v25, %v1239_v26  ;;  %v8192_v34 = vsel %vm2656_vm4, %v2841_v59, %v2840_v55 }
 0x188   : > { %v2185_v13 = vrot.slane %v1575_v12, 4  ;;  %v1582_v30 = vrot.slane %v1304_v5, %v7685_v58  ;;  %v1363_v18 = vmax.f32 %v1237_v22, 0.0  ;;  %v2854_v36 = vsel %vm2653_vm3, %v2853_v19, %v7940_v14  ;;  %v1244_v19 = vpop.f32.mrb[40].mxu1 }
 0x189   : > { %v1004_v62 = vpop.f32.mrb[60].mxu0  ;;  %v8197_v9 = vcombine.low %v2439_v44, %v2440_v0  ;;  %v1364_v47 = vmax.f32 %v1240_v33, 0.0  ;;  %v8200_v39 = vsel %vm2656_vm4, %v2855_v11, %v2854_v36  ;;  %v2869_v16 = vrot.slane %v8000_v31, 4  ;;  %v7070_v33 = vpop.f32.mrb[41].mxu1 }
 0x18a   : > { %v2381_v1 = vmax.f32 %v1575_v12, %v2185_v13  ;;  %v2186_v55 = vrot.slane %v1582_v30, 4  ;;  %v1005_v59 = vadd.f32 %v8180_v25, %v1004_v62  ;;  %v6950_v10 = vpop.f32.mrb[61].mxu0  ;;  %v1995_v23 = vrot.slane %v1363_v18, %v7685_v58 }
 0x18b   : > { %10440 = vst [vmem:[#allocation14_spill] sm:$0xff] %v8197_v9  ;;  %v1007_v26 = vpop.f32.mrb[62].mxu0  ;;  %v2002_v14 = vrot.slane %v1364_v47, %v7685_v58  ;;  %v2870_v5 = vsel %vm2653_vm3, %v2869_v16, %v7948_v21  ;;  %v2871_v22 = vrot.slane %v8144_v61, 7  ;;  %v2884_v11 = vrot.slane %v8000_v31, 5 }
 0x18c   : > { %v2382_v15 = vmax.f32 %v1582_v30, %v2186_v55  ;;  %v1305_v44 = vmax.f32 %v1005_v59, 0.0  ;;  %v1008_v13 = vadd.f32 %v8180_v25, %v1007_v26  ;;  %v6951_v12 = vpop.f32.mrb[63].mxu0  ;;  %v2245_v0 = vrot.slane %v1995_v23, 4 }
 0x18d   : > { %v2246_v36 = vrot.slane %v2002_v14, 4  ;;  %v8212_v18 = vsel %vm2656_vm4, %v2871_v22, %v2870_v5  ;;  %v2885_v62 = vsel %vm2653_vm3, %v2884_v11, %v7955_v53  ;;  %v2898_v21 = vrot.slane %v8036_v32, 6 }
 0x18e   : > { %v2563_v47 = vcombine.low %v2381_v1, %v2382_v15  ;;  %v1589_v16 = vrot.slane %v1305_v44, %v7685_v58  ;;  %v1306_v31 = vmax.f32 %v1008_v13, 0.0  ;;  %v2441_v30 = vmax.f32 %v1995_v23, %v2245_v0 }
 0x18f   : > { %v2442_v55 = vmax.f32 %v2002_v14, %v2246_v36  ;;  %v1245_v59 = vadd.f32 %v8180_v25, %v1244_v19  ;;  %v8221_v10 = vsel %vm2656_vm4, %v8144_v61, %v2885_v62  ;;  %v8225_v26 = vsel %vm2653_vm3, %v2898_v21, %v7959_v37 }
 0x190   : > { %v2187_v5 = vrot.slane %v1589_v16, 4  ;;  %v1596_v53 = vrot.slane %v1306_v31, %v7685_v58  ;;  %v2658_v22 = vrot.slane %v2563_v47, 4  ;;  %v2678_v1 = vrot.slane %v2563_v47, 5 }
 0x191   : > { %v1012_v11 = vpop.f32.mrb[64].mxu0  ;;  %v8228_v15 = vcombine.low %v2441_v30, %v2442_v55  ;;  %v1365_v23 = vmax.f32 %v1245_v59, 0.0  ;;  %v2692_v14 = vrot.slane %v2563_v47, 6  ;;  %v2708_v44 = vrot.slane %v2563_v47, 7 }
 0x192   : > { %v2383_v19 = vmax.f32 %v1589_v16, %v2187_v5  ;;  %v2188_v13 = vrot.slane %v1596_v53, 4  ;;  %v1013_v12 = vadd.f32 %v8180_v25, %v1012_v11  ;;  %v6954_v0 = vpop.f32.mrb[65].mxu0  ;;  %v8233_v37 = vsel %vm2659_vm5, %v2658_v22, %v8093_v8 }
 0x193   : > { %10441 = vst [vmem:[#allocation15_spill] sm:$0xff] %v8228_v15  ;;  %v1015_v33 = vpop.f32.mrb[66].mxu0  ;;  %v2009_v36 = vrot.slane %v1365_v23, %v7685_v58  ;;  %v8238_v62 = vsel %vm2659_vm5, %v2678_v1, %v8099_v3  ;;  %v8242_v21 = vsel %vm2659_vm5, %v2692_v14, %v8103_v20  ;;  %v8246_v16 = vsel %vm2659_vm5, %v2708_v44, %v8113_v4 }
 0x194   : > { %v2384_v31 = vmax.f32 %v1596_v53, %v2188_v13  ;;  %v1307_v30 = vmax.f32 %v1013_v12, 0.0  ;;  %v1016_v8 = vadd.f32 %v8180_v25, %v1015_v33  ;;  %v6955_v55 = vpop.f32.mrb[67].mxu0  ;;  %v8251_v59 = vsel %vm2659_vm5, %v2563_v47, %v8126_v6 }
 0x195   : > { %v2247_v5 = vrot.slane %v2009_v36, 4  ;;  %v2737_v3 = vrot.slane %v2563_v47, 1  ;;  %v2753_v22 = vrot.slane %v2563_v47, 2  ;;  %v2767_v1 = vrot.slane %v2563_v47, 3 }
 0x196   : > { %v2564_v11 = vcombine.low %v2383_v19, %v2384_v31  ;;  %v1603_v20 = vrot.slane %v1307_v30, %v7685_v58  ;;  %v1308_v23 = vmax.f32 %v1016_v8, 0.0  ;;  %v2900_v4 = vrot.slane %v8144_v61, 1 }
 0x197   : > { %v8255_v14 = vmax.f32 %v2009_v36, %v2247_v5  ;;  %v8259_v53 = vsel %vm2659_vm5, %v2737_v3, %v8130_v42  ;;  %v8263_v6 = vsel %vm2659_vm5, %v2753_v22, %v8134_v48  ;;  %v8267_v44 = vsel %vm2659_vm5, %v2767_v1, %v8140_v49 }
 0x198   : > { %v2189_v47 = vrot.slane %v1603_v20, 4  ;;  %v1610_v19 = vrot.slane %v1308_v23, %v7685_v58  ;;  %v2782_v13 = vrot.slane %v2564_v11, 4  ;;  %v2798_v12 = vrot.slane %v2564_v11, 5 }
 0x199   : > { %v1020_v0 = vpop.f32.mrb[68].mxu0  ;;  %v2812_v33 = vrot.slane %v2564_v11, 6  ;;  %v2828_v36 = vrot.slane %v2564_v11, 7  ;;  %v8272_v42 = vsel %vm2659_vm5, %v2564_v11, %v8192_v34  ;;  %v2857_v31 = vrot.slane %v2564_v11, 1 }
 0x19a   : > { %v2385_v30 = vmax.f32 %v1603_v20, %v2189_v47  ;;  %v2190_v48 = vrot.slane %v1610_v19, 4  ;;  %v1021_v8 = vadd.f32 %v8180_v25, %v1020_v0  ;;  %v6958_v55 = vpop.f32.mrb[69].mxu0  ;;  %v8277_v49 = vsel %vm2659_vm5, %v2782_v13, %v8151_v35 }
 0x19b   : > { %v1023_v5 = vpop.f32.mrb[70].mxu0  ;;  %v8281_v3 = vsel %vm2659_vm5, %v2798_v12, %v8156_v60  ;;  %v8285_v22 = vsel %vm2659_vm5, %v2812_v33, %v8165_v40  ;;  %v8289_v34 = vsel %vm2659_vm5, %v2828_v36, %v8171_v50  ;;  %v8293_v1 = vsel %vm2659_vm5, %v2857_v31, %v8200_v39  ;;  %v8307_v36 = vpop.f32.mrb[42].mxu1 }
 0x19c   : > { %v2386_v20 = vmax.f32 %v1610_v19, %v2190_v48  ;;  %v1309_v35 = vmax.f32 %v1021_v8, 0.0  ;;  %v1024_v23 = vadd.f32 %v8180_v25, %v1023_v5  ;;  %v6959_v47 = vpop.f32.mrb[71].mxu0  ;;  %v2873_v13 = vrot.slane %v2564_v11, 2 }
 0x19d   : > { %v2887_v60 = vrot.slane %v2564_v11, 3  ;;  %v2901_v40 = vsel %vm2656_vm4, %v2900_v4, %v8225_v26  ;;  %v2914_v12 = vrot.slane %v8036_v32, 7  ;;  %v2916_v50 = vrot.slane %v8144_v61, 2 }
 0x19e   : > { %v8300_v0 = vcombine.low %v2385_v30, %v2386_v20  ;;  %v1617_v39 = vrot.slane %v1309_v35, %v7685_v58  ;;  %v1310_v33 = vmax.f32 %v1024_v23, 0.0  ;;  %v8305_v19 = vsel %vm2659_vm5, %v2873_v13, %v8212_v18  ;;  %v7071_v30 = vpop.f32.mrb[43].mxu1 }
 0x19f   : > { %v8311_v11 = vsel %vm2659_vm5, %v2887_v60, %v8221_v10  ;;  %v2915_v26 = vsel %vm2653_vm3, %v2914_v12, %v7969_v38  ;;  %v2927_v4 = vrot.slane %v7882_v24, 5  ;;  %v2930_v31 = vrot.slane %v8144_v61, 3  ;;  %v8320_v5 = vpop.f32.mrb[44].mxu1 }
 0x1a0   : > { %v2191_v48 = vrot.slane %v1617_v39, 4  ;;  %v1624_v8 = vrot.slane %v1310_v33, %v7685_v58  ;;  %v2902_v18 = vrot.slane %v8300_v0, 4  ;;  %v2917_v55 = vsel %vm2656_vm4, %v2916_v50, %v2915_v26  ;;  %v7074_v47 = vpop.f32.mrb[45].mxu1 }
 0x1a1   : > { %v1028_v20 = vpop.f32.mrb[72].mxu0  ;;  %v2918_v10 = vrot.slane %v8300_v0, 5  ;;  %v2928_v38 = vsel %vm2650_vm2, %v2927_v4, %v7827_v57  ;;  %v2932_v35 = vrot.slane %v8300_v0, 6  ;;  %v2942_v23 = vrot.slane %v7882_v24, 6 }
 0x1a2   : > { %v2387_v13 = vmax.f32 %v1617_v39, %v2191_v48  ;;  %v2192_v60 = vrot.slane %v1624_v8, 4  ;;  %v1029_v12 = vadd.f32 %v8180_v25, %v1028_v20  ;;  %v6962_v33 = vpop.f32.mrb[73].mxu0  ;;  %v8329_v50 = vsel %vm2659_vm5, %v2902_v18, %v2901_v40 }
 0x1a3   : > { %v1031_v26 = vpop.f32.mrb[74].mxu0  ;;  %v8332_v30 = vsel %vm2659_vm5, %v2918_v10, %v2917_v55  ;;  %v2929_v57 = vsel %vm2653_vm3, %v8036_v32, %v2928_v38  ;;  %v2943_v4 = vsel %vm2650_vm2, %v2942_v23, %v7831_v2  ;;  %v2944_v24 = vrot.slane %v8036_v32, 1 }
 0x1a4   : > { %v2388_v39 = vmax.f32 %v1624_v8, %v2192_v60  ;;  %v1311_v48 = vmax.f32 %v1029_v12, 0.0  ;;  %v1032_v20 = vadd.f32 %v8180_v25, %v1031_v26  ;;  %v6963_v47 = vpop.f32.mrb[75].mxu0  ;;  %v2931_v40 = vsel %vm2656_vm4, %v2930_v31, %v2929_v57  ;;  %v8351_v60 = vpop.f32.mrb[46].mxu1 }
 0x1a5   : > { %v8342_v18 = vsel %vm2659_vm5, %v2932_v35, %v2931_v40  ;;  %v2945_v55 = vsel %vm2653_vm3, %v2944_v24, %v2943_v4  ;;  %v2946_v10 = vrot.slane %v8144_v61, 4  ;;  %v2948_v38 = vrot.slane %v8300_v0, 7  ;;  %v7075_v26 = vpop.f32.mrb[47].mxu1 }
 0x1a6   : > { %v8347_v33 = vcombine.low %v2387_v13, %v2388_v39  ;;  %v1631_v2 = vrot.slane %v1311_v48, %v7685_v58  ;;  %v1312_v8 = vmax.f32 %v1032_v20, 0.0  ;;  %v2957_v23 = vrot.slane %v7921_v45, 7  ;;  %v8366_v39 = vpop.f32.mrb[48].mxu1 }
 0x1a7   : > { %v2947_v31 = vsel %vm2656_vm4, %v2946_v10, %v2945_v55  ;;  %v2959_v35 = vrot.slane %v8036_v32, 2  ;;  %v2961_v12 = vrot.slane %v8186_v7, 5  ;;  %v2972_v61 = vsel %vm2650_vm2, %v7921_v45, %v7842_v27  ;;  %v7078_v55 = vpop.f32.mrb[49].mxu1 }
 0x1a8   : > { %v2193_v13 = vrot.slane %v1631_v2, 4  ;;  %v1638_v57 = vrot.slane %v1312_v8, %v7685_v58  ;;  %v10408_v4 = vrot.slane %v8347_v33, 7  ;;  %v8364_v24 = vsel %vm2662_vm6, %v8347_v33, %v8238_v62 }
 0x1a9   : > { %v1036_v48 = vpop.f32.mrb[76].mxu0  ;;  %v2694_v20 = vrot.slane %v8347_v33, 1  ;;  %v2710_v47 = vrot.slane %v8347_v33, 2  ;;  %v8371_v27 = vsel %vm2659_vm5, %v2948_v38, %v2947_v31  ;;  %v2958_v40 = vsel %vm2650_vm2, %v2957_v23, %v7834_v17  ;;  %v8392_v31 = vpop.f32.mrb[50].mxu1 }
 0x1aa   : > { %v2389_v10 = vmax.f32 %v1631_v2, %v2193_v13  ;;  %v2194_v8 = vrot.slane %v1638_v57, 4  ;;  %v1037_v26 = vadd.f32 %v8180_v25, %v1036_v48  ;;  %v6966_v62 = vpop.f32.mrb[77].mxu0  ;;  %v8380_v15 = vsel %vm2662_vm6, %v10408_v4, %v8233_v37  ;;  %10442 = vst [vmem:[#allocation16_spill] sm:$0xff] %v8392_v31  ;;  %v7079_v4 = vpop.f32.mrb[51].mxu1 }
 0x1ab   : > { %v1039_v9 = vpop.f32.mrb[78].mxu0  ;;  %v8384_v38 = vsel %vm2662_vm6, %v2694_v20, %v8242_v21  ;;  %v8388_v17 = vsel %vm2662_vm6, %v2710_v47, %v8246_v16  ;;  %v2960_v2 = vsel %vm2653_vm3, %v2959_v35, %v2958_v40  ;;  %v2973_v23 = vrot.slane %v8036_v32, 3 }
 0x1ac   : > { %v2390_v13 = vmax.f32 %v1638_v57, %v2194_v8  ;;  %v1313_v48 = vmax.f32 %v1037_v26, 0.0  ;;  %v1040_v37 = vadd.f32 %v8180_v25, %v1039_v9  ;;  %v6967_v55 = vpop.f32.mrb[79].mxu0  ;;  %v2962_v62 = vsel %vm2656_vm4, %v2961_v12, %v2960_v2  ;;  %v8409_v2 = vpop.f32.mrb[52].mxu1 }
 0x1ad   : > { %v8398_v21 = vsel %vm2659_vm5, %v8300_v0, %v2962_v62  ;;  %v2974_v16 = vsel %vm2653_vm3, %v2973_v23, %v2972_v61  ;;  %v2975_v35 = vrot.slane %v8186_v7, 6  ;;  %v2977_v20 = vrot.slane %v8300_v0, 1  ;;  %10443 = vst [vmem:[#allocation17_spill] sm:$0xff] %v8409_v2 }
 0x1ae   : > { %v2567_v47 = vcombine.low %v2389_v10, %v2390_v13  ;;  %v1645_v57 = vrot.slane %v1313_v48, %v7685_v58  ;;  %v1314_v40 = vmax.f32 %v1040_v37, 0.0  ;;  %v2987_v9 = vrot.slane %v7921_v45, 1  ;;  %v7082_v13 = vpop.f32.mrb[53].mxu1 }
 0x1af   : > { %v2976_v8 = vsel %vm2656_vm4, %v2975_v35, %v2974_v16  ;;  %v2989_v12 = vrot.slane %v8036_v32, 4 }
 0x1b0   : > { %v2195_v61 = vrot.slane %v1645_v57, 4  ;;  %v1652_v23 = vrot.slane %v1314_v40, %v7685_v58  ;;  %v2724_v55 = vrot.slane %v2567_v47, 3  ;;  %v2739_v10 = vrot.slane %v2567_v47, 4 }
 0x1b1   : > { %v1044_v48 = vpop.f32.mrb[80].mxu0  ;;  %v2755_v37 = vrot.slane %v2567_v47, 5  ;;  %v2769_v62 = vrot.slane %v2567_v47, 6  ;;  %v2784_v56 = vrot.slane %v2567_v47, 7  ;;  %v8414_v16 = vsel %vm2662_vm6, %v2567_v47, %v8281_v3 }
 0x1b2   : > { %v2391_v35 = vmax.f32 %v1645_v57, %v2195_v61  ;;  %v2196_v4 = vrot.slane %v1652_v23, 4  ;;  %v1045_v26 = vadd.f32 %v8180_v25, %v1044_v48  ;;  %v6970_v52 = vpop.f32.mrb[81].mxu0  ;;  %v8419_v2 = vsel %vm2662_vm6, %v2724_v55, %v8251_v59 }
 0x1b3   : > { %v1047_v40 = vpop.f32.mrb[82].mxu0  ;;  %v8423_v13 = vsel %vm2662_vm6, %v2739_v10, %v8259_v53  ;;  %v8427_v31 = vsel %vm2662_vm6, %v2755_v37, %v8263_v6  ;;  %v8431_v3 = vsel %vm2662_vm6, %v2769_v62, %v8267_v44  ;;  %v8435_v52 = vsel %vm2662_vm6, %v2784_v56, %v8277_v49  ;;  %v8438_v53 = vpop.f32.mrb[54].mxu1 }
 0x1b4   : > { %v2392_v57 = vmax.f32 %v1652_v23, %v2196_v4  ;;  %v1315_v59 = vmax.f32 %v1045_v26, 0.0  ;;  %v1048_v61 = vadd.f32 %v8180_v25, %v1047_v40  ;;  %v6971_v55 = vpop.f32.mrb[83].mxu0  ;;  %v2814_v48 = vrot.slane %v2567_v47, 1  ;;  %10444 = vst [vmem:[#allocation18_spill] sm:$0xff] %v8438_v53  ;;  %v7083_v62 = vpop.f32.mrb[55].mxu1 }
 0x1b5   : > { %v2830_v10 = vrot.slane %v2567_v47, 2  ;;  %v8441_v6 = vsel %vm2659_vm5, %v2977_v20, %v2976_v8  ;;  %v2988_v44 = vsel %vm2650_vm2, %v2987_v9, %v7845_v28  ;;  %v3002_v37 = vrot.slane %v7921_v45, 2 }
 0x1b6   : > { %v2568_v56 = vcombine.low %v2391_v35, %v2392_v57  ;;  %v1659_v49 = vrot.slane %v1315_v59, %v7685_v58  ;;  %v1316_v4 = vmax.f32 %v1048_v61, 0.0  ;;  %v8449_v26 = vsel %vm2662_vm6, %v2814_v48, %v8285_v22 }
 0x1b7   : > { %v8453_v47 = vsel %vm2662_vm6, %v2830_v10, %v8289_v34  ;;  %v2990_v20 = vsel %vm2653_vm3, %v2989_v12, %v2988_v44  ;;  %v3003_v28 = vsel %vm2650_vm2, %v3002_v37, %v7848_v29  ;;  %v3004_v9 = vrot.slane %v8036_v32, 5 }
 0x1b8   : > { %v2197_v8 = vrot.slane %v1659_v49, 4  ;;  %v1666_v23 = vrot.slane %v1316_v4, %v7685_v58  ;;  %v2844_v35 = vrot.slane %v2568_v56, 3  ;;  %v2859_v40 = vrot.slane %v2568_v56, 4 }
 0x1b9   : > { %v1052_v57 = vpop.f32.mrb[84].mxu0  ;;  %v2875_v59 = vrot.slane %v2568_v56, 5  ;;  %v2889_v22 = vrot.slane %v2568_v56, 6  ;;  %v2904_v61 = vrot.slane %v2568_v56, 7  ;;  %v8462_v34 = vsel %vm2662_vm6, %v2568_v56, %v8332_v30 }
 0x1ba   : > { %v2393_v55 = vmax.f32 %v1659_v49, %v2197_v8  ;;  %v2198_v12 = vrot.slane %v1666_v23, 4  ;;  %v1053_v48 = vadd.f32 %v8180_v25, %v1052_v57  ;;  %v6974_v29 = vpop.f32.mrb[85].mxu0  ;;  %v8467_v32 = vsel %vm2662_vm6, %v2844_v35, %v8272_v42 }
 0x1bb   : > { %v1055_v10 = vpop.f32.mrb[86].mxu0  ;;  %v8471_v44 = vsel %vm2662_vm6, %v2859_v40, %v8293_v1  ;;  %v8475_v37 = vsel %vm2662_vm6, %v2875_v59, %v8305_v19  ;;  %v8479_v30 = vsel %vm2662_vm6, %v2889_v22, %v8311_v11  ;;  %v8483_v62 = vsel %vm2662_vm6, %v2904_v61, %v8329_v50 }
 0x1bc   : > { %v2394_v49 = vmax.f32 %v1666_v23, %v2198_v12  ;;  %v1317_v42 = vmax.f32 %v1053_v48, 0.0  ;;  %v1056_v4 = vadd.f32 %v8180_v25, %v1055_v10  ;;  %v6975_v8 = vpop.f32.mrb[87].mxu0  ;;  %v2934_v35 = vrot.slane %v2568_v56, 1 }
 0x1bd   : > { %v2950_v1 = vrot.slane %v2568_v56, 2  ;;  %v10445_v40 = vrot.slane %v8186_v7, 7  ;;  %v3005_v57 = vsel %vm2653_vm3, %v3004_v9, %v3003_v28  ;;  %v3007_v11 = vrot.slane %v8300_v0, 3 }
 0x1be   : > { %v8491_v59 = vcombine.low %v2393_v55, %v2394_v49  ;;  %v1673_v50 = vrot.slane %v1317_v42, %v7685_v58  ;;  %v1318_v22 = vmax.f32 %v1056_v4, 0.0  ;;  %v8496_v23 = vsel %vm2662_vm6, %v2934_v35, %v8342_v18 }
 0x1bf   : > { %v2992_v19 = vsel %vm2656_vm4, %v10445_v40, %v2990_v20  ;;  %v8500_v56 = vsel %vm2662_vm6, %v2950_v1, %v8371_v27  ;;  %v10446_v61 = vrot.slane %v8300_v0, 2  ;;  %v3006_v28 = vsel %vm2656_vm4, %v8186_v7, %v3005_v57 }
 0x1c0   : > { %v3016_v9 = vrot.slane %v7921_v45, 3  ;;  %v2199_v55 = vrot.slane %v1673_v50, 4  ;;  %v1680_v12 = vrot.slane %v1318_v22, %v7685_v58  ;;  %v2964_v48 = vrot.slane %v8491_v59, 3 }
 0x1c1   : > { %v2994_v20 = vsel %vm2659_vm5, %v10446_v61, %v2992_v19  ;;  %v2979_v18 = vrot.slane %v8491_v59, 4  ;;  %v1060_v29 = vpop.f32.mrb[88].mxu0  ;;  %v2995_v27 = vrot.slane %v8491_v59, 5  ;;  %v3008_v0 = vsel %vm2659_vm5, %v3007_v11, %v3006_v28 }
 0x1c2   : > { %v3009_v10 = vrot.slane %v8491_v59, 6  ;;  %v3017_v49 = vsel %vm2650_vm2, %v3016_v9, %v7855_v41  ;;  %v2395_v42 = vmax.f32 %v1673_v50, %v2199_v55  ;;  %v2200_v4 = vrot.slane %v1680_v12, 4  ;;  %v6978_v35 = vpop.f32.mrb[89].mxu0 }
 0x1c3   : > { %v1061_v8 = vadd.f32 %v8180_v25, %v1060_v29  ;;  %v8519_v1 = vsel %vm2662_vm6, %v2964_v48, %v8398_v21  ;;  %v1063_v40 = vpop.f32.mrb[90].mxu0  ;;  %v8523_v19 = vsel %vm2662_vm6, %v2979_v18, %v8441_v6  ;;  %v8526_v57 = vsel %vm2662_vm6, %v2995_v27, %v2994_v20 }
 0x1c4   : > { %v8529_v11 = vsel %vm2662_vm6, %v3009_v10, %v3008_v0  ;;  %v10447_v41 = vrot.slane %v8070_v43, 6  ;;  %v2396_v22 = vmax.f32 %v1680_v12, %v2200_v4  ;;  %v1064_v21 = vadd.f32 %v8180_v25, %v1063_v40  ;;  %v6979_v28 = vpop.f32.mrb[91].mxu0 }
 0x1c5   : > { %v1319_v61 = vmax.f32 %v1061_v8, 0.0  ;;  %v3020_v9 = vrot.slane %v8186_v7, 1  ;;  %v3022_v6 = vrot.slane %v8347_v33, 4  ;;  %v3024_v55 = vrot.slane %v8491_v59, 7 }
 0x1c6   : > { %v3019_v50 = vsel %vm2653_vm3, %v10447_v41, %v3017_v49  ;;  %v3032_v20 = vrot.slane %v7921_v45, 4  ;;  %v3036_v48 = vrot.slane %v8186_v7, 2  ;;  %v2570_v18 = vcombine.low %v2395_v42, %v2396_v22 }
 0x1c7   : > { %v1687_v29 = vrot.slane %v1319_v61, %v7685_v58  ;;  %v1320_v27 = vmax.f32 %v1064_v21, 0.0  ;;  %v3021_v12 = vsel %vm2656_vm4, %v3020_v9, %v3019_v50  ;;  %v3038_v49 = vrot.slane %v8347_v33, 5 }
 0x1c8   : > { %v3023_v0 = vsel %vm2659_vm5, %v3022_v6, %v3021_v12  ;;  %v3033_v10 = vsel %vm2650_vm2, %v3032_v20, %v7859_v46  ;;  %v3047_v4 = vrot.slane %v7921_v45, 5  ;;  %v2664_v40 = vrot.slane %v2570_v18, 2 }
 0x1c9   : > { %v2201_v8 = vrot.slane %v1687_v29, 4  ;;  %v1694_v35 = vrot.slane %v1320_v27, %v7685_v58  ;;  %v2681_v41 = vrot.slane %v2570_v18, 3  ;;  %v1068_v42 = vpop.f32.mrb[92].mxu0  ;;  %v2696_v22 = vrot.slane %v2570_v18, 4 }
 0x1ca   : > { %v2712_v61 = vrot.slane %v2570_v18, 5  ;;  %v2726_v21 = vrot.slane %v2570_v18, 6  ;;  %v2741_v28 = vrot.slane %v2570_v18, 7  ;;  %v1069_v6 = vadd.f32 %v8180_v25, %v1068_v42  ;;  %v6982_v12 = vpop.f32.mrb[93].mxu0 }
 0x1cb   : > { %v2397_v50 = vmax.f32 %v1687_v29, %v2201_v8  ;;  %v2202_v9 = vrot.slane %v1694_v35, 4  ;;  %v8551_v46 = vsel %vm2665_vm7, %v2664_v40, %v8380_v15  ;;  %v1071_v20 = vpop.f32.mrb[94].mxu0  ;;  %v8555_v27 = vsel %vm2665_vm7, %v2681_v41, %v8364_v24 }
 0x1cc   : > { %v8559_v53 = vsel %vm2665_vm7, %v2696_v22, %v8384_v38  ;;  %v8563_v29 = vsel %vm2665_vm7, %v2712_v61, %v8388_v17  ;;  %v8567_v8 = vsel %vm2665_vm7, %v2726_v21, %v8419_v2  ;;  %v1321_v15 = vmax.f32 %v1069_v6, 0.0  ;;  %v6983_v12 = vpop.f32.mrb[95].mxu0 }
 0x1cd   : > { %v2398_v42 = vmax.f32 %v1694_v35, %v2202_v9  ;;  %v1072_v40 = vadd.f32 %v8180_v25, %v1071_v20  ;;  %v8572_v24 = vsel %vm2665_vm7, %v2741_v28, %v8423_v13  ;;  %v8576_v38 = vsel %vm2665_vm7, %v2570_v18, %v8427_v31 }
 0x1ce   : > { %v2771_v41 = vrot.slane %v2570_v18, 1  ;;  %v8579_v17 = vsel %vm2662_vm6, %v3024_v55, %v3023_v0  ;;  %v10448_v2 = vrot.slane %v8070_v43, 7  ;;  %v1701_v61 = vrot.slane %v1321_v15, %v7685_v58 }
 0x1cf   : > { %v2571_v22 = vcombine.low %v2397_v50, %v2398_v42  ;;  %v1322_v21 = vmax.f32 %v1072_v40, 0.0  ;;  %v3048_v55 = vsel %vm2650_vm2, %v3047_v4, %v7899_v63  ;;  %v3050_v18 = vrot.slane %v8186_v7, 3 }
 0x1d0   : > { %v3035_v35 = vsel %vm2653_vm3, %v10448_v2, %v3033_v10  ;;  %v8588_v13 = vsel %vm2665_vm7, %v2771_v41, %v8431_v3  ;;  %v2203_v0 = vrot.slane %v1701_v61, 4 }
 0x1d1   : > { %v3037_v9 = vsel %vm2656_vm4, %v3036_v48, %v3035_v35  ;;  %v1708_v10 = vrot.slane %v1322_v21, %v7685_v58  ;;  %v2786_v28 = vrot.slane %v2571_v22, 2  ;;  %v2801_v50 = vrot.slane %v2571_v22, 3  ;;  %v1076_v6 = vpop.f32.mrb[96].mxu0 }
 0x1d2   : > { %v3039_v31 = vsel %vm2659_vm5, %v3038_v49, %v3037_v9  ;;  %v2816_v20 = vrot.slane %v2571_v22, 4  ;;  %v2832_v42 = vrot.slane %v2571_v22, 5  ;;  %v2846_v48 = vrot.slane %v2571_v22, 6  ;;  %v6986_v49 = vpop.f32.mrb[97].mxu0 }
 0x1d3   : > { %v2861_v15 = vrot.slane %v2571_v22, 7  ;;  %v2399_v40 = vmax.f32 %v1701_v61, %v2203_v0  ;;  %v2204_v3 = vrot.slane %v1708_v10, 4  ;;  %v1077_v12 = vadd.f32 %v8180_v25, %v1076_v6  ;;  %v1079_v4 = vpop.f32.mrb[98].mxu0 }
 0x1d4   : > { %v8598_v63 = vsel %vm2665_vm7, %v2786_v28, %v8435_v52  ;;  %v8602_v41 = vsel %vm2665_vm7, %v2801_v50, %v8414_v16  ;;  %v8606_v2 = vsel %vm2665_vm7, %v2816_v20, %v8449_v26  ;;  %v8610_v35 = vsel %vm2665_vm7, %v2832_v42, %v8453_v47  ;;  %v6987_v0 = vpop.f32.mrb[99].mxu0 }
 0x1d5   : > { %v8614_v61 = vsel %vm2665_vm7, %v2846_v48, %v8467_v32  ;;  %v2400_v21 = vmax.f32 %v1708_v10, %v2204_v3  ;;  %v1323_v52 = vmax.f32 %v1077_v12, 0.0  ;;  %v1080_v9 = vadd.f32 %v8180_v25, %v1079_v4 }
 0x1d6   : > { %v8619_v16 = vsel %vm2665_vm7, %v2861_v15, %v8471_v44  ;;  %v8623_v26 = vsel %vm2665_vm7, %v2571_v22, %v8475_v37  ;;  %v2891_v28 = vrot.slane %v2571_v22, 1  ;;  %v8627_v47 = vsel %vm2662_vm6, %v8491_v59, %v3039_v31 }
 0x1d7   : > { %v3049_v32 = vsel %vm2653_vm3, %v8070_v43, %v3048_v55  ;;  %v2572_v10 = vcombine.low %v2399_v40, %v2400_v21  ;;  %v1715_v50 = vrot.slane %v1323_v52, %v7685_v58  ;;  %v1324_v6 = vmax.f32 %v1080_v9, 0.0 }
 0x1d8   : > { %v3051_v44 = vsel %vm2656_vm4, %v3050_v18, %v3049_v32  ;;  %v8635_v20 = vsel %vm2665_vm7, %v2891_v28, %v8479_v30  ;;  %v3052_v37 = vrot.slane %v8347_v33, 6  ;;  %v3054_v22 = vrot.slane %v8491_v59, 1 }
 0x1d9   : > { %v3061_v31 = vrot.slane %v7921_v45, 6  ;;  %v2205_v42 = vrot.slane %v1715_v50, 4  ;;  %v1722_v55 = vrot.slane %v1324_v6, %v7685_v58  ;;  %v2906_v48 = vrot.slane %v2572_v10, 2  ;;  %v1084_v40 = vpop.f32.mrb[100].mxu0 }
 0x1da   : > { %v2921_v15 = vrot.slane %v2572_v10, 3  ;;  %v2936_v3 = vrot.slane %v2572_v10, 4  ;;  %v2952_v12 = vrot.slane %v2572_v10, 5  ;;  %v2966_v49 = vrot.slane %v2572_v10, 6  ;;  %v6990_v52 = vpop.f32.mrb[101].mxu0 }
 0x1db   : > { %v2981_v18 = vrot.slane %v2572_v10, 7  ;;  %v2401_v4 = vmax.f32 %v1715_v50, %v2205_v42  ;;  %v2206_v21 = vrot.slane %v1722_v55, 4  ;;  %v1085_v30 = vadd.f32 %v8180_v25, %v1084_v40  ;;  %v1087_v45 = vpop.f32.mrb[102].mxu0 }
 0x1dc   : > { %v8644_v9 = vsel %vm2665_vm7, %v2906_v48, %v8483_v62  ;;  %v8648_v0 = vsel %vm2665_vm7, %v2921_v15, %v8462_v34  ;;  %v8652_v28 = vsel %vm2665_vm7, %v2936_v3, %v8496_v23  ;;  %v8656_v32 = vsel %vm2665_vm7, %v2952_v12, %v8500_v56  ;;  %v6991_v48 = vpop.f32.mrb[103].mxu0 }
 0x1dd   : > { %v8660_v50 = vsel %vm2665_vm7, %v2966_v49, %v8519_v1  ;;  %v2402_v6 = vmax.f32 %v1722_v55, %v2206_v21  ;;  %v1325_v62 = vmax.f32 %v1085_v30, 0.0  ;;  %v1088_v42 = vadd.f32 %v8180_v25, %v1087_v45 }
 0x1de   : > { %v8665_v34 = vsel %vm2665_vm7, %v2981_v18, %v8523_v19  ;;  %v8669_v23 = vsel %vm2665_vm7, %v2572_v10, %v8526_v57  ;;  %v3011_v15 = vrot.slane %v2572_v10, 1  ;;  %v3053_v56 = vsel %vm2659_vm5, %v3052_v37, %v3051_v44 }
 0x1df   : > { %v3062_v1 = vsel %vm2650_vm2, %v3061_v31, %v8020_v51  ;;  %v8674_v40 = vcombine.low %v2401_v4, %v2402_v6  ;;  %v1729_v55 = vrot.slane %v1325_v62, %v7685_v58  ;;  %v1326_v3 = vmax.f32 %v1088_v42, 0.0 }
 0x1e0   : > { %v3055_v12 = vsel %vm2662_vm6, %v3054_v22, %v3053_v56  ;;  %v8680_v19 = vsel %vm2665_vm7, %v3011_v15, %v8529_v11  ;;  %v10449_v57 = vrot.slane %v8070_v43, 1  ;;  %v3064_v44 = vrot.slane %v8186_v7, 4 }
 0x1e1   : > { %v3067_v37 = vrot.slane %v8491_v59, 2  ;;  %v2207_v51 = vrot.slane %v1729_v55, 4  ;;  %v1736_v31 = vrot.slane %v1326_v3, %v7685_v58  ;;  %v2667_v49 = vrot.slane %v8674_v40, 5  ;;  %v1092_v22 = vpop.f32.mrb[104].mxu0 }
 0x1e2   : > { %v3063_v10 = vsel %vm2653_vm3, %v10449_v57, %v3062_v1  ;;  %v2683_v18 = vrot.slane %v8674_v40, 6  ;;  %v2698_v4 = vrot.slane %v8674_v40, 7  ;;  %v8694_v43 = vsel %vm2668_vm8, %v8674_v40, %v8563_v29  ;;  %v6994_v45 = vpop.f32.mrb[105].mxu0 }
 0x1e3   : > { %v3026_v11 = vrot.slane %v8674_v40, 2  ;;  %v3041_v7 = vrot.slane %v8674_v40, 3  ;;  %v2403_v21 = vmax.f32 %v1729_v55, %v2207_v51  ;;  %v2208_v30 = vrot.slane %v1736_v31, 4  ;;  %v1095_v62 = vpop.f32.mrb[106].mxu0 }
 0x1e4   : > { %v1093_v52 = vadd.f32 %v8180_v25, %v1092_v22  ;;  %v8703_v6 = vsel %vm2668_vm8, %v2667_v49, %v8551_v46  ;;  %v8707_v29 = vsel %vm2668_vm8, %v2683_v18, %v8555_v27  ;;  %v8711_v42 = vsel %vm2668_vm8, %v2698_v4, %v8559_v53  ;;  %v6995_v55 = vpop.f32.mrb[107].mxu0 }
 0x1e5   : > { %v8715_v48 = vsel %vm2665_vm7, %v3026_v11, %v8579_v17  ;;  %v8719_v15 = vsel %vm2665_vm7, %v3041_v7, %v8627_v47  ;;  %v2404_v56 = vmax.f32 %v1736_v31, %v2208_v30  ;;  %v1096_v1 = vadd.f32 %v8180_v25, %v1095_v62 }
 0x1e6   : > { %v1327_v46 = vmax.f32 %v1093_v52, 0.0  ;;  %v3056_v27 = vrot.slane %v8674_v40, 4  ;;  %v3065_v3 = vsel %vm2656_vm4, %v3064_v44, %v3063_v10  ;;  %v1248_v53 = vadd.f32 %v8180_v25, %v8307_v36 }
 0x1e7   : > { %v2574_v57 = vcombine.low %v2403_v21, %v2404_v56  ;;  %v1328_v51 = vmax.f32 %v1096_v1, 0.0  ;;  %v10450_v47 = vrot.slane %v8347_v33, 7  ;;  %v7384_v22 = vmov 1983009808  }
 0x1e8   : > { %v1743_v17 = vrot.slane %v1327_v46, %v7685_v58  ;;  %v8728_v18 = vsel %vm2665_vm7, %v3056_v27, %v3055_v12  ;;  %v3414_v4 = vunpack.c.l.s4 %v7384_v22  ;;  %v7385_v11 = vmov 1934713408  }
 0x1e9   : > { %v3066_v31 = vsel %vm2659_vm5, %v10450_v47, %v3065_v3  ;;  %v8733_v7 = vunpack.c.l.s4 %v7385_v11  ;;  %v1366_v10 = vmax.f32 %v1248_v53, 0.0  ;;  %v1750_v36 = vrot.slane %v1328_v51, %v7685_v58  ;;  %v1100_v52 = vpop.f32.mrb[108].mxu0 }
 0x1ea   : > { %v2209_v44 = vrot.slane %v1743_v17, 4  ;;  %v2728_v21 = vrot.slane %v2574_v57, 1  ;;  %v2743_v30 = vrot.slane %v2574_v57, 2  ;;  %v2758_v45 = vrot.slane %v2574_v57, 3  ;;  %v6998_v55 = vpop.f32.mrb[109].mxu0 }
 0x1eb   : > { %v2773_v62 = vrot.slane %v2574_v57, 4  ;;  %v2788_v12 = vrot.slane %v2574_v57, 5  ;;  %v2803_v56 = vrot.slane %v2574_v57, 6  ;;  %v2210_v33 = vrot.slane %v1750_v36, 4  ;;  %v1103_v3 = vpop.f32.mrb[110].mxu0 }
 0x1ec   : > { %v2405_v46 = vmax.f32 %v1743_v17, %v2209_v44  ;;  %v1101_v1 = vadd.f32 %v8180_v25, %v1100_v52  ;;  %v8739_v27 = vsel %vm2668_vm8, %v2728_v21, %v8567_v8  ;;  %v2744_v53 = vsel %vm2668_vm8, %v2743_v30, %v8572_v24  ;;  %v6999_v44 = vpop.f32.mrb[111].mxu0 }
 0x1ed   : > { %v8745_v51 = vsel %vm2668_vm8, %v2758_v45, %v8576_v38  ;;  %v8749_v47 = vsel %vm2668_vm8, %v2773_v62, %v8588_v13  ;;  %v8753_v17 = vsel %vm2668_vm8, %v2788_v12, %v8598_v63  ;;  %v2406_v22 = vmax.f32 %v1750_v36, %v2210_v33  ;;  %v8788_v33 = vld [vmem:[%s10386_s2] ss:$0 sm:$0xff] }
 0x1ee   : > { %v1329_v11 = vmax.f32 %v1101_v1, 0.0  ;;  %v1104_v8 = vadd.f32 %v8180_v25, %v1103_v3  ;;  %v8758_v24 = vsel %vm2668_vm8, %v2803_v56, %v8602_v41  ;;  %v2818_v21 = vrot.slane %v2574_v57, 7 }
 0x1ef   : > { %v8762_v38 = vsel %vm2668_vm8, %v2574_v57, %v8610_v35  ;;  %v3068_v13 = vsel %vm2662_vm6, %v3067_v37, %v3066_v31  ;;  %v3415_v63 = vunpack.c.0.s8 %v3414_v4  ;;  %v2575_v30 = vcombine.low %v2405_v46, %v2406_v22 }
 0x1f0   : > { %v1757_v36 = vrot.slane %v1329_v11, %v7685_v58  ;;  %v1330_v52 = vmax.f32 %v1104_v8, 0.0  ;;  %v8771_v25 = vsel %vm2665_vm7, %v2667_v49, %v3068_v13  ;;  %v8775_v41 = vsel %vm2668_vm8, %v2818_v21, %v8606_v2 }
 0x1f1   : > { %v8778_v35 = vsub.s32 %v3415_v63, %v7674_v54  ;;  %v3479_v59 = vunpack.c.0.s8 %v8733_v7  ;;  %v8782_v37 = vrot.slane %v1366_v10, %v7685_v58  ;;  %v2848_v4 = vrot.slane %v2575_v30, 1  ;;  %v1108_v45 = vpop.f32.mrb[112].mxu0 }
 0x1f2   : > { %v2211_v57 = vrot.slane %v1757_v36, 4  ;;  %v1764_v31 = vrot.slane %v1330_v52, %v7685_v58  ;;  %v2863_v40 = vrot.slane %v2575_v30, 2  ;;  %v2878_v49 = vrot.slane %v2575_v30, 3  ;;  %v7002_v10 = vpop.f32.mrb[113].mxu0 }
 0x1f3   : > { %v2893_v62 = vrot.slane %v2575_v30, 4  ;;  %v2908_v12 = vrot.slane %v2575_v30, 5  ;;  %v2923_v56 = vrot.slane %v2575_v30, 6  ;;  %v1109_v7 = vadd.f32 %v8788_v33, %v1108_v45  ;;  %v1111_v55 = vpop.f32.mrb[114].mxu0 }
 0x1f4   : > { %v2407_v2 = vmax.f32 %v1757_v36, %v2211_v57  ;;  %v2212_v46 = vrot.slane %v1764_v31, 4  ;;  %v2849_v1 = vsel %vm2668_vm8, %v2848_v4, %v8614_v61  ;;  %v2864_v3 = vsel %vm2668_vm8, %v2863_v40, %v8619_v16  ;;  %v7003_v63 = vpop.f32.mrb[115].mxu0 }
 0x1f5   : > { %v2879_v22 = vsel %vm2668_vm8, %v2878_v49, %v8623_v26  ;;  %v2894_v11 = vsel %vm2668_vm8, %v2893_v62, %v8635_v20  ;;  %v2909_v8 = vsel %vm2668_vm8, %v2908_v12, %v8644_v9  ;;  %v1331_v21 = vmax.f32 %v1109_v7, 0.0 }
 0x1f6   : > { %v2408_v44 = vmax.f32 %v1764_v31, %v2212_v46  ;;  %v1112_v13 = vadd.f32 %v8788_v33, %v1111_v55  ;;  %v2924_v61 = vsel %vm2668_vm8, %v2923_v56, %v8648_v0  ;;  %v2938_v36 = vrot.slane %v2575_v30, 7 }
 0x1f7   : > { %v2954_v16 = vsel %vm2668_vm8, %v2575_v30, %v8656_v32  ;;  %v8807_v26 = vmax.f32 %v8703_v6, %v2879_v22  ;;  %v8810_v20 = vmax.f32 %v8707_v29, %v2894_v11  ;;  %v1771_v9 = vrot.slane %v1331_v21, %v7685_v58 }
 0x1f8   : > { %v2576_v52 = vcombine.low %v2407_v2, %v2408_v44  ;;  %v1332_v57 = vmax.f32 %v1112_v13, 0.0  ;;  %v8814_v31 = vmax.f32 %v8711_v42, %v2909_v8  ;;  %v2939_v0 = vsel %vm2668_vm8, %v2938_v36, %v8652_v28 }
 0x1f9   : > { %v8819_v4 = vmax.f32 %v8694_v43, %v2924_v61  ;;  %v8821_v32 = vmax.f32 %v2744_v53, %v2954_v16  ;;  %v8824_v6 = vsub.s32 %v3479_v59, %v7674_v54  ;;  %v2213_v29 = vrot.slane %v1771_v9, 4  ;;  %v1116_v49 = vpop.f32.mrb[116].mxu0 }
 0x1fa   : > { %v1778_v30 = vrot.slane %v1332_v57, %v7685_v58  ;;  %v2968_v40 = vrot.slane %v2576_v52, 1  ;;  %v2983_v45 = vrot.slane %v2576_v52, 2  ;;  %v2998_v62 = vrot.slane %v2576_v52, 3  ;;  %v7006_v46 = vpop.f32.mrb[117].mxu0 }
 0x1fb   : > { %v3013_v42 = vrot.slane %v2576_v52, 4  ;;  %v3028_v12 = vrot.slane %v2576_v52, 5  ;;  %v3043_v56 = vrot.slane %v2576_v52, 6  ;;  %v2409_v2 = vmax.f32 %v1771_v9, %v2213_v29  ;;  %v1119_v54 = vpop.f32.mrb[118].mxu0 }
 0x1fc   : > { %v2214_v28 = vrot.slane %v1778_v30, 4  ;;  %v1117_v43 = vadd.f32 %v8788_v33, %v1116_v49  ;;  %v2969_v53 = vsel %vm2668_vm8, %v2968_v40, %v8660_v50  ;;  %v2984_v59 = vsel %vm2668_vm8, %v2983_v45, %v8665_v34  ;;  %v7007_v44 = vpop.f32.mrb[119].mxu0 }
 0x1fd   : > { %v2999_v7 = vsel %vm2668_vm8, %v2998_v62, %v8669_v23  ;;  %v3014_v10 = vsel %vm2668_vm8, %v3013_v42, %v8680_v19  ;;  %v3029_v55 = vsel %vm2668_vm8, %v3028_v12, %v8715_v48  ;;  %v1120_v8 = vadd.f32 %v8788_v33, %v1119_v54 }
 0x1fe   : > { %v2410_v22 = vmax.f32 %v1778_v30, %v2214_v28  ;;  %v1333_v11 = vmax.f32 %v1117_v43, 0.0  ;;  %v3044_v50 = vsel %vm2668_vm8, %v3043_v56, %v8719_v15  ;;  %v3058_v21 = vrot.slane %v2576_v52, 7 }
 0x1ff   : > { %v3070_v34 = vsel %vm2668_vm8, %v2576_v52, %v8771_v25  ;;  %v8844_v23 = vmax.f32 %v8739_v27, %v2939_v0  ;;  %v8847_v19 = vmax.f32 %v8745_v51, %v2969_v53  ;;  %v1334_v63 = vmax.f32 %v1120_v8, 0.0 }
 0x200   : > { %v8849_v13 = vcombine.low %v2409_v2, %v2410_v22  ;;  %v1785_v48 = vrot.slane %v1333_v11, %v7685_v58  ;;  %v8853_v61 = vmax.f32 %v8749_v47, %v2984_v59  ;;  %v3059_v15 = vsel %vm2668_vm8, %v3058_v21, %v8728_v18 }
 0x201   : > { %v8858_v36 = vmax.f32 %v8753_v17, %v2999_v7  ;;  %v8861_v27 = vmax.f32 %v8758_v24, %v3014_v10  ;;  %v8864_v51 = vmax.f32 %v8775_v41, %v3029_v55  ;;  %v1792_v16 = vrot.slane %v1334_v63, %v7685_v58  ;;  %v1124_v9 = vpop.f32.mrb[120].mxu0 }
 0x202   : > { %v2215_v25 = vrot.slane %v1785_v48, 4  ;;  %v8868_v52 = vmax.f32 %v8762_v38, %v3044_v50  ;;  %v3395_v47 = vmax.f32 %v2849_v1, %v3059_v15  ;;  %v3396_v57 = vmax.f32 %v2864_v3, %v3070_v34  ;;  %v7010_v30 = vpop.f32.mrb[121].mxu0 }
 0x203   : > { %v3411_v18 = vcombine.low %v8807_v26, %v8814_v31  ;;  %v3412_v17 = vcombine.high %v8807_v26, %v8814_v31  ;;  %v3427_v24 = vcombine.low %v8810_v20, %v8819_v4  ;;  %v2216_v0 = vrot.slane %v1792_v16, 4  ;;  %v1127_v1 = vpop.f32.mrb[122].mxu0 }
 0x204   : > { %v2411_v41 = vmax.f32 %v1785_v48, %v2215_v25  ;;  %v1125_v29 = vadd.f32 %v8788_v33, %v1124_v9  ;;  %v3428_v38 = vcombine.high %v8810_v20, %v8819_v4  ;;  %v3443_v45 = vcombine.low %v8844_v23, %v8847_v19  ;;  %v7011_v56 = vpop.f32.mrb[123].mxu0 }
 0x205   : > { %v3419_v3 = vrot.slane %v3411_v18, %v8778_v35  ;;  %v3435_v40 = vrot.slane %v3427_v24, %v8778_v35  ;;  %v3444_v49 = vcombine.high %v8844_v23, %v8847_v19  ;;  %v2412_v62 = vmax.f32 %v1792_v16, %v2216_v0 }
 0x206   : > { %v1335_v42 = vmax.f32 %v1125_v29, 0.0  ;;  %v1128_v12 = vadd.f32 %v8788_v33, %v1127_v1  ;;  %v3459_v2 = vcombine.low %v8821_v32, %v8853_v61  ;;  %v3451_v28 = vrot.slane %v3443_v45, %v8778_v35 }
 0x207   : > { %v3460_v43 = vcombine.high %v8821_v32, %v8853_v61  ;;  %v3476_v46 = vcombine.high %v3419_v3, %v3435_v40  ;;  %v3547_v53 = vcombine.low %v8858_v36, %v8864_v51  ;;  %v8893_v54 = vcombine.low %v2411_v41, %v2412_v62 }
 0x208   : > { %v1799_v59 = vrot.slane %v1335_v42, %v7685_v58  ;;  %v1336_v7 = vmax.f32 %v1128_v12, 0.0  ;;  %v3467_v10 = vrot.slane %v3459_v2, %v8778_v35  ;;  %v3548_v22 = vcombine.high %v8858_v36, %v8864_v51 }
 0x209   : > { %v8898_v55 = vrot.slane %v3476_v46, %v8824_v6  ;;  %v3555_v11 = vrot.slane %v3547_v53, %v8778_v35  ;;  %v3563_v8 = vcombine.low %v8861_v27, %v8868_v52  ;;  %v3564_v34 = vcombine.high %v8861_v27, %v8868_v52  ;;  %v1132_v9 = vpop.f32.mrb[124].mxu0 }
 0x20a   : > { %v2217_v44 = vrot.slane %v1799_v59, 4  ;;  %v1806_v50 = vrot.slane %v1336_v7, %v7685_v58  ;;  %v3508_v21 = vcombine.high %v3451_v28, %v3467_v10  ;;  %v10451_v63 = vmov 0.0   ;;  %v7014_v29 = vpop.f32.mrb[125].mxu0 }
 0x20b   : > { %v3571_v48 = vrot.slane %v3563_v8, %v8778_v35  ;;  %v3579_v15 = vcombine.high %v3395_v47, %v10451_v63  ;;  %v3586_v25 = vrot.slane %v3395_v47, %v8778_v35  ;;  %v3594_v16 = vcombine.high %v3396_v57, %v10451_v63  ;;  %v1135_v42 = vpop.f32.mrb[126].mxu0 }
 0x20c   : > { %v2413_v18 = vmax.f32 %v1799_v59, %v2217_v44  ;;  %v2218_v24 = vrot.slane %v1806_v50, 4  ;;  %v3522_v41 = vrot.slane %v3508_v21, %v8824_v6  ;;  %v3601_v0 = vrot.slane %v3396_v57, %v8778_v35  ;;  %v7015_v46 = vpop.f32.mrb[127].mxu0 }
 0x20d   : > { %v8915_v30 = vrot.slane %v3579_v15, %v8778_v35  ;;  %v8918_v1 = vrot.slane %v3594_v16, %v8778_v35  ;;  %v3610_v45 = vcombine.high %v3555_v11, %v3571_v48  ;;  %v3475_v62 = vcombine.low %v3419_v3, %v3435_v40 }
 0x20e   : > { %v2414_v47 = vmax.f32 %v1806_v50, %v2218_v24  ;;  %v3541_v12 = vcombine.low %v8898_v55, %v3522_v41  ;;  %v3642_v56 = vcombine.high %v3586_v25, %v3601_v0  ;;  %v3507_v2 = vcombine.low %v3451_v28, %v3467_v10 }
 0x20f   : > { %v3624_v53 = vrot.slane %v3610_v45, %v8824_v6  ;;  %v8923_v57 = vrot.slane %v3475_v62, %v8824_v6  ;;  %v3609_v59 = vcombine.low %v3555_v11, %v3571_v48  ;;  %v3641_v7 = vcombine.low %v3586_v25, %v3601_v0 }
 0x210   : > { %v8925_v8 = vcombine.low %v2413_v18, %v2414_v47  ;;  %v3656_v44 = vrot.slane %v3642_v56, %v8824_v6  ;;  %v8929_v3 = vrot.slane %v3507_v2, %v8824_v6  ;;  %v1133_v40 = vadd.f32 %v8788_v33, %v1132_v9 }
 0x211   : > { %v8933_v50 = vrot.slane %v3609_v59, %v8824_v6  ;;  %v8936_v28 = vrot.slane %v3641_v7, %v8824_v6  ;;  %v1136_v10 = vadd.f32 %v8788_v33, %v1135_v42  ;;  %v2248_v11 = vrot.slane %v8782_v37, 4  ;;  %v1140_v0 = vpop.f32.mrb[128].mxu0 }
 0x212   : > { %v3675_v21 = vcombine.low %v3624_v53, %v3656_v44  ;;  %v3540_v48 = vcombine.high %v8923_v57, %v8929_v3  ;;  %v1337_v25 = vmax.f32 %v1133_v40, 0.0  ;;  %v3542_v62 = vcombine.high %v8898_v55, %v3522_v41  ;;  %v7018_v47 = vpop.f32.mrb[129].mxu0 }
 0x213   : > { %v3674_v9 = vcombine.high %v8933_v50, %v8936_v28  ;;  %v1338_v18 = vmax.f32 %v1136_v10, 0.0  ;;  %v2444_v24 = vmax.f32 %v8782_v37, %v2248_v11  ;;  %v3676_v42 = vcombine.high %v3624_v53, %v3656_v44  ;;  %v1143_v37 = vpop.f32.mrb[130].mxu0 }
 0x214   : > { %v8949_v29 = vpack.c.bf16 %v3675_v21, %v3541_v12  ;;  %v1813_v45 = vrot.slane %v1337_v25, %v7685_v58  ;;  %v1253_v59 = vadd.f32 %v8788_v33, %v8320_v5  ;;  %v8969_v55 = vrot.slane %v3412_v17, %v8778_v35  ;;  %v7019_v5 = vpop.f32.mrb[131].mxu0 }
 0x215   : > { %v8953_v56 = vpack.c.bf16 %v3674_v9, %v3540_v48  ;;  %v1820_v2 = vrot.slane %v1338_v18, %v7685_v58  ;;  %v8957_v46 = vcombine.low %v8255_v14, %v2444_v24  ;;  %v8963_v7 = vpack.c.bf16 %v3676_v42, %v3542_v62 }
 0x216   : > { %3946 = vrot.lane.b32.xlu1 %v8949_v29, %s10416_s22  ;;  %v2219_v12 = vrot.slane %v1813_v45, 4  ;;  %v8975_v14 = vrot.slane %v3428_v38, %v8778_v35  ;;  %v1367_v40 = vmax.f32 %v1253_v59, 0.0  ;;  %v8985_v31 = vrot.slane %v3444_v49, %v8778_v35 }
 0x217   : > { %3925 = vrot.lane.b32.xlu0 %v8953_v56, %s7387_s24  ;;  %v2220_v41 = vrot.slane %v1820_v2, 4  ;;  %v8991_v20 = vrot.slane %v3460_v43, %v8778_v35  ;;  %v9000_v10 = vrot.slane %v3548_v22, %v8778_v35  ;;  %v9006_v23 = vrot.slane %v3564_v34, %v8778_v35 }
 0x218   : > { %v2415_v26 = vmax.f32 %v1813_v45, %v2219_v12  ;;  %v3491_v4 = vcombine.low %v8969_v55, %v8975_v14  ;;  %v2023_v38 = vrot.slane %v1367_v40, %v7685_v58  ;;  %v3657_v61 = vcombine.low %v8915_v30, %v8918_v1 }
 0x219   : > { %v2416_v17 = vmax.f32 %v1820_v2, %v2220_v41  ;;  %v3523_v19 = vcombine.low %v8985_v31, %v8991_v20  ;;  %v1141_v36 = vadd.f32 %v8788_v33, %v1140_v0  ;;  %v3625_v52 = vcombine.low %v9000_v10, %v9006_v23  ;;  %v1148_v43 = vpop.f32.mrb[132].mxu0 }
 0x21a   : > { %3948 = vrot.lane.b32.xlu1 %v8963_v7, %s10416_s22  ;;  %v3499_v32 = vrot.slane %v3491_v4, %v8824_v6  ;;  %v2249_v27 = vrot.slane %v2023_v38, 4  ;;  %v1144_v49 = vadd.f32 %v8788_v33, %v1143_v37  ;;  %v3665_v34 = vrot.slane %v3657_v61, %v8824_v6  ;;  %v7022_v48 = vpop.f32.mrb[133].mxu0 }
 0x21b   : > { %v9016_v51 = vcombine.low %v2415_v26, %v2416_v17  ;;  %3927 = vrot.lane.b32.xlu0 %v8949_v29, %s7387_s24  ;;  %v3531_v22 = vrot.slane %v3523_v19, %v8824_v6  ;;  %v1339_v11 = vmax.f32 %v1141_v36, 0.0  ;;  %v1256_v21 = vadd.f32 %v8788_v33, %v8351_v60  ;;  %v1151_v0 = vpop.f32.mrb[134].mxu0 }
 0x21c   : > { %v2445_v47 = vmax.f32 %v2023_v38, %v2249_v27  ;;  %v7023_v60 = vpop.f32.mrb[135].mxu0  ;;  %v3633_v37 = vrot.slane %v3625_v52, %v8824_v6  ;;  %v1340_v40 = vmax.f32 %v1144_v49, 0.0  ;;  %v1261_v27 = vadd.f32 %v8788_v33, %v8366_v39 }
 0x21d   : > { %v3072_v25 = vrot.slane %v9016_v51, 3  ;;  %v3084_v9 = vrot.slane %v9016_v51, 4  ;;  %v3095_v18 = vrot.slane %v9016_v51, 5  ;;  %v3106_v24 = vrot.slane %v9016_v51, 6 }
 0x21e   : > { %v9033_v45 = vsel %vm2647_vm1, %v9016_v51, 0.0  ;;  %v3352_v62 = vrot.slane %v9016_v51, 1  ;;  %v3363_v42 = vrot.slane %v9016_v51, 2  ;;  %v3543_v59 = vcombine.low %v3499_v32, %v3531_v22 }
 0x21f   : > { %v9040_v2 = vsel %vm2647_vm1, %v3072_v25, 0.0  ;;  %3967 = vrot.lane.b32.xlu0 %v8963_v7, %s7388_s25  ;;  %v1827_v12 = vrot.slane %v1339_v11, %v7685_v58  ;;  %v1368_v26 = vmax.f32 %v1256_v21, 0.0  ;;  %v3677_v4 = vcombine.low %v3633_v37, %v3665_v34 }
 0x220   : > { %v9047_v5 = vsel %vm2647_vm1, %v3352_v62, 0.0  ;;  %v9050_v41 = vsel %vm2647_vm1, %v3363_v42, 0.0  ;;  %v3544_v38 = vcombine.high %v3499_v32, %v3531_v22  ;;  %v3678_v19 = vcombine.high %v3633_v37, %v3665_v34  ;;  %v10453_v37 = vld [vmem:[#allocation17_spill] sm:$0xff] }
 0x221   : > { %v2221_v17 = vrot.slane %v1827_v12, 4  ;;  %v1834_v61 = vrot.slane %v1340_v40, %v7685_v58  ;;  %v2030_v36 = vrot.slane %v1368_v26, %v7685_v58  ;;  %v1149_v52 = vadd.f32 %v8788_v33, %v1148_v43  ;;  %v1156_v21 = vpop.f32.mrb[136].mxu0  ;;  %v10452_v43 = vld [vmem:[#allocation16_spill] sm:$0xff] }
 0x222   : > { %v9057_v11 = vpack.c.bf16 %v3677_v4, %v3543_v59  ;;  %v9059_v62 = vpack.c.bf16 %v3678_v19, %v3544_v38  ;;  %v1152_v49 = vadd.f32 %v8788_v33, %v1151_v0  ;;  %v1369_v22 = vmax.f32 %v1261_v27, 0.0  ;;  %v7026_v60 = vpop.f32.mrb[137].mxu0 }
 0x223   : > { %v2417_v48 = vmax.f32 %v1827_v12, %v2221_v17  ;;  %v2222_v42 = vrot.slane %v1834_v61, 4  ;;  %v2250_v32 = vrot.slane %v2030_v36, 4  ;;  %v1341_v34 = vmax.f32 %v1149_v52, 0.0  ;;  %v1159_v40 = vpop.f32.mrb[138].mxu0 }
 0x224   : > { %3969 = vrot.lane.b32.xlu1 %v9057_v11, %s7388_s25  ;;  %3988 = vrot.lane.b32.xlu0 %v9057_v11, %s10419_s30  ;;  %v1342_v39 = vmax.f32 %v1152_v49, 0.0  ;;  %v1264_v59 = vadd.f32 %v8788_v33, %v10452_v43  ;;  %v1269_v0 = vadd.f32 %v8788_v33, %v10453_v37  ;;  %v3492_v12 = vcombine.high %v8969_v55, %v8975_v14  ;;  %v7027_v19 = vpop.f32.mrb[139].mxu0 }
 0x225   : > { %v2418_v26 = vmax.f32 %v1834_v61, %v2222_v42  ;;  %v2446_v4 = vmax.f32 %v2030_v36, %v2250_v32  ;;  %v2037_v17 = vrot.slane %v1369_v22, %v7685_v58  ;;  %v1841_v38 = vrot.slane %v1341_v34, %v7685_v58 }
 0x226   : > { %v1848_v27 = vrot.slane %v1342_v39, %v7685_v58  ;;  %v1370_v52 = vmax.f32 %v1264_v59, 0.0  ;;  %v1371_v49 = vmax.f32 %v1269_v0, 0.0  ;;  %v3506_v60 = vrot.slane %v3492_v12, %v8824_v6 }
 0x227   : > { %v9076_v43 = vcombine.low %v2417_v48, %v2418_v26  ;;  %v9078_v37 = vcombine.low %v2445_v47, %v2446_v4  ;;  %v2251_v16 = vrot.slane %v2037_v17, 4  ;;  %v2223_v55 = vrot.slane %v1841_v38, 4 }
 0x228   : > { %3990 = vrot.lane.b32.xlu1 %v9059_v62, %s10419_s30  ;;  %3929 = vrot.lane.b32.xlu0 %v8963_v7, %s7387_s24  ;;  %v2224_v14 = vrot.slane %v1848_v27, 4  ;;  %v2044_v61 = vrot.slane %v1370_v52, %v7685_v58  ;;  %v2051_v36 = vrot.slane %v1371_v49, %v7685_v58  ;;  %v3524_v42 = vcombine.high %v8985_v31, %v8991_v20 }
 0x229   : > { %v2447_v48 = vmax.f32 %v2037_v17, %v2251_v16  ;;  %v2419_v32 = vmax.f32 %v1841_v38, %v2223_v55  ;;  %v3626_v47 = vcombine.high %v9000_v10, %v9006_v23  ;;  %v3658_v22 = vcombine.high %v8915_v30, %v8918_v1 }
 0x22a   : > { %v2420_v34 = vmax.f32 %v1848_v27, %v2224_v14  ;;  %v2252_v39 = vrot.slane %v2044_v61, 4  ;;  %v2253_v59 = vrot.slane %v2051_v36, 4  ;;  %v3538_v0 = vrot.slane %v3524_v42, %v8824_v6 }
 0x22b   : > { %v3640_v12 = vrot.slane %v3626_v47, %v8824_v6  ;;  %v3672_v26 = vrot.slane %v3658_v22, %v8824_v6  ;;  %v1157_v4 = vadd.f32 %v8788_v33, %v1156_v21  ;;  %v1160_v16 = vadd.f32 %v8788_v33, %v1159_v40  ;;  %v10454_v40 = vld [vmem:[#allocation18_spill] sm:$0xff] }
 0x22c   : > { %3950 = vrot.lane.b32.xlu1 %v9057_v11, %s10416_s22  ;;  %v9099_v31 = vcombine.low %v2419_v32, %v2420_v34  ;;  %v2448_v20 = vmax.f32 %v2044_v61, %v2252_v39  ;;  %3931 = vrot.lane.b32.xlu0 %v9057_v11, %s7387_s24  ;;  %v2449_v30 = vmax.f32 %v2051_v36, %v2253_v59  ;;  %v3071_v1 = vsel %vm2647_vm1, %v8849_v13, 0.0 }
 0x22d   : > { %v3545_v10 = vcombine.low %v3506_v60, %v3538_v0  ;;  %v3679_v23 = vcombine.low %v3640_v12, %v3672_v26  ;;  %v1343_v17 = vmax.f32 %v1157_v4, 0.0  ;;  %v1344_v38 = vmax.f32 %v1160_v16, 0.0  ;;  %v10458_v16 = vld [vmem:[#allocation9_spill] sm:$0xff] }
 0x22e   : > { %v9105_v21 = vcombine.low %v2447_v48, %v2448_v20  ;;  %v1272_v19 = vadd.f32 %v8788_v33, %v10454_v40  ;;  %v3546_v27 = vcombine.high %v3506_v60, %v3538_v0  ;;  %v3680_v52 = vcombine.high %v3640_v12, %v3672_v26  ;;  %v10456_v60 = vld [vmem:[#allocation6_spill] sm:$0xff]  ;;  %v10457_v48 = vld [vmem:[#allocation13_spill] sm:$0xff] }
 0x22f   : > { %v9109_v49 = vpack.c.bf16 %v3679_v23, %v3545_v10  ;;  %v1855_v55 = vrot.slane %v1343_v17, %v7685_v58  ;;  %v1862_v14 = vrot.slane %v1344_v38, %v7685_v58  ;;  %v3073_v61 = vsel %vm2650_vm2, %v3072_v25, %v3071_v1 }
 0x230   : > { %3971 = vrot.lane.b32.xlu1 %v9059_v62, %s7388_s25  ;;  %3952 = vrot.lane.b32.xlu0 %v9059_v62, %s10416_s22  ;;  %v1372_v36 = vmax.f32 %v1272_v19, 0.0  ;;  %v9120_v33 = vpack.c.bf16 %v3680_v52, %v3546_v27  ;;  %v3074_v42 = vrot.slane %v10456_v60, 6  ;;  %v3078_v32 = vrot.slane %v10457_v48, 4 }
 0x231   : > { %v2225_v47 = vrot.slane %v1855_v55, 4  ;;  %v2226_v22 = vrot.slane %v1862_v14, 4  ;;  %v10411_v34 = vrot.slane %v8957_v46, 7  ;;  %v3082_v39 = vrot.slane %v8849_v13, 1 }
 0x232   : > { %10455 = vst [vmem:[#allocation16_spill] sm:$0xff] %v9120_v33  ;;  %v2058_v25 = vrot.slane %v1372_v36, %v7685_v58  ;;  %v3075_v59 = vsel %vm2653_vm3, %v3074_v42, %v3073_v61  ;;  %v3086_v0 = vrot.slane %v10456_v60, 7  ;;  %v3090_v12 = vrot.slane %v10457_v48, 5 }
 0x233   : > { %v2421_v26 = vmax.f32 %v1855_v55, %v2225_v47  ;;  %v2422_v4 = vmax.f32 %v1862_v14, %v2226_v22  ;;  %v10459_v20 = vrot.slane %v10458_v16, 1  ;;  %v3083_v10 = vsel %vm2647_vm1, %v3082_v39, 0.0 }
 0x234   : > { %3992 = vrot.lane.b32.xlu1 %v9109_v49, %s10419_s30  ;;  %v2254_v23 = vrot.slane %v2058_v25, 4  ;;  %3973 = vrot.lane.b32.xlu0 %v9109_v49, %s7388_s25  ;;  %v3085_v38 = vsel %vm2650_vm2, %v3084_v9, %v3083_v10  ;;  %v3093_v40 = vrot.slane %v8849_v13, 2  ;;  %v3100_v55 = vrot.slane %v10457_v48, 6 }
 0x235   : > { %v3077_v1 = vsel %vm2656_vm4, %v10459_v20, %v3075_v59  ;;  %v9143_v19 = vcombine.low %v2421_v26, %v2422_v4  ;;  %v3087_v52 = vsel %vm2653_vm3, %v3086_v0, %v3085_v38  ;;  %v10460_v61 = vrot.slane %v10458_v16, 2 }
 0x236   : > { %v3079_v17 = vsel %vm2659_vm5, %v3078_v32, %v3077_v1  ;;  %v2450_v14 = vmax.f32 %v2058_v25, %v2254_v23  ;;  %v3094_v9 = vsel %vm2647_vm1, %v3093_v40, 0.0  ;;  %v3102_v42 = vrot.slane %v8957_v46, 1 }
 0x237   : > { %v9148_v27 = vsel %vm2662_vm6, %v10411_v34, %v3079_v17  ;;  %v3089_v36 = vsel %vm2656_vm4, %v10460_v61, %v3087_v52  ;;  %v3096_v47 = vsel %vm2650_vm2, %v3095_v18, %v3094_v9  ;;  %v3104_v22 = vrot.slane %v8849_v13, 3 }
 0x238   : > { %v3091_v32 = vsel %vm2659_vm5, %v3090_v12, %v3089_v36  ;;  %v3108_v39 = vrot.slane %v10456_v60, 1  ;;  %v9163_v59 = vcombine.low %v2449_v30, %v2450_v14  ;;  %3994 = vrot.lane.b32.xlu1 %v9120_v33, %s10419_s30  ;;  %3933 = vrot.lane.b32.xlu0 %v9059_v62, %s7387_s24  ;;  %v3097_v0 = vsel %vm2653_vm3, %v10456_v60, %v3096_v47  ;;  %v10462_v14 = vld [vmem:[#allocation10_spill] sm:$0xff] }
 0x239   : > { %v9171_v25 = vsel %vm2662_vm6, %v8957_v46, %v3091_v32  ;;  %v3112_v18 = vrot.slane %v10457_v48, 7  ;;  %v10461_v12 = vrot.slane %v10458_v16, 3  ;;  %v3105_v26 = vsel %vm2647_vm1, %v3104_v22, 0.0 }
 0x23a   : > { %v3114_v4 = vrot.slane %v8957_v46, 2  ;;  %v3116_v20 = vrot.slane %v8849_v13, 4  ;;  %v3107_v10 = vsel %vm2650_vm2, %v3106_v24, %v3105_v26  ;;  %v3118_v23 = vrot.slane %v9076_v43, 7 }
 0x23b   : > { %v3099_v30 = vsel %vm2656_vm4, %v10461_v12, %v3097_v0  ;;  %v3120_v17 = vrot.slane %v10456_v60, 2  ;;  %v3109_v40 = vsel %vm2653_vm3, %v3108_v39, %v3107_v10  ;;  %v3122_v61 = vrot.slane %v10462_v14, 5 }
 0x23c   : > { %v3101_v1 = vsel %vm2659_vm5, %v3100_v55, %v3099_v30  ;;  %v3117_v52 = vsel %vm2647_vm1, %v3116_v20, 0.0  ;;  %3954 = vrot.lane.b32.xlu1 %v9109_v49, %s10416_s22  ;;  %3975 = vrot.lane.b32.xlu0 %v9120_v33, %s7388_s25  ;;  %v10463_v51 = vrot.slane %v10458_v16, 4  ;;  %v3125_v36 = vrot.slane %v9078_v37, 3 }
 0x23d   : > { %v9189_v38 = vsel %vm2662_vm6, %v3102_v42, %v3101_v1  ;;  %v3119_v55 = vsel %vm2650_vm2, %v3118_v23, %v3117_v52  ;;  %v3127_v9 = vrot.slane %v8849_v13, 5  ;;  %v3130_v47 = vrot.slane %v10456_v60, 3 }
 0x23e   : > { %v3111_v24 = vsel %vm2656_vm4, %v10463_v51, %v3109_v40  ;;  %v3121_v32 = vsel %vm2653_vm3, %v3120_v17, %v3119_v55  ;;  %v3132_v22 = vrot.slane %v10462_v14, 6  ;;  %v3134_v30 = vrot.slane %v10457_v48, 1 }
 0x23f   : > { %v3113_v42 = vsel %vm2659_vm5, %v3112_v18, %v3111_v24  ;;  %v3123_v0 = vsel %vm2656_vm4, %v3122_v61, %v3121_v32  ;;  %v3128_v12 = vsel %vm2647_vm1, %v3127_v9, 0.0  ;;  %v3136_v20 = vrot.slane %v9078_v37, 4 }
 0x240   : > { %v9209_v39 = vsel %vm2662_vm6, %v3114_v4, %v3113_v42  ;;  %v3124_v26 = vsel %vm2659_vm5, %v10457_v48, %v3123_v0  ;;  %v3129_v18 = vsel %vm2650_vm2, %v9076_v43, %v3128_v12  ;;  %v3138_v1 = vrot.slane %v8849_v13, 6  ;;  %3956 = vrot.lane.b32.xlu1 %v9120_v33, %s10416_s22  ;;  %3935 = vrot.lane.b32.xlu0 %v9109_v49, %s7387_s24 }
 0x241   : > { %v9225_v4 = vsel %vm2662_vm6, %v3125_v36, %v3124_v26  ;;  %v3131_v10 = vsel %vm2653_vm3, %v3130_v47, %v3129_v18  ;;  %v3140_v23 = vrot.slane %v9076_v43, 1  ;;  %v3142_v17 = vrot.slane %v10456_v60, 4 }
 0x242   : > { %v3133_v40 = vsel %vm2656_vm4, %v3132_v22, %v3131_v10  ;;  %v3139_v52 = vsel %vm2647_vm1, %v3138_v1, 0.0  ;;  %v3144_v61 = vrot.slane %v10462_v14, 7  ;;  %v3146_v51 = vrot.slane %v10457_v48, 2 }
 0x243   : > { %v3135_v24 = vsel %vm2659_vm5, %v3134_v30, %v3133_v40  ;;  %v3141_v55 = vsel %vm2650_vm2, %v3140_v23, %v3139_v52  ;;  %v3148_v36 = vrot.slane %v9078_v37, 5  ;;  %v3150_v9 = vrot.slane %v8849_v13, 7  ;;  %v10464_v23 = vld [vmem:[#allocation7_spill] sm:$0xff] }
 0x244   : > { %v9239_v42 = vsel %vm2662_vm6, %v3136_v20, %v3135_v24  ;;  %v3143_v32 = vsel %vm2653_vm3, %v3142_v17, %v3141_v55  ;;  %v3152_v47 = vrot.slane %v9076_v43, 2  ;;  %v3154_v22 = vrot.slane %v10456_v60, 5  ;;  %3937 = vrot.lane.b32.xlu0 %v9120_v33, %s7387_s24 }
 0x245   : > { %v3145_v0 = vsel %vm2656_vm4, %v3144_v61, %v3143_v32  ;;  %v3151_v12 = vsel %vm2647_vm1, %v3150_v9, 0.0  ;;  %v3157_v30 = vrot.slane %v10457_v48, 3  ;;  %v3159_v13 = vrot.slane %v9078_v37, 6  ;;  %v10465_v61 = vld [vmem:[#allocation14_spill] sm:$0xff] }
 0x246   : > { %v3147_v26 = vsel %vm2659_vm5, %v3146_v51, %v3145_v0  ;;  %v3153_v18 = vsel %vm2650_vm2, %v3152_v47, %v3151_v12  ;;  %v3161_v20 = vsel %vm2647_vm1, %v8893_v54, 0.0  ;;  %v3162_v60 = vrot.slane %v9076_v43, 3 }
 0x247   : > { %v9256_v1 = vsel %vm2662_vm6, %v3148_v36, %v3147_v26  ;;  %v3155_v10 = vsel %vm2653_vm3, %v3154_v22, %v3153_v18  ;;  %v3164_v17 = vrot.slane %v10464_v23, 6  ;;  %v3166_v48 = vrot.slane %v10462_v14, 1 }
 0x248   : > { %v3156_v40 = vsel %vm2656_vm4, %v10462_v14, %v3155_v10  ;;  %v3163_v52 = vsel %vm2650_vm2, %v3162_v60, %v3161_v20  ;;  %v3168_v51 = vrot.slane %v10465_v61, 4  ;;  %v3170_v24 = vrot.slane %v9078_v37, 7 }
 0x249   : > { %v3158_v55 = vsel %vm2659_vm5, %v3157_v30, %v3156_v40  ;;  %v3165_v36 = vsel %vm2653_vm3, %v3164_v17, %v3163_v52  ;;  %v3172_v9 = vrot.slane %v8893_v54, 1  ;;  %v3174_v32 = vrot.slane %v9076_v43, 4 }
 0x24a   : > { %v9271_v47 = vsel %vm2662_vm6, %v3159_v13, %v3158_v55  ;;  %v3167_v22 = vsel %vm2656_vm4, %v3166_v48, %v3165_v36  ;;  %v3176_v0 = vrot.slane %v10464_v23, 7  ;;  %v3178_v12 = vrot.slane %v10462_v14, 2 }
 0x24b   : > { %v3169_v26 = vsel %vm2659_vm5, %v3168_v51, %v3167_v22  ;;  %v3173_v18 = vsel %vm2647_vm1, %v3172_v9, 0.0  ;;  %v3180_v30 = vrot.slane %v10465_v61, 5  ;;  %v3183_v20 = vrot.slane %v8893_v54, 2 }
 0x24c   : > { %v9281_v60 = vsel %vm2662_vm6, %v3170_v24, %v3169_v26  ;;  %v3175_v13 = vsel %vm2650_vm2, %v3174_v32, %v3173_v18  ;;  %v3185_v10 = vrot.slane %v9076_v43, 5  ;;  %v3188_v17 = vrot.slane %v10462_v14, 3 }
 0x24d   : > { %v3177_v48 = vsel %vm2653_vm3, %v3176_v0, %v3175_v13  ;;  %v3184_v40 = vsel %vm2647_vm1, %v3183_v20, 0.0  ;;  %v3190_v52 = vrot.slane %v10465_v61, 6  ;;  %v3192_v51 = vrot.slane %v9078_v37, 1 }
 0x24e   : > { %v3179_v55 = vsel %vm2656_vm4, %v3178_v12, %v3177_v48  ;;  %v3186_v36 = vsel %vm2650_vm2, %v3185_v10, %v3184_v40  ;;  %v3194_v24 = vrot.slane %v8893_v54, 3  ;;  %v3196_v9 = vrot.slane %v9076_v43, 6 }
 0x24f   : > { %v3181_v32 = vsel %vm2659_vm5, %v3180_v30, %v3179_v55  ;;  %v3187_v22 = vsel %vm2653_vm3, %v10464_v23, %v3186_v36  ;;  %v3198_v0 = vrot.slane %v10464_v23, 1  ;;  %v3200_v26 = vrot.slane %v10462_v14, 4 }
 0x250   : > { %v9301_v18 = vsel %vm2662_vm6, %v9078_v37, %v3181_v32  ;;  %v3189_v12 = vsel %vm2656_vm4, %v3188_v17, %v3187_v22  ;;  %v3195_v20 = vsel %vm2647_vm1, %v3194_v24, 0.0  ;;  %v3202_v13 = vrot.slane %v10465_v61, 7 }
 0x251   : > { %v3191_v43 = vsel %vm2659_vm5, %v3190_v52, %v3189_v12  ;;  %v3197_v30 = vsel %vm2650_vm2, %v3196_v9, %v3195_v20  ;;  %v3204_v10 = vrot.slane %v9078_v37, 2  ;;  %v3206_v48 = vrot.slane %v8893_v54, 4  ;;  %v10466_v52 = vld [vmem:[#allocation11_spill] sm:$0xff] }
 0x252   : > { %v9311_v14 = vsel %vm2662_vm6, %v3192_v51, %v3191_v43  ;;  %v3199_v40 = vsel %vm2653_vm3, %v3198_v0, %v3197_v30  ;;  %v3208_v55 = vrot.slane %v9099_v31, 7  ;;  %v3210_v17 = vrot.slane %v10464_v23, 2 }
 0x253   : > { %v3201_v36 = vsel %vm2656_vm4, %v3200_v26, %v3199_v40  ;;  %v3207_v24 = vsel %vm2647_vm1, %v3206_v48, 0.0  ;;  %v3212_v32 = vrot.slane %v10466_v52, 5  ;;  %v3215_v9 = vrot.slane %v9105_v21, 3 }
 0x254   : > { %v3203_v37 = vsel %vm2659_vm5, %v3202_v13, %v3201_v36  ;;  %v3209_v22 = vsel %vm2650_vm2, %v3208_v55, %v3207_v24  ;;  %v3217_v51 = vrot.slane %v8893_v54, 5  ;;  %v3220_v0 = vrot.slane %v10464_v23, 3 }
 0x255   : > { %v9325_v12 = vsel %vm2662_vm6, %v3204_v10, %v3203_v37  ;;  %v3211_v20 = vsel %vm2653_vm3, %v3210_v17, %v3209_v22  ;;  %v3222_v26 = vrot.slane %v10466_v52, 6  ;;  %v3224_v43 = vrot.slane %v10465_v61, 1 }
 0x256   : > { %v3213_v30 = vsel %vm2656_vm4, %v3212_v32, %v3211_v20  ;;  %v3218_v48 = vsel %vm2647_vm1, %v3217_v51, 0.0  ;;  %v3226_v13 = vrot.slane %v9105_v21, 4  ;;  %v3228_v40 = vrot.slane %v8893_v54, 6 }
 0x257   : > { %v3214_v55 = vsel %vm2659_vm5, %v10465_v61, %v3213_v30  ;;  %v3219_v10 = vsel %vm2650_vm2, %v9099_v31, %v3218_v48  ;;  %v3230_v17 = vrot.slane %v9099_v31, 1  ;;  %v3232_v36 = vrot.slane %v10464_v23, 4 }
 0x258   : > { %v9341_v24 = vsel %vm2662_vm6, %v3215_v9, %v3214_v55  ;;  %v3221_v32 = vsel %vm2653_vm3, %v3220_v0, %v3219_v10  ;;  %v3229_v37 = vsel %vm2647_vm1, %v3228_v40, 0.0  ;;  %v3234_v22 = vrot.slane %v10466_v52, 7 }
 0x259   : > { %v3223_v51 = vsel %vm2656_vm4, %v3222_v26, %v3221_v32  ;;  %v3231_v20 = vsel %vm2650_vm2, %v3230_v17, %v3229_v37  ;;  %v3236_v30 = vrot.slane %v10465_v61, 2  ;;  %v3238_v48 = vrot.slane %v9105_v21, 5 }
 0x25a   : > { %v3225_v15 = vsel %vm2659_vm5, %v3224_v43, %v3223_v51  ;;  %v3233_v34 = vsel %vm2653_vm3, %v3232_v36, %v3231_v20  ;;  %v3240_v9 = vrot.slane %v8893_v54, 7  ;;  %v3242_v0 = vrot.slane %v9099_v31, 2 }
 0x25b   : > { %v9355_v40 = vsel %vm2662_vm6, %v3226_v13, %v3225_v15  ;;  %v3235_v55 = vsel %vm2656_vm4, %v3234_v22, %v3233_v34  ;;  %v3244_v26 = vrot.slane %v10464_v23, 5  ;;  %v3247_v10 = vrot.slane %v10465_v61, 3  ;;  %v10467_v13 = vld [vmem:[#allocation8_spill] sm:$0xff]  ;;  %v10468_v22 = vld [vmem:[#allocation15_spill] sm:$0xff] }
 0x25c   : > { %v3237_v17 = vsel %vm2659_vm5, %v3236_v30, %v3235_v55  ;;  %v3241_v32 = vsel %vm2647_vm1, %v3240_v9, 0.0  ;;  %v3249_v43 = vrot.slane %v9105_v21, 6  ;;  %v3251_v54 = vsel %vm2647_vm1, %v8925_v8, 0.0 }
 0x25d   : > { %v9366_v36 = vsel %vm2662_vm6, %v3238_v48, %v3237_v17  ;;  %v3243_v15 = vsel %vm2650_vm2, %v3242_v0, %v3241_v32  ;;  %v3252_v34 = vrot.slane %v9099_v31, 3  ;;  %v3254_v23 = vrot.slane %v10467_v13, 6 }
 0x25e   : > { %v3245_v61 = vsel %vm2653_vm3, %v3244_v26, %v3243_v15  ;;  %v3256_v37 = vrot.slane %v10466_v52, 1  ;;  %v3258_v51 = vrot.slane %v10468_v22, 4  ;;  %v3260_v20 = vrot.slane %v9105_v21, 7 }
 0x25f   : > { %v3246_v30 = vsel %vm2656_vm4, %v10466_v52, %v3245_v61  ;;  %v3253_v48 = vsel %vm2650_vm2, %v3252_v34, %v3251_v54  ;;  %v3262_v9 = vrot.slane %v8925_v8, 1  ;;  %v3264_v0 = vrot.slane %v9099_v31, 4 }
 0x260   : > { %v3248_v55 = vsel %vm2659_vm5, %v3247_v10, %v3246_v30  ;;  %v3255_v17 = vsel %vm2653_vm3, %v3254_v23, %v3253_v48  ;;  %v3266_v26 = vrot.slane %v10467_v13, 7  ;;  %v3268_v32 = vrot.slane %v10466_v52, 2 }
 0x261   : > { %v9385_v15 = vsel %vm2662_vm6, %v3249_v43, %v3248_v55  ;;  %v3257_v44 = vsel %vm2656_vm4, %v3256_v37, %v3255_v17  ;;  %v3263_v61 = vsel %vm2647_vm1, %v3262_v9, 0.0  ;;  %v3270_v54 = vrot.slane %v10468_v22, 5 }
 0x262   : > { %v3259_v34 = vsel %vm2659_vm5, %v3258_v51, %v3257_v44  ;;  %v3265_v53 = vsel %vm2650_vm2, %v3264_v0, %v3263_v61  ;;  %v3273_v10 = vrot.slane %v8925_v8, 2  ;;  %v3275_v23 = vrot.slane %v9099_v31, 5 }
 0x263   : > { %v9395_v30 = vsel %vm2662_vm6, %v3260_v20, %v3259_v34  ;;  %v3267_v43 = vsel %vm2653_vm3, %v3266_v26, %v3265_v53  ;;  %v3278_v48 = vrot.slane %v10466_v52, 3  ;;  %v3280_v37 = vrot.slane %v10468_v22, 6 }
 0x264   : > { %v3269_v9 = vsel %vm2656_vm4, %v3268_v32, %v3267_v43  ;;  %v3274_v55 = vsel %vm2647_vm1, %v3273_v10, 0.0  ;;  %v3282_v44 = vrot.slane %v9105_v21, 1  ;;  %v3284_v51 = vrot.slane %v8925_v8, 3 }
 0x265   : > { %v3271_v0 = vsel %vm2659_vm5, %v3270_v54, %v3269_v9  ;;  %v3276_v17 = vsel %vm2650_vm2, %v3275_v23, %v3274_v55  ;;  %v3286_v20 = vrot.slane %v9099_v31, 6  ;;  %v3288_v53 = vrot.slane %v10467_v13, 1 }
 0x266   : > { %v9410_v26 = vsel %vm2662_vm6, %v9105_v21, %v3271_v0  ;;  %v3277_v32 = vsel %vm2653_vm3, %v10467_v13, %v3276_v17  ;;  %v3285_v61 = vsel %vm2647_vm1, %v3284_v51, 0.0  ;;  %v3290_v34 = vrot.slane %v10466_v52, 4  ;;  %v10469_v17 = vld [vmem:[#allocation12_spill] sm:$0xff] }
 0x267   : > { %v3279_v10 = vsel %vm2656_vm4, %v3278_v48, %v3277_v32  ;;  %v3287_v54 = vsel %vm2650_vm2, %v3286_v20, %v3285_v61  ;;  %v3292_v23 = vrot.slane %v10468_v22, 7  ;;  %v3294_v31 = vrot.slane %v9105_v21, 2 }
 0x268   : > { %v3281_v43 = vsel %vm2659_vm5, %v3280_v37, %v3279_v10  ;;  %v3289_v9 = vsel %vm2653_vm3, %v3288_v53, %v3287_v54  ;;  %v3296_v55 = vrot.slane %v8925_v8, 4  ;;  %v3298_v0 = vrot.slane %v9143_v19, 7 }
 0x269   : > { %v9425_v51 = vsel %vm2662_vm6, %v3282_v44, %v3281_v43  ;;  %v3291_v52 = vsel %vm2656_vm4, %v3290_v34, %v3289_v9  ;;  %v3300_v48 = vrot.slane %v10467_v13, 2  ;;  %v3302_v20 = vrot.slane %v10469_v17, 5 }
 0x26a   : > { %v3293_v32 = vsel %vm2659_vm5, %v3292_v23, %v3291_v52  ;;  %v3297_v21 = vsel %vm2647_vm1, %v3296_v55, 0.0  ;;  %v3305_v37 = vrot.slane %v9163_v59, 3  ;;  %v3307_v53 = vrot.slane %v8925_v8, 5 }
 0x26b   : > { %v9435_v61 = vsel %vm2662_vm6, %v3294_v31, %v3293_v32  ;;  %v3299_v44 = vsel %vm2650_vm2, %v3298_v0, %v3297_v21  ;;  %v3310_v10 = vrot.slane %v10467_v13, 3  ;;  %v3312_v34 = vrot.slane %v10469_v17, 6 }
 0x26c   : > { %v3301_v54 = vsel %vm2653_vm3, %v3300_v48, %v3299_v44  ;;  %v3308_v43 = vsel %vm2647_vm1, %v3307_v53, 0.0  ;;  %v3314_v23 = vrot.slane %v10468_v22, 1  ;;  %v3316_v9 = vrot.slane %v9163_v59, 4 }
 0x26d   : > { %v3303_v55 = vsel %vm2656_vm4, %v3302_v20, %v3301_v54  ;;  %v3309_v31 = vsel %vm2650_vm2, %v9143_v19, %v3308_v43  ;;  %v3318_v52 = vrot.slane %v8925_v8, 6  ;;  %v3320_v0 = vrot.slane %v9143_v19, 1 }
 0x26e   : > { %v3304_v32 = vsel %vm2659_vm5, %v10468_v22, %v3303_v55  ;;  %v3311_v48 = vsel %vm2653_vm3, %v3310_v10, %v3309_v31  ;;  %v3322_v21 = vrot.slane %v10467_v13, 4  ;;  %v3324_v53 = vrot.slane %v10469_v17, 7 }
 0x26f   : > { %v3306_v44 = vsel %vm2662_vm6, %v3305_v37, %v3304_v32  ;;  %v3313_v20 = vsel %vm2656_vm4, %v3312_v34, %v3311_v48  ;;  %v3319_v54 = vsel %vm2647_vm1, %v3318_v52, 0.0  ;;  %v3326_v43 = vrot.slane %v10468_v22, 2 }
 0x270   : > { %v3315_v63 = vsel %vm2659_vm5, %v3314_v23, %v3313_v20  ;;  %v3321_v58 = vsel %vm2650_vm2, %v3320_v0, %v3319_v54  ;;  %v3328_v55 = vrot.slane %v9163_v59, 5  ;;  %v3330_v10 = vrot.slane %v8925_v8, 7 }
 0x271   : > { %v3317_v31 = vsel %vm2662_vm6, %v3316_v9, %v3315_v63  ;;  %v3323_v33 = vsel %vm2653_vm3, %v3322_v21, %v3321_v58  ;;  %v3332_v37 = vrot.slane %v9143_v19, 2  ;;  %v3334_v34 = vrot.slane %v10467_v13, 5 }
 0x272   : > { %v3325_v52 = vsel %vm2656_vm4, %v3324_v53, %v3323_v33  ;;  %v3331_v32 = vsel %vm2647_vm1, %v3330_v10, 0.0  ;;  %v3337_v23 = vrot.slane %v10468_v22, 3  ;;  %v3339_v0 = vrot.slane %v9163_v59, 6 }
 0x273   : > { %v3327_v48 = vsel %vm2659_vm5, %v3326_v43, %v3325_v52  ;;  %v3333_v8 = vsel %vm2650_vm2, %v3332_v37, %v3331_v32  ;;  %v3342_v63 = vrot.slane %v9143_v19, 3  ;;  %v3346_v58 = vrot.slane %v10469_v17, 1 }
 0x274   : > { %v3329_v9 = vsel %vm2662_vm6, %v3328_v55, %v3327_v48  ;;  %v3335_v13 = vsel %vm2653_vm3, %v3334_v34, %v3333_v8  ;;  %v3350_v33 = vrot.slane %v9163_v59, 7  ;;  %v3354_v21 = vrot.slane %v9143_v19, 4 }
 0x275   : > { %v3336_v22 = vsel %vm2656_vm4, %v10469_v17, %v3335_v13  ;;  %v3343_v53 = vsel %vm2650_vm2, %v3342_v63, %v9033_v45  ;;  %v3358_v20 = vrot.slane %v10469_v17, 2  ;;  %v3365_v54 = vrot.slane %v9143_v19, 5 }
 0x276   : > { %v3338_v43 = vsel %vm2659_vm5, %v3337_v23, %v3336_v22  ;;  %v10470_v55 = vrot.slane %v10458_v16, 6  ;;  %v3355_v37 = vsel %vm2650_vm2, %v3354_v21, %v9047_v5  ;;  %v3368_v34 = vrot.slane %v10469_v17, 3 }
 0x277   : > { %v3340_v52 = vsel %vm2662_vm6, %v3339_v0, %v3338_v43  ;;  %v10471_v45 = vrot.slane %v10458_v16, 7  ;;  %v3366_v23 = vsel %vm2650_vm2, %v3365_v54, %v9050_v41  ;;  %v10472_v8 = vrot.slane %v8957_v46, 4 }
 0x278   : > { %v3345_v10 = vsel %vm2653_vm3, %v10470_v55, %v3343_v53  ;;  %v3367_v5 = vsel %vm2653_vm3, %v10458_v16, %v3366_v23  ;;  %v3370_v0 = vrot.slane %v8957_v46, 6  ;;  %v10473_v21 = vrot.slane %v8957_v46, 5 }
 0x279   : > { %v3347_v32 = vsel %vm2656_vm4, %v3346_v58, %v3345_v10  ;;  %v3357_v48 = vsel %vm2653_vm3, %v10471_v45, %v3355_v37  ;;  %v3369_v53 = vsel %vm2656_vm4, %v3368_v34, %v3367_v5  ;;  %v3372_v41 = vrot.slane %v9163_v59, 1 }
 0x27a   : > { %v3349_v63 = vsel %vm2659_vm5, %v10472_v8, %v3347_v32  ;;  %v3359_v13 = vsel %vm2656_vm4, %v3358_v20, %v3357_v48  ;;  %v3371_v20 = vsel %vm2659_vm5, %v3370_v0, %v3369_v53  ;;  %v3375_v43 = vrot.slane %v9143_v19, 6 }
 0x27b   : > { %v3351_v58 = vsel %vm2662_vm6, %v3350_v33, %v3349_v63  ;;  %v3361_v22 = vsel %vm2659_vm5, %v10473_v21, %v3359_v13  ;;  %v3378_v55 = vrot.slane %v10469_v17, 4  ;;  %v3373_v10 = vsel %vm2662_vm6, %v3372_v41, %v3371_v20 }
 0x27c   : > { %v3362_v54 = vsel %vm2662_vm6, %v9163_v59, %v3361_v22  ;;  %v3381_v33 = vrot.slane %v9163_v59, 2  ;;  %v3397_v37 = vmax.f32 %v9148_v27, %v9366_v36  ;;  %v9522_v34 = vmax.f32 %v9171_v25, %v9385_v15 }
 0x27d   : > { %v3376_v32 = vsel %vm2650_vm2, %v3375_v43, %v9040_v2  ;;  %v3399_v45 = vmax.f32 %v9189_v38, %v9395_v30  ;;  %v9530_v19 = vmax.f32 %v9209_v39, %v9410_v26  ;;  %v9534_v59 = vmax.f32 %v9225_v4, %v9425_v51 }
 0x27e   : > { %v10474_v27 = vrot.slane %v10458_v16, 1  ;;  %v9541_v25 = vmax.f32 %v9239_v42, %v9435_v61  ;;  %v3403_v2 = vmax.f32 %v9256_v1, %v3306_v44  ;;  %v3404_v38 = vmax.f32 %v9271_v47, %v3317_v31 }
 0x27f   : > { %v9547_v39 = vmax.f32 %v9281_v60, %v3329_v9  ;;  %v9550_v4 = vmax.f32 %v9301_v18, %v3340_v52  ;;  %v9553_v16 = vmax.f32 %v9311_v14, %v3351_v58  ;;  %v10475_v30 = vrot.slane %v8957_v46, 7 }
 0x280   : > { %v3377_v36 = vsel %vm2653_vm3, %v10474_v27, %v3376_v32  ;;  %v9559_v26 = vmax.f32 %v9325_v12, %v3362_v54  ;;  %v9562_v1 = vmax.f32 %v9341_v24, %v3373_v10  ;;  %v3681_v47 = vcombine.low %v3397_v37, %v3399_v45 }
 0x281   : > { %v3379_v15 = vsel %vm2656_vm4, %v3378_v55, %v3377_v36  ;;  %v3697_v18 = vcombine.low %v9522_v34, %v9530_v19  ;;  %v3713_v51 = vcombine.low %v9534_v59, %v3403_v2  ;;  %v3729_v14 = vcombine.low %v9541_v25, %v3404_v38 }
 0x282   : > { %v3380_v42 = vsel %vm2659_vm5, %v10475_v30, %v3379_v15  ;;  %v3689_v17 = vrot.slane %v3681_v47, %v8778_v35  ;;  %v3799_v12 = vcombine.low %v9547_v39, %v9553_v16  ;;  %v3815_v24 = vcombine.low %v9550_v4, %v9559_v26 }
 0x283   : > { %v3382_v60 = vsel %vm2662_vm6, %v3381_v33, %v3380_v42  ;;  %v3705_v61 = vrot.slane %v3697_v18, %v8778_v35  ;;  %v3721_v44 = vrot.slane %v3713_v51, %v8778_v35  ;;  %v3737_v31 = vrot.slane %v3729_v14, %v8778_v35 }
 0x284   : > { %v9570_v46 = vmax.f32 %v9355_v40, %v3382_v60  ;;  %v3837_v9 = vrot.slane %v9562_v1, %v8778_v35  ;;  %v3807_v40 = vrot.slane %v3799_v12, %v8778_v35  ;;  %v3823_v52 = vrot.slane %v3815_v24, %v8778_v35 }
 0x285   : > { %v3682_v23 = vcombine.high %v3397_v37, %v3399_v45  ;;  %v3745_v8 = vcombine.low %v3689_v17, %v3705_v61  ;;  %v3769_v63 = vcombine.low %v3721_v44, %v3737_v31  ;;  %v3746_v13 = vcombine.high %v3689_v17, %v3705_v61 }
 0x286   : > { %v3845_v48 = vrot.slane %v9570_v46, %v8778_v35  ;;  %v3770_v5 = vcombine.high %v3721_v44, %v3737_v31  ;;  %v3847_v0 = vcombine.low %v3807_v40, %v3823_v52  ;;  %v3848_v21 = vcombine.high %v3807_v40, %v3823_v52 }
 0x287   : > { %v3753_v53 = vrot.slane %v3745_v8, %v8824_v6  ;;  %v3777_v41 = vrot.slane %v3769_v63, %v8824_v6  ;;  %v3760_v54 = vrot.slane %v3746_v13, %v8824_v6  ;;  %v3696_v60 = vrot.slane %v3682_v23, %v8778_v35 }
 0x288   : > { %v3871_v58 = vcombine.low %v3837_v9, %v3845_v48  ;;  %v3872_v22 = vcombine.high %v3837_v9, %v3845_v48  ;;  %v3784_v20 = vrot.slane %v3770_v5, %v8824_v6  ;;  %v3855_v43 = vrot.slane %v3847_v0, %v8824_v6  ;;  %v3947_v44 = vpop.permute.xlu1 %3946 }
 0x289   : > { %v3862_v10 = vrot.slane %v3848_v21, %v8824_v6  ;;  %v3793_v37 = vcombine.low %v3753_v53, %v3777_v41  ;;  %v3794_v32 = vcombine.high %v3753_v53, %v3777_v41  ;;  %v3926_v47 = vpop.permute.xlu0 %3925  ;;  %v3698_v18 = vcombine.high %v9522_v34, %v9530_v19 }
 0x28a   : > { %v3879_v55 = vrot.slane %v3871_v58, %v8824_v6  ;;  %v3886_v33 = vrot.slane %v3872_v22, %v8824_v6  ;;  %v3795_v45 = vcombine.low %v3760_v54, %v3784_v20  ;;  %v3796_v27 = vcombine.high %v3760_v54, %v3784_v20 }
 0x28b   : > { %v3714_v51 = vcombine.high %v9534_v59, %v3403_v2  ;;  %v3730_v14 = vcombine.high %v9541_v25, %v3404_v38  ;;  %v3712_v31 = vrot.slane %v3698_v18, %v8778_v35  ;;  %v3800_v34 = vcombine.high %v9547_v39, %v9553_v16 }
 0x28c   : > { %v3895_v36 = vcombine.low %v3855_v43, %v3879_v55  ;;  %v3896_v15 = vcombine.high %v3855_v43, %v3879_v55  ;;  %v3897_v30 = vcombine.low %v3862_v10, %v3886_v33  ;;  %v3898_v42 = vcombine.high %v3862_v10, %v3886_v33 }
 0x28d   : > { %v3728_v9 = vrot.slane %v3714_v51, %v8778_v35  ;;  %v3744_v40 = vrot.slane %v3730_v14, %v8778_v35  ;;  %v3816_v19 = vcombine.high %v9550_v4, %v9559_v26  ;;  %v6611_v59 = vcombine.high %v9562_v1, %v9570_v46  ;;  %v3928_v48 = vpop.permute.xlu0 %3927 }
 0x28e   : > { %v9599_v17 = vpack.c.bf16 %v3895_v36, %v3793_v37  ;;  %v9601_v12 = vpack.c.bf16 %v3896_v15, %v3794_v32  ;;  %v3911_v24 = vpack.c.bf16 %v3897_v30, %v3795_v45  ;;  %v3912_v61 = vpack.c.bf16 %v3898_v42, %v3796_v27  ;;  %v7251_v37 = vld [vmem:[%s10387_s3 + $0x40] sm:$0xff]  }
 0x28f   : > { %v10476_v25 = vcombine.low %v8923_v57, %v8929_v3  ;;  %v10477_v2 = vcombine.low %v8933_v50, %v8936_v28  ;;  %v3761_v39 = vcombine.low %v3696_v60, %v3712_v31  ;;  %v3785_v16 = vcombine.low %v3728_v9, %v3744_v40  ;;  %v3949_v3 = vpop.permute.xlu1 %3948  ;;  %v7252_v32 = vld [vmem:[%s10387_s3] sm:$0xff]   ;;  %6752 = vmatprep.subr.bf16.mxu1 %v7251_v37 }
 0x290   : > { %3958 = vrot.lane.b32.xlu0 %v9599_v17, %s10416_s22  ;;  %3996 = vrot.lane.b32.xlu1 %v9599_v17, %s10419_s30  ;;  %v3814_v52 = vrot.slane %v3800_v34, %v8778_v35  ;;  %v3830_v23 = vrot.slane %v3816_v19, %v8778_v35  ;;  %v3894_v1 = vrot.slane %v6611_v59, %v8824_v6  ;;  %v7253_v34 = vld [vmem:[%s10387_s3 + $0x48] sm:$0xff]   ;;  %vm5231_vm6 = vcmask 588800  }
 0x291   : > { %v3901_v38 = vpack.c.bf16 %v10477_v2, %v10476_v25  ;;  %v3768_v8 = vrot.slane %v3761_v39, %v8824_v6  ;;  %v3792_v4 = vrot.slane %v3785_v16, %v8824_v6  ;;  %v3968_v46 = vpop.permute.xlu0 %3967  ;;  %v4014_v45 = vsel %vm4008_vm9, %v8953_v56, %v3928_v48  ;;  %6753 = vmatpush3.bf16.msra.mxu1 %v7252_v32 }
 0x292   : > { %v3863_v57 = vcombine.low %v3814_v52, %v3830_v23  ;;  %v4043_v30 = vsel %vm4039_vm10, %v4014_v45, %v3949_v3  ;;  %6754 = vmatprep.subr.bf16.mxu1 %v7253_v34  ;;  %v7254_v52 = vld [vmem:[%s10387_s3 + $0x8] sm:$0xff]   ;;  %v7255_v3 = vld [vmem:[%s10387_s3 + $0x50] sm:$0xff]  }
 0x293   : > { %v3797_v50 = vcombine.low %v3768_v8, %v3792_v4  ;;  %v3798_v28 = vcombine.high %v3768_v8, %v3792_v4  ;;  %v4011_v54 = vsel %vm4008_vm9, %v3901_v38, %v3926_v47 }
 0x294   : > { %3979 = vrot.lane.b32.xlu0 %v9601_v12, %s7388_s25  ;;  %3977 = vrot.lane.b32.xlu1 %v9599_v17, %s7388_s25  ;;  %v3870_v26 = vrot.slane %v3863_v57, %v8824_v6  ;;  %v4041_v20 = vsel %vm4039_vm10, %v4011_v54, %v3947_v44 }
 0x295   : > { %v4062_v43 = vsel %vm4060_vm11, %v4041_v20, %v3968_v46  ;;  %6755 = vmatpush3.bf16.msra.mxu1 %v7254_v52 }
 0x296   : > { %v3899_v63 = vcombine.low %v3870_v26, %v3894_v1  ;;  %v3900_v13 = vcombine.high %v3870_v26, %v3894_v1  ;;  %v3970_v58 = vpop.permute.xlu1 %3969  ;;  %v3989_v21 = vpop.permute.xlu0 %3988  ;;  %6756 = vmatprep.subr.bf16.mxu1 %v7255_v3 }
 0x297   : > { %v9650_v10 = vsel %vm4081_vm12, %v4062_v43, %v3989_v21  ;;  %v4064_v60 = vsel %vm4060_vm11, %v4043_v30, %v3970_v58  ;;  %v7259_v58 = vld [vmem:[%s10387_s3 + $0x60] sm:$0xff]   ;;  %v7261_v30 = vld [vmem:[%s10387_s3 + $0x68] sm:$0xff]  }
 0x298   : > { %3939 = vrot.lane.b32.xlu0 %v9599_v17, %s7387_s24  ;;  %3998 = vrot.lane.b32.xlu1 %v9601_v12, %s10419_s30  ;;  %v3913_v5 = vpack.c.bf16 %v3899_v63, %v3797_v50  ;;  %v3914_v0 = vpack.c.bf16 %v3900_v13, %v3798_v28  ;;  %v4192_v36 = vrot.slane %v9650_v10, 1  ;;  %v4272_v51 = vrot.slane %v9650_v10, 2  ;;  %v7256_v50 = vld [vmem:[%s10387_s3 + $0x10] sm:$0xff]   ;;  %v7257_v28 = vld [vmem:[%s10387_s3 + $0x58] sm:$0xff]  }
 0x299   : > { %v4104_v14 = vshll.u32 %v9650_v10, 16  ;;  %v4102_v31 = vshrl.u32 %v9650_v10, 16  ;;  %6757 = vmatpush3.bf16.msra.mxu1 %v7256_v50  ;;  %v7260_v43 = vld [vmem:[%s10387_s3 + $0x20] sm:$0xff]  }
 0x29a   : > { %v3991_v22 = vpop.permute.xlu1 %3990  ;;  %v3930_v41 = vpop.permute.xlu0 %3929  ;;  %6758 = vmatprep.subr.bf16.mxu1 %v7257_v28 }
 0x29b   : > { %v4017_v27 = vsel %vm4008_vm9, %v8949_v29, %v3930_v41  ;;  %v9672_v29 = vsel %vm4081_vm12, %v4064_v60, %v3991_v22  ;;  %v4106_v40 = vrot.slane %v4104_v14, 1  ;;  %v4222_v2 = vrot.slane %v4102_v31, 1  ;;  %v7264_v60 = vld [vmem:[%s10387_s3 + $0x30] sm:$0xff]  }
 0x29c   : > { %3981 = vrot.lane.b32.xlu0 %v3911_v24, %s7388_s25  ;;  %4000 = vrot.lane.b32.xlu1 %v3911_v24, %s10419_s30  ;;  %v4273_v38 = vrot.slane %v9672_v29, 2  ;;  %v4110_v46 = vshll.u32 %v9672_v29, 16  ;;  %v4108_v21 = vshrl.u32 %v9672_v29, 16 }
 0x29d   : > { %v4107_v39 = vor.u32 %v4106_v40, %v4102_v31 }
 0x29e   : > { %v3951_v53 = vpop.permute.xlu1 %3950  ;;  %v3932_v33 = vpop.permute.xlu0 %3931  ;;  %v4112_v22 = vrot.slane %v4110_v46, 1  ;;  %v4226_v37 = vrot.slane %v4110_v46, 2 }
 0x29f   : > { %v4045_v42 = vsel %vm4039_vm10, %v4017_v27, %v3951_v53  ;;  %v4020_v9 = vsel %vm4008_vm9, %v8963_v7, %v3932_v33  ;;  %v4223_v7 = vrot.slane %v4104_v14, 2  ;;  %v4225_v33 = vrot.slane %v4108_v21, 1 }
 0x2a0   : > { %3941 = vrot.lane.b32.xlu0 %v9601_v12, %s7387_s24  ;;  %3960 = vrot.lane.b32.xlu1 %v9601_v12, %s10416_s22 }
 0x2a1   : > { %v4224_v8 = vor.u32 %v4223_v7, %v4222_v2  ;;  %v4227_v45 = vor.u32 %v4226_v37, %v4225_v33 }
 0x2a2   : > { %v3972_v55 = vpop.permute.xlu1 %3971  ;;  %v3953_v47 = vpop.permute.xlu0 %3952 }
 0x2a3   : > { %v4066_v56 = vsel %vm4060_vm11, %v4045_v42, %v3972_v55  ;;  %v4047_v19 = vsel %vm4039_vm10, %v4020_v9, %v3953_v47  ;;  %v4113_v55 = vor.u32 %v4112_v22, %v4108_v21  ;;  %v7262_v42 = vld [vmem:[%s10387_s3 + $0x28] sm:$0xff]   ;;  %v7263_v47 = vld [vmem:[%s10387_s3 + $0x70] sm:$0xff]  }
 0x2a4   : > { %3962 = vrot.lane.b32.xlu0 %v3911_v24, %s10416_s22  ;;  %4002 = vrot.lane.b32.xlu1 %v3912_v61, %s10419_s30 }
 0x2a6   : > { %v3993_v15 = vpop.permute.xlu1 %3992  ;;  %v3974_v44 = vpop.permute.xlu0 %3973 }
 0x2a7   : > { %v9675_v18 = vsel %vm4081_vm12, %v4066_v56, %v3993_v15  ;;  %v4068_v25 = vsel %vm4060_vm11, %v4047_v19, %v3974_v44  ;;  %v7265_v56 = vld [vmem:[%s10387_s3 + $0x78] sm:$0xff]  }
 0x2a8   : > { %3983 = vrot.lane.b32.xlu0 %v3912_v61, %s7388_s25  ;;  %3943 = vrot.lane.b32.xlu1 %v3911_v24, %s7387_s24  ;;  %v4193_v24 = vrot.slane %v9672_v29, 1  ;;  %v4116_v16 = vshll.u32 %v9675_v18, 16  ;;  %v4194_v23 = vrot.slane %v9675_v18, 1  ;;  %v4114_v1 = vshrl.u32 %v9675_v18, 16 }
 0x2aa   : > { %v3995_v59 = vpop.permute.xlu1 %3994  ;;  %v4118_v4 = vrot.slane %v4116_v16, 1  ;;  %v4228_v27 = vrot.slane %v4114_v1, 1  ;;  %v3934_v14 = vpop.permute.xlu0 %3933 }
 0x2ab   : > { %v9699_v48 = vsel %vm4081_vm12, %v4068_v25, %v3995_v59  ;;  %v4023_v31 = vsel %vm4008_vm9, %v9057_v11, %v3934_v14 }
 0x2ac   : > { %4004 = vrot.lane.b32.xlu0 %v3913_v5, %s10419_s30  ;;  %3964 = vrot.lane.b32.xlu1 %v3912_v61, %s10416_s22  ;;  %v4274_v61 = vrot.slane %v9675_v18, 2  ;;  %v4122_v57 = vshll.u32 %v9699_v48, 16  ;;  %v4195_v26 = vrot.slane %v9699_v48, 1  ;;  %s7392_s22 = smov 120   ;;  %v4119_v63 = vor.u32 %v4118_v4, %v4114_v1 }
 0x2ad   : > { %v4120_v13 = vshrl.u32 %v9699_v48, 16  ;;  %v4275_v53 = vrot.slane %v9699_v48, 2 }
 0x2ae   : > { %v4232_v20 = vrot.slane %v4122_v57, 2 }
 0x2af   : > { %v4231_v54 = vrot.slane %v4120_v13, 1 }
 0x2b0   : > { %3985 = vrot.lane.b32.xlu1 %v3913_v5, %s7388_s25  ;;  %4202 = vrot.lane.b32.xlu0 %v4192_v36, %s10421_s15  ;;  %v4124_v5 = vrot.slane %v4122_v57, 1  ;;  %v4229_v36 = vrot.slane %v4116_v16, 2  ;;  %s10484_s25 = smov 16  }
 0x2b1   : > { %v4233_v32 = vor.u32 %v4232_v20, %v4231_v54 }
 0x2b2   : > { %v4125_v41 = vor.u32 %v4124_v5, %v4120_v13  ;;  %v4230_v15 = vor.u32 %v4229_v36, %v4228_v27 }
 0x2b4   : > { %4006 = vrot.lane.b32.xlu1 %v3914_v0, %s10419_s30  ;;  %4282 = vrot.lane.b32.xlu0 %v4272_v51, %s10419_s30  ;;  %v7258_v0 = vld [vmem:[%s10387_s3 + $0x18] sm:$0xff]  }
 0x2b5   : > { %6759 = vmatpush3.bf16.msra.mxu1 %v7258_v0  ;;  %v7266_v51 = vld [vmem:[%s10387_s3 + $0x38] sm:$0xff]  }
 0x2b6   : > { %6760 = vmatprep.subr.bf16.mxu1 %v7259_v58 }
 0x2b8   : > { %4204 = vrot.lane.b32.xlu1 %v4193_v24, %s10421_s15  ;;  %4286 = vrot.lane.b32.xlu0 %v4274_v61, %s10419_s30  ;;  %v3976_v24 = vpop.permute.xlu0 %3975  ;;  %v3955_v61 = vpop.permute.xlu1 %3954 }
 0x2b9   : > { %6761 = vmatpush3.bf16.msra.mxu1 %v7260_v43  ;;  %v4049_v34 = vsel %vm4039_vm10, %v4023_v31, %v3955_v61 }
 0x2ba   : > { %6762 = vmatprep.subr.bf16.mxu1 %v7261_v30  ;;  %v4070_v19 = vsel %vm4060_vm11, %v4049_v34, %v3976_v24 }
 0x2bc   : > { %4284 = vrot.lane.b32.xlu1 %v4273_v38, %s10419_s30  ;;  %4162 = vrot.lane.b32.xlu0 %v4107_v39, %s10417_s13  ;;  %v3936_v44 = vpop.permute.xlu0 %3935  ;;  %v3957_v9 = vpop.permute.xlu1 %3956 }
 0x2bd   : > { %6763 = vmatpush3.bf16.msra.mxu1 %v7262_v42  ;;  %v4026_v39 = vsel %vm4008_vm9, %v9059_v62, %v3936_v44 }
 0x2be   : > { %6764 = vmatprep.subr.bf16.mxu1 %v7263_v47 }
 0x2c0   : > { %4206 = vrot.lane.b32.xlu1 %v4194_v23, %s10421_s15  ;;  %4252 = vrot.lane.b32.xlu0 %v4224_v8, %s7392_s22  ;;  %v3938_v40 = vpop.permute.xlu0 %3937  ;;  %v4051_v23 = vsel %vm4039_vm10, %v4026_v39, %v3957_v9 }
 0x2c1   : > { %6765 = vmatpush3.bf16.msra.mxu1 %v7264_v60  ;;  %v4029_v50 = vsel %vm4008_vm9, %v9109_v49, %v3938_v40 }
 0x2c2   : > { %6766 = vmatprep.subr.bf16.mxu1 %v7265_v56 }
 0x2c4   : > { %4208 = vrot.lane.b32.xlu1 %v4195_v26, %s10421_s15  ;;  %4166 = vrot.lane.b32.xlu0 %v4119_v63, %s10417_s13  ;;  %s10479_s15 = smov 32  }
 0x2c5   : > { %6767 = vmatpush3.bf16.msra.mxu1 %v7266_v51 }
 0x2c8   : > { %4288 = vrot.lane.b32.xlu1 %v4275_v53, %s10419_s30  ;;  %4168 = vrot.lane.b32.xlu0 %v4125_v41, %s10417_s13  ;;  %s10478_s30 = smov 80   ;;  %v10480_v41 = vld [vmem:[#allocation16_spill] sm:$0xff] }
 0x2cc   : > { %4164 = vrot.lane.b32.xlu1 %v4113_v55, %s10417_s13  ;;  %4258 = vrot.lane.b32.xlu0 %v4233_v32, %s7392_s22  ;;  %s10481_s13 = smov 40  }
 0x2d0   : > { %4254 = vrot.lane.b32.xlu1 %v4227_v45, %s7392_s22 }
 0x2d4   : > { %4256 = vrot.lane.b32.xlu1 %v4230_v15, %s7392_s22 }
 0x302   : > { %v3959_v59 = vpop.permute.xlu0 %3958  ;;  %v3997_v25 = vpop.permute.xlu1 %3996 }
 0x303   : > { %v9762_v2 = vsel %vm4081_vm12, %v4070_v19, %v3997_v25  ;;  %v4053_v46 = vsel %vm4039_vm10, %v4029_v50, %v3959_v59 }
 0x304   : > { %v4196_v38 = vrot.slane %v9762_v2, 1  ;;  %v4276_v16 = vrot.slane %v9762_v2, 2  ;;  %v4128_v52 = vshll.u32 %v9762_v2, 16  ;;  %v4126_v62 = vshrl.u32 %v9762_v2, 16 }
 0x306   : > { %v3980_v7 = vpop.permute.xlu0 %3979  ;;  %4210 = vrot.lane.b32.xlu1 %v4196_v38, %s10478_s30  ;;  %v3978_v11 = vpop.permute.xlu1 %3977  ;;  %v4130_v1 = vrot.slane %v4128_v52, 1  ;;  %v4234_v58 = vrot.slane %v4126_v62, 1  ;;  %v4235_v22 = vrot.slane %v4128_v52, 2 }
 0x307   : > { %v4072_v8 = vsel %vm4060_vm11, %v4051_v23, %v3978_v11  ;;  %v4074_v63 = vsel %vm4060_vm11, %v4053_v46, %v3980_v7 }
 0x308   : > { %v4131_v49 = vor.u32 %v4130_v1, %v4126_v62  ;;  %v4236_v33 = vor.u32 %v4235_v22, %v4234_v58 }
 0x30a   : > { %v3940_v4 = vpop.permute.xlu0 %3939  ;;  %4290 = vrot.lane.b32.xlu1 %v4276_v16, %s10479_s15  ;;  %v3999_v57 = vpop.permute.xlu1 %3998 }
 0x30b   : > { %v9774_v3 = vsel %vm4081_vm12, %v4072_v8, %v3999_v57  ;;  %v4032_v54 = vsel %vm4008_vm9, %v10480_v41, %v3940_v4 }
 0x30c   : > { %v4277_v28 = vrot.slane %v9774_v3, 2  ;;  %v4197_v26 = vrot.slane %v9774_v3, 1  ;;  %v4134_v53 = vshll.u32 %v9774_v3, 16  ;;  %v4132_v32 = vshrl.u32 %v9774_v3, 16 }
 0x30e   : > { %v3982_v13 = vpop.permute.xlu0 %3981  ;;  %4292 = vrot.lane.b32.xlu0 %v4277_v28, %s10479_s15  ;;  %4212 = vrot.lane.b32.xlu1 %v4197_v26, %s10478_s30  ;;  %v4001_v5 = vpop.permute.xlu1 %4000  ;;  %v4136_v45 = vrot.slane %v4134_v53, 1  ;;  %v4237_v60 = vrot.slane %v4132_v32, 1  ;;  %v4238_v56 = vrot.slane %v4134_v53, 2 }
 0x30f   : > { %v9786_v0 = vsel %vm4081_vm12, %v4074_v63, %v4001_v5 }
 0x310   : > { %v4198_v21 = vrot.slane %v9786_v0, 1  ;;  %v4278_v37 = vrot.slane %v9786_v0, 2  ;;  %v4137_v42 = vor.u32 %v4136_v45, %v4132_v32  ;;  %v4239_v61 = vor.u32 %v4238_v56, %v4237_v60 }
 0x311   : > { %v4140_v44 = vshll.u32 %v9786_v0, 16 }
 0x312   : > { %v3942_v20 = vpop.permute.xlu0 %3941  ;;  %4170 = vrot.lane.b32.xlu0 %v4131_v49, %s10481_s13  ;;  %4214 = vrot.lane.b32.xlu1 %v4198_v21, %s10478_s30  ;;  %v3961_v43 = vpop.permute.xlu1 %3960 }
 0x313   : > { %v4055_v55 = vsel %vm4039_vm10, %v4032_v54, %v3961_v43  ;;  %v4035_v24 = vsel %vm4008_vm9, %v9599_v17, %v3942_v20  ;;  %v4138_v17 = vshrl.u32 %v9786_v0, 16  ;;  %v4142_v38 = vrot.slane %v4140_v44, 1 }
 0x314   : > { %v4076_v36 = vsel %vm4060_vm11, %v4055_v55, %v3982_v13  ;;  %v4241_v8 = vrot.slane %v4140_v44, 2 }
 0x315   : > { %v4143_v52 = vor.u32 %v4142_v38, %v4138_v17  ;;  %v4240_v23 = vrot.slane %v4138_v17, 1 }
 0x316   : > { %v3963_v27 = vpop.permute.xlu0 %3962  ;;  %4260 = vrot.lane.b32.xlu0 %v4236_v33, %s7392_s22  ;;  %4294 = vrot.lane.b32.xlu1 %v4278_v37, %s10479_s15  ;;  %v4003_v15 = vpop.permute.xlu1 %4002 }
 0x317   : > { %v9801_v30 = vsel %vm4081_vm12, %v4076_v36, %v4003_v15  ;;  %v4057_v31 = vsel %vm4039_vm10, %v4035_v24, %v3963_v27  ;;  %v4242_v46 = vor.u32 %v4241_v8, %v4240_v23 }
 0x318   : > { %v4199_v47 = vrot.slane %v9801_v30, 1  ;;  %v4279_v25 = vrot.slane %v9801_v30, 2  ;;  %v4146_v11 = vshll.u32 %v9801_v30, 16  ;;  %v4144_v26 = vshrl.u32 %v9801_v30, 16 }
 0x31a   : > { %v3984_v51 = vpop.permute.xlu0 %3983  ;;  %4172 = vrot.lane.b32.xlu0 %v4137_v42, %s10481_s13  ;;  %4216 = vrot.lane.b32.xlu1 %v4199_v47, %s10478_s30  ;;  %v3944_v14 = vpop.permute.xlu1 %3943  ;;  %v4148_v1 = vrot.slane %v4146_v11, 1  ;;  %v4243_v22 = vrot.slane %v4144_v26, 1  ;;  %v4244_v53 = vrot.slane %v4146_v11, 2 }
 0x31b   : > { %v4078_v9 = vsel %vm4060_vm11, %v4057_v31, %v3984_v51  ;;  %v4038_v16 = vsel %vm4008_vm9, %v9601_v12, %v3944_v14 }
 0x31c   : > { %v4149_v21 = vor.u32 %v4148_v1, %v4144_v26  ;;  %v4245_v45 = vor.u32 %v4244_v53, %v4243_v22 }
 0x31e   : > { %v4005_v40 = vpop.permute.xlu0 %4004  ;;  %4262 = vrot.lane.b32.xlu1 %v4239_v61, %s7392_s22  ;;  %v3965_v34 = vpop.permute.xlu1 %3964 }
 0x31f   : > { %v9813_v19 = vsel %vm4081_vm12, %v4078_v9, %v4005_v40  ;;  %v4059_v4 = vsel %vm4039_vm10, %v4038_v16, %v3965_v34  ;;  %v10482_v9 = vld [vmem:[#allocation5_spill] sm:$0xff] }
 0x320   : > { %v4200_v59 = vrot.slane %v9813_v19, 1  ;;  %v4152_v43 = vshll.u32 %v9813_v19, 16  ;;  %v4150_v37 = vshrl.u32 %v9813_v19, 16 }
 0x322   : > { %4218 = vrot.lane.b32.xlu0 %v4200_v59, %s10478_s30  ;;  %4296 = vrot.lane.b32.xlu1 %v4279_v25, %s10479_s15  ;;  %v3986_v39 = vpop.permute.xlu1 %3985  ;;  %v4203_v7 = vpop.permute.xlu0 %4202  ;;  %v4154_v36 = vrot.slane %v4152_v43, 1  ;;  %v4246_v60 = vrot.slane %v4150_v37, 1  ;;  %v4247_v24 = vrot.slane %v4152_v43, 2 }
 0x323   : > { %v4080_v57 = vsel %vm4060_vm11, %v4059_v4, %v3986_v39  ;;  %v4280_v39 = vrot.slane %v9813_v19, 2 }
 0x324   : > { %v4155_v14 = vor.u32 %v4154_v36, %v4150_v37  ;;  %v4248_v34 = vor.u32 %v4247_v24, %v4246_v60 }
 0x326   : > { %4174 = vrot.lane.b32.xlu0 %v4143_v52, %s10481_s13  ;;  %v4007_v62 = vpop.permute.xlu1 %4006  ;;  %v4283_v50 = vpop.permute.xlu0 %4282 }
 0x327   : > { %v9827_v28 = vsel %vm4081_vm12, %v4080_v57, %v4007_v62 }
 0x328   : > { %v4201_v12 = vrot.slane %v9827_v28, 1  ;;  %v4156_v63 = vshrl.u32 %v9827_v28, 16  ;;  %v4158_v13 = vshll.u32 %v9827_v28, 16 }
 0x32a   : > { %4264 = vrot.lane.b32.xlu0 %v4242_v46, %s7392_s22  ;;  %4220 = vrot.lane.b32.xlu1 %v4201_v12, %s10478_s30  ;;  %v4160_v5 = vrot.slane %v4158_v13, 1  ;;  %v4205_v58 = vpop.permute.xlu1 %4204  ;;  %v9835_v49 = vpop.permute.xlu0 %4286  ;;  %v4249_v54 = vrot.slane %v4156_v63, 1  ;;  %v4250_v20 = vrot.slane %v4158_v13, 2 }
 0x32c   : > { %v4161_v41 = vor.u32 %v4160_v5, %v4156_v63  ;;  %v4251_v27 = vor.u32 %v4250_v20, %v4249_v54 }
 0x32e   : > { %4176 = vrot.lane.b32.xlu0 %v4149_v21, %s10481_s13  ;;  %4180 = vrot.lane.b32.xlu1 %v4161_v41, %s10481_s13  ;;  %v4285_v55 = vpop.permute.xlu1 %4284  ;;  %v4163_v33 = vpop.permute.xlu0 %4162 }
 0x32f   : > { %v4304_v32 = vsel %vm4302_vm13, %v9650_v10, %v4163_v33  ;;  %v4281_v10 = vrot.slane %v9827_v28, 2 }
 0x330   : > { %v4325_v42 = vsel %vm4323_vm14, %v4304_v32, %v4203_v7 }
 0x332   : > { %4266 = vrot.lane.b32.xlu0 %v4245_v45, %s7392_s22  ;;  %4270 = vrot.lane.b32.xlu1 %v4251_v27, %s7392_s22  ;;  %v4207_v15 = vpop.permute.xlu1 %4206  ;;  %v4253_v47 = vpop.permute.xlu0 %4252 }
 0x333   : > { %v4346_v56 = vsel %vm4344_vm15, %v4325_v42, %v4253_v47  ;;  %v4366_v51 = vsel %vm4081_vm12, %v4253_v47, %v4283_v50 }
 0x334   : > { %v4405_v61 = vcombine.low %v4346_v56, %v4366_v51  ;;  %v4406_v7 = vcombine.high %v4346_v56, %v4366_v51 }
 0x336   : > { %4178 = vrot.lane.b32.xlu0 %v4155_v14, %s10481_s13  ;;  %4300 = vrot.lane.b32.xlu1 %v4281_v10, %s10479_s15  ;;  %v4209_v44 = vpop.permute.xlu1 %4208  ;;  %v4167_v31 = vpop.permute.xlu0 %4166  ;;  %v4413_v40 = vrot.slane %v4405_v61, %v10482_v9  ;;  %v4420_v50 = vrot.slane %v4406_v7, %v10482_v9  ;;  %s378_s13 = sand.u32 1, %s7371_s18  }
 0x337   : > { %v4308_v1 = vsel %vm4302_vm13, %v9675_v18, %v4167_v31  ;;  %s6481_s14 = scalar_lea.sflag [#allocation3], %s378_s13 }
 0x338   : > { %v4421_v17 = vcombine.high %v4413_v40, %v4413_v40  ;;  %v4428_v26 = vrot.slane %v4413_v40, %v10482_v9  ;;  %v4435_v20 = vrot.slane %v4420_v50, %v10482_v9  ;;  %v4329_v37 = vsel %vm4323_vm14, %v4308_v1, %v4207_v15 }
 0x33a   : > { %4268 = vrot.lane.b32.xlu0 %v4248_v34, %s7392_s22  ;;  %v4289_v59 = vpop.permute.xlu1 %4288  ;;  %v4169_v25 = vpop.permute.xlu0 %4168  ;;  %v4442_v23 = vrot.slane %v4421_v17, %v10482_v9 }
 0x33b   : > { %v4310_v38 = vsel %vm4302_vm13, %v9699_v48, %v4169_v25 }
 0x33c   : > { %v4331_v52 = vsel %vm4323_vm14, %v4310_v38, %v4209_v44  ;;  %v4805_v13 = vcombine.low %v4428_v26, %v4442_v23 }
 0x33e   : > { %4298 = vrot.lane.b32.xlu0 %v4280_v39, %s10479_s15  ;;  %v4165_v11 = vpop.permute.xlu1 %4164  ;;  %v4259_v16 = vpop.permute.xlu0 %4258  ;;  %v4815_v45 = vrot.slane %v4805_v13, %v10482_v9 }
 0x33f   : > { %v4306_v8 = vsel %vm4302_vm13, %v9672_v29, %v4165_v11  ;;  %v4352_v4 = vsel %vm4344_vm15, %v4331_v52, %v4259_v16  ;;  %v4372_v57 = vsel %vm4081_vm12, %v4259_v16, %v4289_v59  ;;  %v6612_v29 = vcombine.high %v4428_v26, %v4442_v23 }
 0x340   : > { %v4525_v62 = vcombine.low %v4352_v4, %v4372_v57  ;;  %v4526_v48 = vcombine.high %v4352_v4, %v4372_v57  ;;  %v4327_v46 = vsel %vm4323_vm14, %v4306_v8, %v4205_v58 }
 0x342   : > { %v4255_v12 = vpop.permute.xlu1 %4254  ;;  %v4533_v63 = vrot.slane %v4525_v62, %v10482_v9  ;;  %v4540_v53 = vrot.slane %v4526_v48, %v10482_v9 }
 0x343   : > { %v4348_v5 = vsel %vm4344_vm15, %v4327_v46, %v4255_v12  ;;  %v4368_v21 = vsel %vm4081_vm12, %v4255_v12, %v4285_v55  ;;  %v4822_v55 = vrot.slane %v6612_v29, %v10482_v9 }
 0x344   : > { %v4445_v22 = vcombine.low %v4348_v5, %v4368_v21  ;;  %v4541_v41 = vcombine.high %v4533_v63, %v4533_v63  ;;  %v4548_v54 = vrot.slane %v4533_v63, %v10482_v9  ;;  %v4446_v18 = vcombine.high %v4348_v5, %v4368_v21 }
 0x345   : > { %v4555_v60 = vrot.slane %v4540_v53, %v10482_v9  ;;  %v4837_v40 = vcombine.low %v4815_v45, %v4822_v55  ;;  %v4838_v16 = vcombine.high %v4815_v45, %v4822_v55 }
 0x346   : > { %v4453_v58 = vrot.slane %v4445_v22, %v10482_v9  ;;  %v4562_v43 = vrot.slane %v4541_v41, %v10482_v9  ;;  %v4563_v33 = vcombine.high %v4548_v54, %v4548_v54  ;;  %v4257_v32 = vpop.permute.xlu1 %4256  ;;  %v4460_v51 = vrot.slane %v4446_v18, %v10482_v9 }
 0x347   : > { %v4350_v27 = vsel %vm4344_vm15, %v4329_v37, %v4257_v32  ;;  %v4370_v36 = vsel %vm4081_vm12, %v4257_v32, %v9835_v49  ;;  %v4854_v63 = vrot.slane %v4838_v16, %v10482_v9  ;;  %v4847_v29 = vrot.slane %v4837_v40, %v10482_v9 }
 0x348   : > { %v4461_v42 = vcombine.high %v4453_v58, %v4453_v58  ;;  %v4468_v47 = vrot.slane %v4453_v58, %v10482_v9  ;;  %v4564_v56 = vcombine.high %v4562_v43, %v4562_v43  ;;  %v4937_v14 = vcombine.low %v4562_v43, %v4563_v33 }
 0x349   : > { %v4485_v15 = vcombine.low %v4350_v27, %v4370_v36  ;;  %v4486_v10 = vcombine.high %v4350_v27, %v4370_v36  ;;  %v4475_v39 = vrot.slane %v4460_v51, %v10482_v9 }
 0x34a   : > { %v4482_v24 = vrot.slane %v4461_v42, %v10482_v9  ;;  %v4483_v61 = vcombine.high %v4468_v47, %v4468_v47  ;;  %v4807_v44 = vcombine.low %v4435_v20, %v4468_v47  ;;  %v4938_v31 = vcombine.low %v4564_v56, %v4555_v60 }
 0x34b   : > { %v4493_v34 = vrot.slane %v4485_v15, %v10482_v9  ;;  %v4500_v49 = vrot.slane %v4486_v10, %v10482_v9  ;;  %v9889_v17 = vrot.slane %v4937_v14, %v10482_v9 }
 0x34c   : > { %v4484_v59 = vcombine.high %v4482_v24, %v4482_v24  ;;  %v4808_v25 = vcombine.low %v4482_v24, %v4483_v61  ;;  %v9892_v38 = vrot.slane %v4938_v31, %v10482_v9  ;;  %v4829_v52 = vrot.slane %v4807_v44, %v10482_v9 }
 0x34d   : > { %v4501_v7 = vcombine.high %v4493_v34, %v4493_v34  ;;  %v4515_v11 = vrot.slane %v4500_v49, %v10482_v9  ;;  %v4508_v62 = vrot.slane %v4493_v34, %v10482_v9 }
 0x34e   : > { %v4836_v23 = vrot.slane %v4808_v25, %v10482_v9  ;;  %v4970_v8 = vcombine.high %v9889_v17, %v9892_v38  ;;  %v4969_v4 = vcombine.low %v9889_v17, %v9892_v38  ;;  %v4871_v57 = vcombine.low %v4484_v59, %v4475_v39 }
 0x34f   : > { %v4522_v48 = vrot.slane %v4501_v7, %v10482_v9  ;;  %v4874_v50 = vcombine.low %v4515_v11, %v4548_v54 }
 0x350   : > { %v4839_v26 = vcombine.low %v4829_v52, %v4836_v23  ;;  %v4840_v1 = vcombine.high %v4829_v52, %v4836_v23  ;;  %v4881_v21 = vrot.slane %v4871_v57, %v10482_v9 }
 0x351   : > { %v4872_v46 = vcombine.low %v4508_v62, %v4522_v48  ;;  %v6613_v12 = vcombine.high %v4508_v62, %v4522_v48  ;;  %v4902_v41 = vrot.slane %v4874_v50, %v10482_v9 }
 0x352   : > { %v4868_v13 = vrot.slane %v4840_v1, %v10482_v9  ;;  %v4861_v5 = vrot.slane %v4839_v26, %v10482_v9 }
 0x353   : > { %v4888_v22 = vrot.slane %v4872_v46, %v10482_v9  ;;  %v4895_v53 = vrot.slane %v6613_v12, %v10482_v9 }
 0x354   : > { %v4870_v54 = vcombine.low %v4854_v63, %v4868_v13  ;;  %v4869_v20 = vcombine.low %v4847_v29, %v4861_v5  ;;  %v4986_v29 = vrot.slane %v4970_v8, %v10482_v9 }
 0x355   : > { %v4904_v18 = vcombine.high %v4881_v21, %v4888_v22  ;;  %v4906_v58 = vcombine.high %v4895_v53, %v4902_v41  ;;  %v4903_v43 = vcombine.low %v4881_v21, %v4888_v22  ;;  %v4905_v33 = vcombine.low %v4895_v53, %v4902_v41 }
 0x356   : > { %6634 = vmatprep.mubr.msk.bf16.mxu1 %vm5231_vm6, %v4870_v54 }
 0x357   : > { %5422 = vmatmul.mubr.bf16.vlgmr.msra.gmra.mrb[56].mxu1 %v4869_v20  ;;  %v4920_v37 = vrot.slane %v4904_v18, %v10482_v9  ;;  %v4934_v32 = vrot.slane %v4906_v58, %v10482_v9  ;;  %v4913_v55 = vrot.slane %v4903_v43, %v10482_v9  ;;  %v4927_v27 = vrot.slane %v4905_v33, %v10482_v9 }
 0x358   : > { %v4979_v43 = vrot.slane %v4969_v4, %v10482_v9 }
 0x359   : > { %v4936_v45 = vcombine.low %v4920_v37, %v4934_v32  ;;  %v4935_v36 = vcombine.low %v4913_v55, %v4927_v27 }
 0x35b   : > { %6635 = vmatprep.mubr.msk.bf16.mxu1 %vm5231_vm6, %v4936_v45 }
 0x35f   : > { %5430 = vmatmul.mubr.bf16.gmra.mrb[60].mxu1 %v4935_v36 }
 0x378   : > { %v4211_v42 = vpop.permute.xlu1 %4210 }
 0x37c   : > { %v4291_v47 = vpop.permute.xlu1 %4290 }
 0x380   : > { %v4293_v60 = vpop.permute.xlu0 %4292  ;;  %v4213_v56 = vpop.permute.xlu1 %4212 }
 0x384   : > { %v4171_v51 = vpop.permute.xlu0 %4170  ;;  %v4215_v14 = vpop.permute.xlu1 %4214 }
 0x385   : > { %v4312_v15 = vsel %vm4302_vm13, %v9762_v2, %v4171_v51 }
 0x386   : > { %v4333_v24 = vsel %vm4323_vm14, %v4312_v15, %v4211_v42 }
 0x388   : > { %v4261_v10 = vpop.permute.xlu0 %4260  ;;  %v4295_v61 = vpop.permute.xlu1 %4294 }
 0x389   : > { %v4354_v44 = vsel %vm4344_vm15, %v4333_v24, %v4261_v10  ;;  %v4374_v31 = vsel %vm4081_vm12, %v4261_v10, %v4291_v47 }
 0x38a   : > { %v4565_v40 = vcombine.low %v4354_v44, %v4374_v31  ;;  %v4566_v50 = vcombine.high %v4354_v44, %v4374_v31 }
 0x38c   : > { %v4573_v34 = vrot.slane %v4565_v40, %v10482_v9  ;;  %v4173_v49 = vpop.permute.xlu0 %4172  ;;  %v4217_v59 = vpop.permute.xlu1 %4216  ;;  %v4580_v21 = vrot.slane %v4566_v50, %v10482_v9 }
 0x38d   : > { %v4314_v25 = vsel %vm4302_vm13, %v9774_v3, %v4173_v49 }
 0x38e   : > { %v4581_v39 = vcombine.high %v4573_v34, %v4573_v34  ;;  %v4588_v7 = vrot.slane %v4573_v34, %v10482_v9  ;;  %v4335_v11 = vsel %vm4323_vm14, %v4314_v25, %v4213_v56  ;;  %v4595_v32 = vrot.slane %v4580_v21, %v10482_v9 }
 0x390   : > { %v4602_v2 = vrot.slane %v4581_v39, %v10482_v9  ;;  %v4263_v16 = vpop.permute.xlu1 %4262 }
 0x391   : > { %v4356_v52 = vsel %vm4344_vm15, %v4335_v11, %v4263_v16  ;;  %v4376_v23 = vsel %vm4081_vm12, %v4263_v16, %v4293_v60 }
 0x392   : > { %v4939_v57 = vcombine.low %v4588_v7, %v4602_v2  ;;  %v6614_v62 = vcombine.high %v4588_v7, %v4602_v2  ;;  %v4605_v48 = vcombine.low %v4356_v52, %v4376_v23  ;;  %v4606_v18 = vcombine.high %v4356_v52, %v4376_v23 }
 0x394   : > { %v4961_v26 = vrot.slane %v4939_v57, %v10482_v9  ;;  %v4968_v3 = vrot.slane %v6614_v62, %v10482_v9  ;;  %v4613_v1 = vrot.slane %v4605_v48, %v10482_v9  ;;  %v9934_v46 = vpop.permute.xlu0 %4218  ;;  %v4297_v41 = vpop.permute.xlu1 %4296  ;;  %v4620_v42 = vrot.slane %v4606_v18, %v10482_v9 }
 0x396   : > { %v4621_v12 = vcombine.high %v4613_v1, %v4613_v1  ;;  %v4628_v63 = vrot.slane %v4613_v1, %v10482_v9  ;;  %v4972_v13 = vcombine.high %v4961_v26, %v4968_v3  ;;  %v4971_v5 = vcombine.low %v4961_v26, %v4968_v3 }
 0x398   : > { %v4642_v22 = vrot.slane %v4621_v12, %v10482_v9  ;;  %v4643_v53 = vcombine.high %v4628_v63, %v4628_v63  ;;  %v4175_v54 = vpop.permute.xlu0 %4174  ;;  %v5000_v20 = vrot.slane %v4972_v13, %v10482_v9  ;;  %v4993_v8 = vrot.slane %v4971_v5, %v10482_v9 }
 0x399   : > { %v4316_v58 = vsel %vm4302_vm13, %v9786_v0, %v4175_v54  ;;  %v5003_v17 = vcombine.low %v4595_v32, %v4628_v63 }
 0x39a   : > { %v5002_v33 = vcombine.low %v4986_v29, %v5000_v20  ;;  %v5001_v37 = vcombine.low %v4979_v43, %v4993_v8  ;;  %v5004_v45 = vcombine.low %v4642_v22, %v4643_v53  ;;  %v4337_v27 = vsel %vm4323_vm14, %v4316_v58, %v4215_v14 }
 0x39b   : > { %v4644_v4 = vcombine.high %v4642_v22, %v4642_v22  ;;  %v4635_v14 = vrot.slane %v4620_v42, %v10482_v9  ;;  %v5013_v24 = vrot.slane %v5003_v17, %v10482_v9 }
 0x39c   : > { %v4265_v55 = vpop.permute.xlu0 %4264  ;;  %v4221_v36 = vpop.permute.xlu1 %4220  ;;  %6636 = vmatprep.mubr.msk.bf16.mxu1 %vm5231_vm6, %v5002_v33  ;;  %v5020_v60 = vrot.slane %v5004_v45, %v10482_v9 }
 0x39d   : > { %v4358_v0 = vsel %vm4344_vm15, %v4337_v27, %v4265_v55  ;;  %v4378_v47 = vsel %vm4081_vm12, %v4265_v55, %v4295_v61  ;;  %5438 = vmatmul.mubr.bf16.gmra.mrb[64].mxu1 %v5001_v37  ;;  %v5005_v31 = vcombine.low %v4644_v4, %v4635_v14 }
 0x39e   : > { %v4645_v38 = vcombine.low %v4358_v0, %v4378_v47  ;;  %v4646_v61 = vcombine.high %v4358_v0, %v4378_v47  ;;  %v5036_v7 = vcombine.high %v5013_v24, %v5020_v60  ;;  %v5035_v16 = vcombine.low %v5013_v24, %v5020_v60 }
 0x39f   : > { %v5027_v48 = vrot.slane %v5005_v31, %v10482_v9 }
 0x3a0   : > { %v4653_v56 = vrot.slane %v4645_v38, %v10482_v9  ;;  %v4177_v51 = vpop.permute.xlu0 %4176  ;;  %v4181_v15 = vpop.permute.xlu1 %4180  ;;  %v4660_v52 = vrot.slane %v4646_v61, %v10482_v9  ;;  %v5052_v1 = vrot.slane %v5036_v7, %v10482_v9  ;;  %v5045_v29 = vrot.slane %v5035_v16, %v10482_v9 }
 0x3a1   : > { %v4318_v10 = vsel %vm4302_vm13, %v9801_v30, %v4177_v51  ;;  %v4322_v2 = vsel %vm4302_vm13, %v9827_v28, %v4181_v15 }
 0x3a2   : > { %v4661_v44 = vcombine.high %v4653_v56, %v4653_v56  ;;  %v4668_v40 = vrot.slane %v4653_v56, %v10482_v9  ;;  %v4339_v25 = vsel %vm4323_vm14, %v4318_v10, %v4217_v59  ;;  %v4343_v26 = vsel %vm4323_vm14, %v4322_v2, %v4221_v36 }
 0x3a3   : > { %v4675_v5 = vrot.slane %v4660_v52, %v10482_v9 }
 0x3a4   : > { %v4682_v34 = vrot.slane %v4661_v44, %v10482_v9  ;;  %v4267_v49 = vpop.permute.xlu0 %4266  ;;  %v4271_v39 = vpop.permute.xlu1 %4270 }
 0x3a5   : > { %v4360_v11 = vsel %vm4344_vm15, %v4339_v25, %v4267_v49  ;;  %v4380_v30 = vsel %vm4081_vm12, %v4267_v49, %v4297_v41  ;;  %v4364_v63 = vsel %vm4344_vm15, %v4343_v26, %v4271_v39 }
 0x3a6   : > { %v5006_v23 = vcombine.low %v4668_v40, %v4682_v34  ;;  %v4685_v57 = vcombine.low %v4360_v11, %v4380_v30  ;;  %v4686_v62 = vcombine.high %v4360_v11, %v4380_v30  ;;  %v6615_v41 = vcombine.high %v4668_v40, %v4682_v34 }
 0x3a8   : > { %v5034_v50 = vrot.slane %v5006_v23, %v10482_v9  ;;  %v4693_v59 = vrot.slane %v4685_v57, %v10482_v9  ;;  %v4179_v3 = vpop.permute.xlu0 %4178  ;;  %v4301_v28 = vpop.permute.xlu1 %4300  ;;  %v4700_v12 = vrot.slane %v4686_v62, %v10482_v9  ;;  %v5079_v17 = vrot.slane %v6615_v41, %v10482_v9 }
 0x3a9   : > { %v4384_v13 = vsel %vm4081_vm12, %v4271_v39, %v4301_v28  ;;  %v4320_v45 = vsel %vm4302_vm13, %v9813_v19, %v4179_v3 }
 0x3aa   : > { %v4701_v21 = vcombine.high %v4693_v59, %v4693_v59  ;;  %v4708_v22 = vrot.slane %v4693_v59, %v10482_v9  ;;  %v4765_v53 = vcombine.low %v4364_v63, %v4384_v13  ;;  %v4766_v54 = vcombine.high %v4364_v63, %v4384_v13 }
 0x3ab   : > { %v5038_v20 = vcombine.high %v5027_v48, %v5034_v50  ;;  %v5037_v18 = vcombine.low %v5027_v48, %v5034_v50  ;;  %v4715_v32 = vrot.slane %v4700_v12, %v10482_v9  ;;  %v4341_v15 = vsel %vm4323_vm14, %v4320_v45, %v9934_v46 }
 0x3ac   : > { %v4722_v58 = vrot.slane %v4701_v21, %v10482_v9  ;;  %v4723_v43 = vcombine.high %v4708_v22, %v4708_v22  ;;  %v5070_v8 = vcombine.low %v4675_v5, %v4708_v22  ;;  %v4773_v33 = vrot.slane %v4765_v53, %v10482_v9  ;;  %v4269_v37 = vpop.permute.xlu0 %4268 }
 0x3ad   : > { %v5066_v55 = vrot.slane %v5038_v20, %v10482_v9  ;;  %v5059_v27 = vrot.slane %v5037_v18, %v10482_v9  ;;  %v4780_v51 = vrot.slane %v4766_v54, %v10482_v9  ;;  %v4362_v24 = vsel %vm4344_vm15, %v4341_v15, %v4269_v37 }
 0x3ae   : > { %v4724_v36 = vcombine.high %v4722_v58, %v4722_v58  ;;  %v5071_v42 = vcombine.low %v4722_v58, %v4723_v43  ;;  %v5086_v0 = vrot.slane %v5070_v8, %v10482_v9  ;;  %v4781_v47 = vcombine.high %v4773_v33, %v4773_v33 }
 0x3af   : > { %v4788_v38 = vrot.slane %v4773_v33, %v10482_v9  ;;  %v5068_v4 = vcombine.low %v5052_v1, %v5066_v55  ;;  %v5067_v60 = vcombine.low %v5045_v29, %v5059_v27  ;;  %v4795_v11 = vrot.slane %v4780_v51, %v10482_v9 }
 0x3b0   : > { %v5072_v56 = vcombine.low %v4724_v36, %v4715_v32  ;;  %v4802_v19 = vrot.slane %v4781_v47, %v10482_v9  ;;  %v4299_v14 = vpop.permute.xlu0 %4298  ;;  %v5093_v10 = vrot.slane %v5071_v42, %v10482_v9  ;;  %v5102_v44 = vcombine.high %v5079_v17, %v5086_v0  ;;  %v10028_v42 = vld [vmem:[%s10388_s4] ss:$0 sm:$0xff] }
 0x3b1   : > { %v4382_v61 = vsel %vm4081_vm12, %v4269_v37, %v4299_v14  ;;  %6637 = vmatprep.mubr.msk.bf16.mxu1 %vm5231_vm6, %v5068_v4  ;;  %v4803_v40 = vcombine.high %v4788_v38, %v4788_v38  ;;  %v5101_v39 = vcombine.low %v5079_v17, %v5086_v0 }
 0x3b2   : > { %v5100_v31 = vrot.slane %v5072_v56, %v10482_v9  ;;  %v4725_v34 = vcombine.low %v4362_v24, %v4382_v61  ;;  %v4726_v49 = vcombine.high %v4362_v24, %v4382_v61  ;;  %5446 = vmatmul.mubr.bf16.gmra.mrb[68].mxu1 %v5067_v60  ;;  %v4804_v25 = vcombine.high %v4802_v19, %v4802_v19 }
 0x3b3   : > { %v5138_v16 = vcombine.low %v4802_v19, %v4803_v40  ;;  %v5118_v57 = vrot.slane %v5102_v44, %v10482_v9  ;;  %v5111_v50 = vrot.slane %v5101_v39, %v10482_v9 }
 0x3b4   : > { %v4733_v46 = vrot.slane %v4725_v34, %v10482_v9  ;;  %v4740_v7 = vrot.slane %v4726_v49, %v10482_v9  ;;  %v5104_v2 = vcombine.high %v5093_v10, %v5100_v31  ;;  %v5103_v30 = vcombine.low %v5093_v10, %v5100_v31 }
 0x3b5   : > { %v5201_v62 = vcombine.low %v4804_v25, %v4795_v11  ;;  %v5166_v63 = vrot.slane %v5138_v16, %v10482_v9 }
 0x3b6   : > { %v4741_v52 = vcombine.high %v4733_v46, %v4733_v46  ;;  %v4755_v23 = vrot.slane %v4740_v7, %v10482_v9  ;;  %v5132_v48 = vrot.slane %v5104_v2, %v10482_v9  ;;  %v5125_v59 = vrot.slane %v5103_v30, %v10482_v9 }
 0x3b7   : > { %v4748_v26 = vrot.slane %v4733_v46, %v10482_v9  ;;  %v5208_v21 = vrot.slane %v5201_v62, %v10482_v9 }
 0x3b8   : > { %v4762_v3 = vrot.slane %v4741_v52, %v10482_v9  ;;  %v5137_v28 = vcombine.low %v4755_v23, %v4788_v38  ;;  %v5134_v1 = vcombine.low %v5118_v57, %v5132_v48  ;;  %v5133_v12 = vcombine.low %v5111_v50, %v5125_v59 }
 0x3b9   : > { %v5209_v58 = vcombine.high %v5208_v21, %v5208_v21  ;;  %v5216_v27 = vrot.slane %v5208_v21, %v10482_v9 }
 0x3ba   : > { %v5135_v13 = vcombine.low %v4748_v26, %v4762_v3  ;;  %v6616_v29 = vcombine.high %v4748_v26, %v4762_v3  ;;  %v5159_v5 = vrot.slane %v5137_v28, %v10482_v9  ;;  %6638 = vmatprep.mubr.msk.bf16.mxu1 %vm5231_vm6, %v5134_v1 }
 0x3bb   : > { %5454 = vmatmul.mubr.bf16.gmra.mrb[72].mxu1 %v5133_v12  ;;  %v5223_v55 = vrot.slane %v5209_v58, %v10482_v9 }
 0x3bc   : > { %v5145_v22 = vrot.slane %v5135_v13, %v10482_v9  ;;  %v5152_v53 = vrot.slane %v6616_v29, %v10482_v9  ;;  %v5170_v41 = vcombine.high %v5159_v5, %v5166_v63  ;;  %v5169_v54 = vcombine.low %v5159_v5, %v5166_v63 }
 0x3be   : > { %v5168_v20 = vcombine.high %v5145_v22, %v5152_v53  ;;  %v5167_v18 = vcombine.low %v5145_v22, %v5152_v53  ;;  %v5198_v8 = vrot.slane %v5170_v41, %v10482_v9  ;;  %v5191_v37 = vrot.slane %v5169_v54, %v10482_v9 }
 0x3c0   : > { %v5184_v43 = vrot.slane %v5168_v20, %v10482_v9  ;;  %v5177_v33 = vrot.slane %v5167_v18, %v10482_v9 }
 0x3c2   : > { %v5200_v32 = vcombine.low %v5184_v43, %v5198_v8  ;;  %v5199_v45 = vcombine.low %v5177_v33, %v5191_v37 }
 0x3c4   : > { %6639 = vmatprep.mubr.msk.bf16.mxu1 %vm5231_vm6, %v5200_v32 }
 0x3c5   : > { %5462 = vmatmul.mubr.bf16.gmra.mrb[76].mxu1 %v5199_v45 }
 0x3c6   : > { %6640 = vmatprep.mubr.msk.bf16.mxu1 %vm5231_vm6, %v5223_v55 }
 0x3cd   : > { %5470 = vmatmul.mubr.bf16.gmra.mrb[80].mxu1 %v5216_v27 }
 0x42a   : > { %v6768_v36 = vpop.f32.mrb[56].mxu1 }
 0x42b   : > { %v6769_v0 = vpop.f32.mrb[57].mxu1 }
 0x42c   : > { %v6770_v47 = vadd.f32 %v6769_v0, %v6768_v36  ;;  %v6771_v17 = vpop.f32.mrb[58].mxu1 }
 0x42d   : > { %v6772_v38 = vpop.f32.mrb[59].mxu1 }
 0x42e   : > { %v5424_v4 = vadd.f32 %v6770_v47, %v10028_v42  ;;  %v6773_v60 = vadd.f32 %v6772_v38, %v6771_v17 }
 0x430   : > { %v5477_v56 = vmax.f32 %v5424_v4, 0.0  ;;  %v5427_v51 = vadd.f32 %v6773_v60, %v10028_v42 }
 0x432   : > { %v5496_v19 = vrot.slane %v5477_v56, %v10482_v9  ;;  %v5478_v15 = vmax.f32 %v5427_v51, 0.0  ;;  %v6774_v14 = vpop.f32.mrb[60].mxu1 }
 0x433   : > { %v6775_v10 = vpop.f32.mrb[61].mxu1 }
 0x434   : > { %v5594_v24 = vrot.slane %v5496_v19, 4  ;;  %v5503_v61 = vrot.slane %v5478_v15, %v10482_v9  ;;  %v6776_v44 = vadd.f32 %v6775_v10, %v6774_v14  ;;  %v6777_v31 = vpop.f32.mrb[62].mxu1 }
 0x435   : > { %v6778_v40 = vpop.f32.mrb[63].mxu1 }
 0x436   : > { %v5595_v34 = vrot.slane %v5503_v61, 4  ;;  %v5432_v49 = vadd.f32 %v6776_v44, %v10028_v42  ;;  %v6779_v25 = vadd.f32 %v6778_v40, %v6777_v31  ;;  %v5620_v39 = vmax.f32 %v5496_v19, %v5594_v24 }
 0x438   : > { %v5621_v46 = vmax.f32 %v5503_v61, %v5595_v34  ;;  %v5479_v7 = vmax.f32 %v5432_v49, 0.0  ;;  %v5435_v2 = vadd.f32 %v6779_v25, %v10028_v42 }
 0x43a   : > { %v5645_v11 = vcombine.low %v5620_v39, %v5621_v46  ;;  %v5510_v30 = vrot.slane %v5479_v7, %v10482_v9  ;;  %v5480_v16 = vmax.f32 %v5435_v2, 0.0 }
 0x43c   : > { %v5596_v52 = vrot.slane %v5510_v30, 4  ;;  %v5517_v23 = vrot.slane %v5480_v16, %v10482_v9  ;;  %v5666_v62 = vrot.slane %v5645_v11, 1  ;;  %v5676_v48 = vrot.slane %v5645_v11, 2 }
 0x43d   : > { %v5686_v50 = vrot.slane %v5645_v11, 3  ;;  %v5696_v3 = vrot.slane %v5645_v11, 4  ;;  %v5705_v28 = vrot.slane %v5645_v11, 5  ;;  %v5657_v12 = vsel %vm2647_vm1, %v5645_v11, 0.0 }
 0x43e   : > { %v5597_v57 = vrot.slane %v5517_v23, 4  ;;  %v5622_v59 = vmax.f32 %v5510_v30, %v5596_v52  ;;  %v5667_v63 = vsel %vm2647_vm1, %v5666_v62, 0.0  ;;  %v5677_v13 = vsel %vm2647_vm1, %v5676_v48, 0.0 }
 0x43f   : > { %v5687_v29 = vsel %vm2647_vm1, %v5686_v50, 0.0  ;;  %v5697_v54 = vsel %vm2647_vm1, %v5696_v3, 0.0  ;;  %v5706_v18 = vsel %vm2647_vm1, %v5705_v28, 0.0  ;;  %v5723_v14 = vrot.slane %v5645_v11, 7 }
 0x440   : > { %v5623_v26 = vmax.f32 %v5517_v23, %v5597_v57  ;;  %v5714_v10 = vrot.slane %v5645_v11, 6 }
 0x441   : > { %v5724_v31 = vsel %vm2647_vm1, %v5723_v14, 0.0 }
 0x442   : > { %v5646_v1 = vcombine.low %v5622_v59, %v5623_v26  ;;  %v5715_v40 = vsel %vm2647_vm1, %v5714_v10, 0.0 }
 0x444   : > { %v5678_v5 = vrot.slane %v5646_v1, 3  ;;  %v5707_v21 = vrot.slane %v5646_v1, 6  ;;  %v5658_v22 = vrot.slane %v5646_v1, 1  ;;  %v5668_v53 = vrot.slane %v5646_v1, 2 }
 0x445   : > { %v5688_v41 = vrot.slane %v5646_v1, 4  ;;  %v5698_v20 = vrot.slane %v5646_v1, 5  ;;  %v5732_v34 = vsel %vm2647_vm1, %v5646_v1, 0.0 }
 0x446   : > { %v5659_v58 = vsel %vm2650_vm2, %v5658_v22, %v5657_v12  ;;  %v5669_v43 = vsel %vm2650_vm2, %v5668_v53, %v5667_v63  ;;  %v5679_v8 = vsel %vm2650_vm2, %v5678_v5, %v5677_v13  ;;  %v10048_v33 = vsel %vm2650_vm2, %v5707_v21, %v5706_v18 }
 0x447   : > { %v5689_v37 = vsel %vm2650_vm2, %v5688_v41, %v5687_v29  ;;  %v10052_v32 = vsel %vm2650_vm2, %v5698_v20, %v5697_v54  ;;  %v5741_v16 = vsel %vm2647_vm1, %v5658_v22, 0.0  ;;  %vm5897_vm1 = vcmask 392192  }
 0x470   : > { %v6780_v45 = vpop.f32.mrb[64].mxu1 }
 0x471   : > { %v6781_v55 = vpop.f32.mrb[65].mxu1 }
 0x472   : > { %v6782_v27 = vadd.f32 %v6781_v55, %v6780_v45  ;;  %v6783_v36 = vpop.f32.mrb[66].mxu1 }
 0x473   : > { %v6784_v0 = vpop.f32.mrb[67].mxu1 }
 0x474   : > { %v5440_v47 = vadd.f32 %v6782_v27, %v10028_v42  ;;  %v6785_v17 = vadd.f32 %v6784_v0, %v6783_v36 }
 0x476   : > { %v5481_v38 = vmax.f32 %v5440_v47, 0.0  ;;  %v5443_v4 = vadd.f32 %v6785_v17, %v10028_v42 }
 0x478   : > { %v5524_v60 = vrot.slane %v5481_v38, %v10482_v9  ;;  %v5482_v56 = vmax.f32 %v5443_v4, 0.0 }
 0x47a   : > { %v5598_v51 = vrot.slane %v5524_v60, 4  ;;  %v5531_v19 = vrot.slane %v5482_v56, %v10482_v9 }
 0x47c   : > { %v5599_v15 = vrot.slane %v5531_v19, 4  ;;  %v5624_v24 = vmax.f32 %v5524_v60, %v5598_v51 }
 0x47e   : > { %v5625_v61 = vmax.f32 %v5531_v19, %v5599_v15 }
 0x480   : > { %v5647_v44 = vcombine.low %v5624_v24, %v5625_v61 }
 0x482   : > { %v5680_v49 = vrot.slane %v5647_v44, 4  ;;  %v5725_v25 = vsel %vm2650_vm2, %v5647_v44, %v5724_v31  ;;  %v5660_v39 = vrot.slane %v5647_v44, 2  ;;  %v5670_v46 = vrot.slane %v5647_v44, 3 }
 0x483   : > { %v5690_v7 = vrot.slane %v5647_v44, 5  ;;  %v5716_v2 = vrot.slane %v5647_v44, 7  ;;  %v5733_v30 = vrot.slane %v5647_v44, 1 }
 0x484   : > { %v5661_v52 = vsel %vm2653_vm3, %v5660_v39, %v5659_v58  ;;  %v5671_v23 = vsel %vm2653_vm3, %v5670_v46, %v5669_v43  ;;  %v10066_v57 = vsel %vm2653_vm3, %v5680_v49, %v5679_v8  ;;  %v5742_v62 = vsel %vm2650_vm2, %v5660_v39, %v5741_v16 }
 0x485   : > { %v6786_v11 = vpop.f32.mrb[68].mxu1  ;;  %v10070_v50 = vsel %vm2653_vm3, %v5690_v7, %v5689_v37  ;;  %v5717_v59 = vsel %vm2650_vm2, %v5716_v2, %v5715_v40  ;;  %v5734_v26 = vsel %vm2650_vm2, %v5733_v30, %v5732_v34 }
 0x486   : > { %v6787_v48 = vpop.f32.mrb[69].mxu1 }
 0x487   : > { %v6788_v3 = vadd.f32 %v6787_v48, %v6786_v11  ;;  %v6789_v28 = vpop.f32.mrb[70].mxu1 }
 0x488   : > { %v6790_v1 = vpop.f32.mrb[71].mxu1 }
 0x489   : > { %v5448_v12 = vadd.f32 %v6788_v3, %v10028_v42  ;;  %v6791_v63 = vadd.f32 %v6790_v1, %v6789_v28 }
 0x48b   : > { %v5483_v13 = vmax.f32 %v5448_v12, 0.0  ;;  %v5451_v29 = vadd.f32 %v6791_v63, %v10028_v42 }
 0x48d   : > { %v5538_v5 = vrot.slane %v5483_v13, %v10482_v9  ;;  %v5484_v21 = vmax.f32 %v5451_v29, 0.0 }
 0x48e   : > { %v6792_v41 = vpop.f32.mrb[72].mxu1 }
 0x48f   : > { %v5600_v22 = vrot.slane %v5538_v5, 4  ;;  %v5545_v53 = vrot.slane %v5484_v21, %v10482_v9  ;;  %v6793_v54 = vpop.f32.mrb[73].mxu1 }
 0x490   : > { %v6794_v18 = vadd.f32 %v6793_v54, %v6792_v41  ;;  %v6795_v58 = vpop.f32.mrb[74].mxu1 }
 0x491   : > { %v5601_v20 = vrot.slane %v5545_v53, 4  ;;  %v6796_v43 = vpop.f32.mrb[75].mxu1  ;;  %v5626_v8 = vmax.f32 %v5538_v5, %v5600_v22 }
 0x492   : > { %v5456_v45 = vadd.f32 %v6794_v18, %v10028_v42  ;;  %v6797_v55 = vadd.f32 %v6796_v43, %v6795_v58 }
 0x493   : > { %v5627_v37 = vmax.f32 %v5545_v53, %v5601_v20 }
 0x494   : > { %v5485_v36 = vmax.f32 %v5456_v45, 0.0  ;;  %v5459_v0 = vadd.f32 %v6797_v55, %v10028_v42 }
 0x495   : > { %v5648_v27 = vcombine.low %v5626_v8, %v5627_v37 }
 0x496   : > { %v5552_v38 = vrot.slane %v5485_v36, %v10482_v9  ;;  %v5486_v4 = vmax.f32 %v5459_v0, 0.0 }
 0x497   : > { %v5709_v47 = vrot.slane %v5648_v27, 7  ;;  %v5726_v17 = vrot.slane %v5648_v27, 1  ;;  %v5662_v56 = vrot.slane %v5648_v27, 3  ;;  %v5672_v51 = vrot.slane %v5648_v27, 4 }
 0x498   : > { %v6798_v60 = vpop.f32.mrb[76].mxu1  ;;  %v5700_v19 = vrot.slane %v5648_v27, 6  ;;  %v5718_v15 = vsel %vm2653_vm3, %v5648_v27, %v5717_v59  ;;  %v5602_v14 = vrot.slane %v5552_v38, 4  ;;  %v5559_v10 = vrot.slane %v5486_v4, %v10482_v9 }
 0x499   : > { %v6799_v24 = vpop.f32.mrb[77].mxu1  ;;  %v5710_v61 = vsel %vm2653_vm3, %v5709_v47, %v10048_v33  ;;  %v5727_v44 = vsel %vm2653_vm3, %v5726_v17, %v5725_v25  ;;  %v5663_v34 = vsel %vm2656_vm4, %v5662_v56, %v5661_v52  ;;  %v5673_v49 = vsel %vm2656_vm4, %v5672_v51, %v5671_v23 }
 0x49a   : > { %v6800_v31 = vadd.f32 %v6799_v24, %v6798_v60  ;;  %v6801_v40 = vpop.f32.mrb[78].mxu1  ;;  %v5701_v39 = vsel %vm2653_vm3, %v5700_v19, %v10052_v32  ;;  %v5603_v46 = vrot.slane %v5559_v10, 4  ;;  %v5735_v2 = vrot.slane %v5648_v27, 2 }
 0x49b   : > { %v6802_v7 = vpop.f32.mrb[79].mxu1  ;;  %v5743_v30 = vsel %vm2653_vm3, %v5662_v56, %v5742_v62  ;;  %v5628_v33 = vmax.f32 %v5552_v38, %v5602_v14 }
 0x49c   : > { %v5464_v16 = vadd.f32 %v6800_v31, %v10028_v42  ;;  %v6803_v11 = vadd.f32 %v6802_v7, %v6801_v40  ;;  %v5629_v48 = vmax.f32 %v5559_v10, %v5603_v46  ;;  %v5736_v25 = vsel %vm2653_vm3, %v5735_v2, %v5734_v26 }
 0x49e   : > { %v5487_v59 = vmax.f32 %v5464_v16, 0.0  ;;  %v5467_v52 = vadd.f32 %v6803_v11, %v10028_v42  ;;  %v5649_v3 = vcombine.low %v5628_v33, %v5629_v48 }
 0x4a0   : > { %v5566_v23 = vrot.slane %v5487_v59, %v10482_v9  ;;  %v5488_v28 = vmax.f32 %v5467_v52, 0.0  ;;  %v6804_v32 = vpop.f32.mrb[80].mxu1  ;;  %v5682_v12 = vrot.slane %v5649_v3, 5  ;;  %v5692_v63 = vrot.slane %v5649_v3, 6 }
 0x4a1   : > { %v6805_v1 = vpop.f32.mrb[81].mxu1  ;;  %v5702_v13 = vrot.slane %v5649_v3, 7  ;;  %v5711_v62 = vsel %vm2656_vm4, %v5649_v3, %v5710_v61  ;;  %v5719_v22 = vrot.slane %v5649_v3, 1  ;;  %v5728_v20 = vrot.slane %v5649_v3, 2 }
 0x4a2   : > { %v5604_v29 = vrot.slane %v5566_v23, 4  ;;  %v5573_v5 = vrot.slane %v5488_v28, %v10482_v9  ;;  %v6806_v21 = vadd.f32 %v6805_v1, %v6804_v32  ;;  %v6807_v26 = vpop.f32.mrb[82].mxu1  ;;  %v5683_v53 = vsel %vm2656_vm4, %v5682_v12, %v10066_v57 }
 0x4a3   : > { %v5693_v41 = vsel %vm2656_vm4, %v5692_v63, %v10070_v50  ;;  %v5703_v54 = vsel %vm2656_vm4, %v5702_v13, %v5701_v39  ;;  %v6808_v18 = vpop.f32.mrb[83].mxu1  ;;  %v5720_v8 = vsel %vm2656_vm4, %v5719_v22, %v5718_v15  ;;  %v5729_v37 = vsel %vm2656_vm4, %v5728_v20, %v5727_v44 }
 0x4a4   : > { %v5605_v58 = vrot.slane %v5573_v5, 4  ;;  %v5472_v43 = vadd.f32 %v6806_v21, %v10028_v42  ;;  %v5737_v45 = vrot.slane %v5649_v3, 3  ;;  %v5744_v55 = vrot.slane %v5649_v3, 4 }
 0x4a5   : > { %v5630_v27 = vmax.f32 %v5566_v23, %v5604_v29  ;;  %v10483_v12 = vmov 0.0  }
 0x4a6   : > { %v5631_v36 = vmax.f32 %v5573_v5, %v5605_v58  ;;  %v5489_v0 = vmax.f32 %v5472_v43, 0.0  ;;  %v5738_v57 = vsel %vm2656_vm4, %v5737_v45, %v5736_v25  ;;  %v5745_v50 = vsel %vm2656_vm4, %v5744_v55, %v5743_v30 }
 0x4a8   : > { %v5650_v47 = vcombine.low %v5630_v27, %v5631_v36  ;;  %v5580_v17 = vrot.slane %v5489_v0, %v10482_v9 }
 0x4aa   : > { %v5606_v38 = vrot.slane %v5580_v17, 4  ;;  %v5664_v4 = vrot.slane %v5650_v47, 4  ;;  %v5674_v60 = vrot.slane %v5650_v47, 5  ;;  %v5684_v42 = vrot.slane %v5650_v47, 6 }
 0x4ab   : > { %v5694_v56 = vrot.slane %v5650_v47, 7  ;;  %v5704_v51 = vsel %vm2659_vm5, %v5650_v47, %v5703_v54  ;;  %v5712_v19 = vrot.slane %v5650_v47, 1  ;;  %v5721_v15 = vrot.slane %v5650_v47, 2 }
 0x4ac   : > { %v5632_v14 = vmax.f32 %v5580_v17, %v5606_v38  ;;  %v5665_v10 = vsel %vm2659_vm5, %v5664_v4, %v5663_v34  ;;  %v5675_v24 = vsel %vm2659_vm5, %v5674_v60, %v5673_v49  ;;  %v5685_v61 = vsel %vm2659_vm5, %v5684_v42, %v5683_v53 }
 0x4ad   : > { %v5695_v44 = vsel %vm2659_vm5, %v5694_v56, %v5693_v41  ;;  %v5713_v9 = vsel %vm2659_vm5, %v5712_v19, %v5711_v62  ;;  %v5722_v31 = vsel %vm2659_vm5, %v5721_v15, %v5720_v8  ;;  %v5730_v40 = vrot.slane %v5650_v47, 3 }
 0x4ae   : > { %v5739_v39 = vrot.slane %v5632_v14, 4  ;;  %v5746_v46 = vrot.slane %v5632_v14, 5  ;;  %v5748_v7 = vmax.f32 %v5665_v10, %v5713_v9  ;;  %v5749_v2 = vmax.f32 %v5675_v24, %v5722_v31  ;;  %v7267_v31 = vld [vmem:[%s10389_s5 + $0x40] sm:$0xff]  }
 0x4af   : > { %v5731_v30 = vsel %vm2659_vm5, %v5730_v40, %v5729_v37  ;;  %v7268_v40 = vld [vmem:[%s10389_s5] sm:$0xff]   ;;  %6810 = vmatprep.subr.bf16.mxu1 %v7267_v31  ;;  %v7295_v31 = vld [vmem:[%s10389_s5 + $0xf0] sm:$0xff]  }
 0x4b0   : > { %v5740_v16 = vsel %vm2659_vm5, %v5739_v39, %v5738_v57  ;;  %v5747_v34 = vsel %vm2659_vm5, %v5746_v46, %v5745_v50  ;;  %v5750_v49 = vmax.f32 %v5685_v61, %v5731_v30  ;;  %6811 = vmatpush3.bf16.msra.mxu1 %v7268_v40  ;;  %v7296_v40 = vld [vmem:[%s10389_s5 + $0xb0] sm:$0xff]  }
 0x4b1   : > { %v5751_v11 = vmax.f32 %v5695_v44, %v5740_v16  ;;  %v5752_v33 = vmax.f32 %v5704_v51, %v5747_v34 }
 0x4b2   : > { %v5753_v48 = vcombine.low %v5748_v7, %v5750_v49  ;;  %v5754_v25 = vcombine.high %v5748_v7, %v5750_v49 }
 0x4b3   : > { %v5769_v59 = vcombine.low %v5749_v2, %v5751_v11  ;;  %v5770_v52 = vcombine.high %v5749_v2, %v5751_v11  ;;  %v5791_v3 = vrot.slane %v5752_v33, %v8778_v35  ;;  %v5831_v21 = vcombine.high %v5752_v33, %v10483_v12  ;;  %v7269_v2 = vld [vmem:[%s10389_s5 + $0x48] sm:$0xff]  }
 0x4b4   : > { %v5761_v23 = vrot.slane %v5753_v48, %v8778_v35  ;;  %v5768_v28 = vrot.slane %v5754_v25, %v8778_v35  ;;  %v7270_v25 = vld [vmem:[%s10389_s5 + $0x8] sm:$0xff]   ;;  %6812 = vmatprep.subr.bf16.mxu1 %v7269_v2 }
 0x4b5   : > { %v5777_v32 = vrot.slane %v5769_v59, %v8778_v35  ;;  %v5784_v1 = vrot.slane %v5770_v52, %v8778_v35  ;;  %v5816_v63 = vcombine.high %v5791_v3, %v10483_v12  ;;  %v5823_v5 = vrot.slane %v5791_v3, %v8824_v6  ;;  %v7271_v3 = vld [vmem:[%s10389_s5 + $0x50] sm:$0xff]   ;;  %6813 = vmatpush3.bf16.msra.mxu1 %v7270_v25  ;;  %v7306_v25 = vld [vmem:[%s10391_s7 + $0x38] sm:$0xff]  }
 0x4b6   : > { %6814 = vmatprep.subr.bf16.mxu1 %v7271_v3 }
 0x4b7   : > { %v5792_v13 = vcombine.low %v5761_v23, %v5777_v32  ;;  %v5793_v62 = vcombine.high %v5761_v23, %v5777_v32  ;;  %v5808_v29 = vcombine.low %v5768_v28, %v5784_v1  ;;  %v5830_v53 = vrot.slane %v5816_v63, %v8824_v6  ;;  %v7272_v28 = vld [vmem:[%s10389_s5 + $0x10] sm:$0xff]   ;;  %v7273_v32 = vld [vmem:[%s10389_s5 + $0x58] sm:$0xff]   ;;  %v7275_v63 = vld [vmem:[%s10389_s5 + $0x60] sm:$0xff]  }
 0x4b8   : > { %v7274_v1 = vld [vmem:[%s10389_s5 + $0x18] sm:$0xff]  }
 0x4b9   : > { %v5800_v22 = vrot.slane %v5792_v13, %v8824_v6  ;;  %v5815_v26 = vrot.slane %v5808_v29, %v8824_v6  ;;  %v5807_v41 = vrot.slane %v5793_v62, %v8824_v6  ;;  %6815 = vmatpush3.bf16.msra.mxu1 %v7272_v28  ;;  %v7276_v13 = vld [vmem:[%s10389_s5 + $0x20] sm:$0xff]   ;;  %v7277_v62 = vld [vmem:[%s10389_s5 + $0x68] sm:$0xff]  }
 0x4ba   : > { %6816 = vmatprep.subr.bf16.mxu1 %v7273_v32  ;;  %v7278_v29 = vld [vmem:[%s10389_s5 + $0x28] sm:$0xff]   ;;  %v5992_v32 = vld [vmem:[%s10390_s6] sm:$0x1] }
 0x4bb   : > { %v5832_v54 = vcombine.low %v5800_v22, %v5823_v5  ;;  %v5833_v20 = vcombine.high %v5800_v22, %v5823_v5  ;;  %v5836_v35 = vcombine.low %v5815_v26, %v5831_v21  ;;  %v5834_v18 = vcombine.low %v5807_v41, %v5830_v53  ;;  %v7279_v5 = vld [vmem:[%s10389_s5 + $0x70] sm:$0xff]   ;;  %v7281_v22 = vld [vmem:[%s10389_s5 + $0x78] sm:$0xff]  }
 0x4bc   : > { %v5835_v58 = vcombine.high %v5807_v41, %v5830_v53  ;;  %v7280_v21 = vld [vmem:[%s10389_s5 + $0x30] sm:$0xff]   ;;  %v7282_v26 = vld [vmem:[%s10389_s5 + $0x38] sm:$0xff]  }
 0x4bd   : > { %v5862_v43 = vrot.slane %v5832_v54, 2  ;;  %v5863_v8 = vrot.slane %v5833_v20, 1  ;;  %v5868_v37 = vrot.slane %v5836_v35, 6  ;;  %v5851_v45 = vrot.slane %v5832_v54, 1  ;;  %6817 = vmatpush3.bf16.msra.mxu1 %v7274_v1 }
 0x4be   : > { %v5866_v55 = vrot.slane %v5835_v58, 7  ;;  %v5853_v27 = vrot.slane %v5834_v18, 7  ;;  %v5855_v36 = vrot.slane %v5835_v58, 6  ;;  %v5857_v0 = vrot.slane %v5836_v35, 5  ;;  %6818 = vmatprep.subr.bf16.mxu1 %v7275_v63 }
 0x4bf   : > { %v5864_v57 = vsel %vm2650_vm2, %v5863_v8, %v5862_v43  ;;  %v5852_v50 = vsel %vm2650_vm2, %v5833_v20, %v5851_v45  ;;  %v5884_v47 = vrot.slane %v5832_v54, 4  ;;  %v5885_v17 = vrot.slane %v5833_v20, 3 }
 0x4c0   : > { %v5865_v6 = vsel %vm2653_vm3, %v5834_v18, %v5864_v57  ;;  %v5854_v38 = vsel %vm2653_vm3, %v5853_v27, %v5852_v50  ;;  %v5887_v4 = vrot.slane %v5834_v18, 2  ;;  %v5889_v60 = vrot.slane %v5835_v58, 1 }
 0x4c1   : > { %v5867_v42 = vsel %vm2656_vm4, %v5866_v55, %v5865_v6  ;;  %v5856_v56 = vsel %vm2656_vm4, %v5855_v36, %v5854_v38  ;;  %v5886_v51 = vsel %vm2650_vm2, %v5885_v17, %v5884_v47  ;;  %v5873_v19 = vrot.slane %v5832_v54, 3  ;;  %6819 = vmatpush3.bf16.msra.mxu1 %v7276_v13 }
 0x4c2   : > { %v5869_v15 = vsel %vm2659_vm5, %v5868_v37, %v5867_v42  ;;  %v5858_v14 = vsel %vm2659_vm5, %v5857_v0, %v5856_v56  ;;  %v5888_v10 = vsel %vm2653_vm3, %v5887_v4, %v5886_v51  ;;  %v5874_v24 = vrot.slane %v5833_v20, 2  ;;  %6820 = vmatprep.subr.bf16.mxu1 %v7277_v62  ;;  %v7284_v4 = vld [vmem:[%s10389_s5 + $0x80] sm:$0xff]   ;;  %v7285_v42 = vld [vmem:[%s10389_s5 + $0xc8] sm:$0xff]  }
 0x4c3   : > { %5870 = vrot.lane.b32.xlu1 %v5869_v15, %s10479_s15  ;;  %5859 = vrot.lane.b32.xlu0 %v5858_v14, %s10484_s25  ;;  %v5890_v61 = vsel %vm2656_vm4, %v5889_v60, %v5888_v10  ;;  %v5876_v44 = vrot.slane %v5834_v18, 1  ;;  %v5842_v9 = vrot.slane %v5833_v20, 7  ;;  %v5844_v7 = vrot.slane %v5834_v18, 6  ;;  %v7286_v51 = vld [vmem:[%s10389_s5 + $0x88] sm:$0xff]   ;;  %v7288_v15 = vld [vmem:[%s10389_s5 + $0x90] sm:$0xff]   ;;  %s6692_s25 = sshll.u32 %s7478_s21, 4 }
 0x4c4   : > { %v5891_v39 = vsel %vm2659_vm5, %v5836_v35, %v5890_v61  ;;  %v5875_v46 = vsel %vm2650_vm2, %v5874_v24, %v5873_v19  ;;  %v5879_v16 = vrot.slane %v5836_v35, 7  ;;  %v5846_v34 = vrot.slane %v5835_v58, 5  ;;  %v7287_v19 = vld [vmem:[%s10389_s5 + $0xd0] sm:$0xff]   ;;  %v7289_v14 = vld [vmem:[%s10389_s5 + $0xd8] sm:$0xff]   ;;  %v7291_v24 = vld [vmem:[%s10389_s5 + $0xe0] sm:$0xff]  }
 0x4c5   : > { %v5877_v30 = vsel %vm2653_vm3, %v5876_v44, %v5875_v46  ;;  %v5843_v49 = vsel %vm2650_vm2, %v5842_v9, %v5832_v54  ;;  %v5848_v33 = vrot.slane %v5836_v35, 4  ;;  %6821 = vmatpush3.bf16.msra.mxu1 %v7278_v29  ;;  %vm5899_vm2 = vcmask 523264   ;;  %v7283_v35 = vld [vmem:[%s10389_s5 + $0xc0] sm:$0xff]   ;;  %v7290_v10 = vld [vmem:[%s10389_s5 + $0x98] sm:$0xff]   ;;  %v7293_v44 = vld [vmem:[%s10389_s5 + $0xe8] sm:$0xff]  }
 0x4c6   : > { %v5878_v11 = vsel %vm2656_vm4, %v5835_v58, %v5877_v30  ;;  %v5845_v48 = vsel %vm2653_vm3, %v5844_v7, %v5843_v49  ;;  %6822 = vmatprep.subr.bf16.mxu1 %v7279_v5  ;;  %vm5920_vm3 = vcmask 916480   ;;  %v7292_v61 = vld [vmem:[%s10389_s5 + $0xa0] sm:$0xff]   ;;  %v7294_v9 = vld [vmem:[%s10389_s5 + $0xa8] sm:$0xff]   ;;  %v7298_v46 = vld [vmem:[%s10389_s5 + $0xb8] sm:$0xff]  }
 0x4c7   : > { %5892 = vrot.lane.b32.xlu1 %v5891_v39, %s10423_s12  ;;  %v5880_v59 = vsel %vm2659_vm5, %v5879_v16, %v5878_v11  ;;  %v5847_v52 = vsel %vm2656_vm4, %v5846_v34, %v5845_v48  ;;  %s7395_s12 = smov 112   ;;  %vm6673_vm4 = vmpackc.low %vm4039_vm10, %vm4039_vm10  ;;  %v7297_v39 = vld [vmem:[%s10389_s5 + $0xf8] sm:$0xff]   ;;  %v7299_v30 = vld [vmem:[%s10391_s7] sm:$0xff]  }
 0x4c8   : > { %5881 = vrot.lane.b32.xlu0 %v5880_v59, %s7394_s16  ;;  %v5849_v23 = vsel %vm2659_vm5, %v5848_v33, %v5847_v52  ;;  %v7300_v16 = vld [vmem:[%s10391_s7 + $0x8] sm:$0xff]   ;;  %v7301_v34 = vld [vmem:[%s10391_s7 + $0x10] sm:$0xff]   ;;  %v7302_v49 = vld [vmem:[%s10391_s7 + $0x18] sm:$0xff]   ;;  %s7321_s16 = sshll.u32 %s7396_s1, 4  ;;  %s7322_s16 = int_to_ptr.vmem [resolvable:$false] %s7321_s16 }
 0x4c9   : > { %6823 = vmatpush3.bf16.msra.mxu1 %v7280_v21  ;;  %v7303_v11 = vld [vmem:[%s10391_s7 + $0x20] sm:$0xff]   ;;  %v7304_v33 = vld [vmem:[%s10391_s7 + $0x28] sm:$0xff]   ;;  %v7305_v48 = vld [vmem:[%s10391_s7 + $0x30] sm:$0xff]   ;;  %s7323_s22 = scalar_lea.vmem %s7322_s16, 32 }
 0x4ca   : > { %6824 = vmatprep.subr.bf16.mxu1 %v7281_v22 }
 0x4cd   : > { %6825 = vmatpush3.bf16.msra.mxu1 %v7282_v26  ;;  %v7307_v26 = vld [vmem:[%s10393_s9] sm:$0xff]  }
 0x4ce   : > { %6832 = vmatprep.subr.bf16.mxu1 %v7283_v35  ;;  %v7311_v35 = vld [vmem:[%s10393_s9 + $0x20] sm:$0xff]  }
 0x535   : > { %v5871_v53 = vpop.permute.xlu1 %5870  ;;  %v5860_v41 = vpop.permute.xlu0 %5859 }
 0x536   : > { %v5895_v54 = vsel %vm4039_vm10, %v5849_v23, %v5860_v41  ;;  %v7308_v41 = vld [vmem:[%s10393_s9 + $0x8] sm:$0xff]  }
 0x537   : > { %v5896_v58 = vsel %vm4081_vm12, %v5895_v54, %v5871_v53  ;;  %v7309_v54 = vld [vmem:[%s10393_s9 + $0x10] sm:$0xff]  }
 0x539   : > { %v5893_v20 = vpop.permute.xlu1 %5892 }
 0x53a   : > { %v5882_v18 = vpop.permute.xlu0 %5881 }
 0x53b   : > { %v5898_v43 = vsel %vm5897_vm1, %v5896_v58, %v5882_v18  ;;  %v7312_v18 = vld [vmem:[%s10393_s9 + $0x28] sm:$0xff]   ;;  %v7313_v58 = vld [vmem:[%s10393_s9 + $0x30] sm:$0xff]  }
 0x53c   : > { %v5900_v8 = vsel %vm5899_vm2, %v5898_v43, %v5893_v20  ;;  %v7310_v20 = vld [vmem:[%s10393_s9 + $0x18] sm:$0xff]  }
 0x53d   : > { %v5906_v37 = vrot.slane %v5900_v8, 2  ;;  %v5902_v45 = vrot.slane %v5900_v8, 1  ;;  %v5914_v55 = vrot.slane %v5900_v8, 4  ;;  %v5910_v27 = vrot.slane %v5900_v8, 3  ;;  %v7314_v43 = vld [vmem:[%s10393_s9 + $0x38] sm:$0xff]  }
 0x53f   : > { %5907 = vrot.lane.b32.xlu1 %v5906_v37, %s10479_s15  ;;  %5903 = vrot.lane.b32.xlu0 %v5902_v45, %s10478_s30  ;;  %s10342_s30 = scalar_lea.hbm %s10395_s11, %s6692_s25 }
 0x543   : > { %5915 = vrot.lane.b32.xlu1 %v5914_v55, %s10485_s0  ;;  %5911 = vrot.lane.b32.xlu0 %v5910_v27, %s7395_s12  ;;  %s379_s0 = scalar_lea.vmem [#allocation2], %s378_s13 }
 0x544   : > { %s6493_s12 = sshll.u32 %s379_s0, 4  ;;  %s10344_s12 = int_to_ptr.vmem [resolvable:$true] %s6493_s12 }
 0x545   : > { %s7317_s21 = scalar_lea.vmem %s10344_s12, 16  ;;  %p7324_p0 = scmp.lt.s32.totalorder %s10344_s12, %s7322_s16 }
 0x546   : > { %p7318_p11 = scmp.ne.s32.totalorder %s10344_s12, %s7317_s21  ;;  %p7325_p1 = scmp.lt.s32.totalorder %s7323_s22, %s7317_s21 }
 0x548   : > { %p7319_p12 = pnand %p7318_p11, %p7495_p5  ;;  %p7326_p2 = por %p7325_p1, %p7324_p0 }
 0x54a   : > { %p7320_p13 = pneg %p7319_p12 }
 0x54c   : > { %p7327_p3 = pnand %p7326_p2, %p7320_p13 }
 0x5b1   : > { %v5908_v36 = vpop.permute.xlu1 %5907  ;;  %v5904_v0 = vpop.permute.xlu0 %5903 }
 0x5b2   : > { %v5918_v57 = vsel %vm4323_vm14, %v5900_v8, %v5904_v0  ;;  %v5919_v50 = vsel %vm4081_vm12, %v5904_v0, %v5908_v36  ;;  %v6283_v8 = vld [vmem:[%s10392_s8] sm:$0x1] }
 0x5b3   : > { %v5924_v60 = vpack.c.bf16 %v5918_v57, %v5918_v57 }
 0x5b5   : > { %v5912_v47 = vpop.permute.xlu0 %5911  ;;  %v5916_v17 = vpop.permute.xlu1 %5915 }
 0x5b6   : > { %v5921_v6 = vsel %vm5920_vm3, %v5919_v50, %v5912_v47  ;;  %v6674_v56 = vpack.c.bf16 %v5916_v17, %v5916_v17  ;;  %v5922_v7 = vsel %vm5899_vm2, %v5912_v47, %v5916_v17  ;;  %v6390_v50 = vld [vmem:[%s10394_s10] sm:$0x1] }
 0x5b7   : > { %v5925_v38 = vpack.c.bf16 %v5921_v6, %v5921_v6  ;;  %v5926_v2 = vpack.c.bf16 %v5922_v7, %v5922_v7 }
 0x5b9   : > { %6217 = vmatprep.mubr.bf16.mxu1 %v5925_v38 }
 0x5ba   : > { %6218 = vmatmul.mubr.bf16.vlgmr.msra.gmra.mrb[84].mxu1 %v5924_v60 }
 0x5bb   : > { %6833 = vmatpush3.bf16.msra.mxu1 %v7284_v4  ;;  %6675 = vmatprep.mubr.msk.bf16.mxu1 %vm6673_vm4, %v6674_v56 }
 0x5bc   : > { %6834 = vmatprep.subr.bf16.mxu1 %v7285_v42 }
 0x5bf   : > { %6835 = vmatpush3.bf16.msra.mxu1 %v7286_v51 }
 0x5c0   : > { %6836 = vmatprep.subr.bf16.mxu1 %v7287_v19 }
 0x5c3   : > { %6837 = vmatpush3.bf16.msra.mxu1 %v7288_v15 }
 0x5c4   : > { %6838 = vmatprep.subr.bf16.mxu1 %v7289_v14 }
 0x5c7   : > { %6839 = vmatpush3.bf16.msra.mxu1 %v7290_v10 }
 0x5c8   : > { %6840 = vmatprep.subr.bf16.mxu1 %v7291_v24 }
 0x5cb   : > { %6841 = vmatpush3.bf16.msra.mxu1 %v7292_v61 }
 0x5cc   : > { %6842 = vmatprep.subr.bf16.mxu1 %v7293_v44 }
 0x5cf   : > { %6843 = vmatpush3.bf16.msra.mxu1 %v7294_v9 }
 0x5d0   : > { %6844 = vmatprep.subr.bf16.mxu1 %v7295_v31 }
 0x5d3   : > { %6845 = vmatpush3.bf16.msra.mxu1 %v7296_v40 }
 0x5d4   : > { %6846 = vmatprep.subr.bf16.mxu1 %v7297_v39 }
 0x5d7   : > { %6847 = vmatpush3.bf16.msra.mxu1 %v7298_v46 }
 0x5d8   : > { %7084 = vmatprep.subr.bf16.mxu1 %v10483_v12 }
 0x5da   : > { %6258 = vmatmul.mubr.bf16.vlgmr.msra.gmra.mrb[88].mxu1 %v5926_v2 }
 0x5db   : > { %7100 = vmatprep.mubr.msk.bf16.mxu1 %vm7382_vm0, %v10483_v12  ;;  %7085 = vmatpush3.bf16.msra.mxu1 %v7299_v30 }
 0x5dc   : > { %7086 = vmatprep.subr.bf16.mxu1 %v10483_v12 }
 0x5df   : > { %7087 = vmatpush3.bf16.msra.mxu1 %v7300_v16 }
 0x5e0   : > { %7088 = vmatprep.subr.bf16.mxu1 %v10483_v12 }
 0x5e3   : > { %7089 = vmatpush3.bf16.msra.mxu1 %v7301_v34 }
 0x5e4   : > { %7090 = vmatprep.subr.bf16.mxu1 %v10483_v12 }
 0x5e7   : > { %7091 = vmatpush3.bf16.msra.mxu1 %v7302_v49 }
 0x5e8   : > { %7092 = vmatprep.subr.bf16.mxu1 %v10483_v12 }
 0x5eb   : > { %7093 = vmatpush3.bf16.msra.mxu1 %v7303_v11 }
 0x5ec   : > { %7094 = vmatprep.subr.bf16.mxu1 %v10483_v12 }
 0x5ef   : > { %7095 = vmatpush3.bf16.msra.mxu1 %v7304_v33 }
 0x5f0   : > { %7096 = vmatprep.subr.bf16.mxu1 %v10483_v12 }
 0x5f3   : > { %7097 = vmatpush3.bf16.msra.mxu1 %v7305_v48 }
 0x5f4   : > { %7098 = vmatprep.subr.bf16.mxu1 %v10483_v12 }
 0x5f7   : > { %7099 = vmatpush3.bf16.msra.mxu1 %v7306_v25 }
 0x5f8   : > { %7104 = vmatprep.subr.bf16.mxu1 %v10483_v12 }
 0x68d   : > { %v6826_v59 = vpop.f32.mrb[84].mxu1 }
 0x68e   : > { %v6827_v52 = vpop.f32.mrb[85].mxu1 }
 0x68f   : > { %v6828_v3 = vadd.f32 %v6827_v52, %v6826_v59  ;;  %v6829_v23 = vpop.f32.mrb[86].mxu1 }
 0x690   : > { %v6830_v28 = vpop.f32.mrb[87].mxu1 }
 0x691   : > { %v6220_v13 = vadd.f32 %v6828_v3, %v5992_v32 }
 0x6ad   : > { %v6848_v1 = vpop.f32.mrb[88].mxu1 }
 0x6ae   : > { %v6849_v63 = vpop.f32.mrb[89].mxu1 }
 0x6af   : > { %v6850_v62 = vadd.f32 %v6849_v63, %v6848_v1  ;;  %v6851_v29 = vpop.f32.mrb[90].mxu1 }
 0x6b0   : > { %v6852_v5 = vpop.f32.mrb[91].mxu1 }
 0x6b1   : > { %v6260_v21 = vadd.f32 %v6850_v62, %v6220_v13 }
 0x6b3   : > { %v6265_v22 = vmax.f32 %v6260_v21, 0.0 }
 0x6b5   : > { %v6266_v53 = vpack.c.bf16 %v6265_v22, %v6265_v22 }
 0x6b7   : > { %7101 = vmatmul.mubr.bf16.vlgmr.msra.gmra.mrb[92].mxu1 %v6266_v53 }
 0x6b8   : > { %7105 = vmatpush3.bf16.msra.mxu1 %v7307_v26  ;;  %7120 = vmatprep.mubr.msk.bf16.mxu1 %vm7382_vm0, %v10483_v12 }
 0x6b9   : > { %7106 = vmatprep.subr.bf16.mxu1 %v10483_v12 }
 0x6bc   : > { %7107 = vmatpush3.bf16.msra.mxu1 %v7308_v41 }
 0x6bd   : > { %7108 = vmatprep.subr.bf16.mxu1 %v10483_v12 }
 0x6c0   : > { %7109 = vmatpush3.bf16.msra.mxu1 %v7309_v54 }
 0x6c1   : > { %7110 = vmatprep.subr.bf16.mxu1 %v10483_v12 }
 0x6c4   : > { %7111 = vmatpush3.bf16.msra.mxu1 %v7310_v20 }
 0x6c5   : > { %7112 = vmatprep.subr.bf16.mxu1 %v10483_v12 }
 0x6c8   : > { %7113 = vmatpush3.bf16.msra.mxu1 %v7311_v35 }
 0x6c9   : > { %7114 = vmatprep.subr.bf16.mxu1 %v10483_v12 }
 0x6cc   : > { %7115 = vmatpush3.bf16.msra.mxu1 %v7312_v18 }
 0x6cd   : > { %7116 = vmatprep.subr.bf16.mxu1 %v10483_v12 }
 0x6d0   : > { %7117 = vmatpush3.bf16.msra.mxu1 %v7313_v58 }
 0x6d1   : > { %7118 = vmatprep.subr.bf16.mxu1 %v10483_v12 }
 0x6d4   : > { %7119 = vmatpush3.bf16.msra.mxu1 %v7314_v43 }
 0x78a   : > { %v6366_v37 = vpop.f32.mrb[92].mxu1 }
 0x78b   : > { %v6367_v45 = vadd.f32 %v6366_v37, %v6283_v8  ;;  %v7102_v55 = vpop.f32.mrb[93].mxu1 }
 0x78c   : > { %v6369_v27 = vpop.f32.mrb[94].mxu1 }
 0x78d   : > { %v6372_v36 = vmax.f32 %v6367_v45, 0.0  ;;  %v7103_v0 = vpop.f32.mrb[95].mxu1 }
 0x78f   : > { %v6373_v57 = vpack.c.bf16 %v6372_v36, %v6372_v36 }
 0x791   : > { %7121 = vmatmul.mubr.bf16.vlgmr.msra.gmra.mrb[96].mxu1 %v6373_v57 }
 0x864   : > { %v6473_v12 = vpop.f32.mrb[96].mxu1 }
 0x865   : > { %v6474_v47 = vadd.f32 %v6473_v12, %v6390_v50  ;;  %v7122_v17 = vpop.f32.mrb[97].mxu1 }
 0x866   : > { %v6476_v6 = vpop.f32.mrb[98].mxu1 }
 0x867   : > { %6479 = vst [vmem:[%s379_s0] sm:$0x1] %v6474_v47  ;;  %v7123_v38 = vpop.f32.mrb[99].mxu1 }
 0x868   : > { %7330 = shalt.err (!%p7327_p3)
}
 0x869   : > { %s7331_s13 = scalar_lea.hbm %s10342_s30, 16  ;;  %s7335_s0 = scalar_lea.hbm %s10395_s11, 32 }
 0x86a   : > { %p7332_p4 = scmp.ne.s32.totalorder %s10342_s30, %s7331_s13  ;;  %p7336_p9 = scmp.lt.u32.totalorder %s10342_s30, %s10395_s11 }
 0x86b   : > { %p7337_p10 = scmp.lt.u32.totalorder %s7335_s0, %s7331_s13  ;;  %p7339_p12 = scmp.lt.u32.totalorder %s7331_s13, %s10342_s30 }
 0x86c   : > { %p7333_p7 = pnand %p7332_p4, %p7495_p5 }
 0x86d   : > { %p7338_p11 = por %p7337_p10, %p7336_p9 }
 0x86e   : > { %p7334_p8 = pneg %p7333_p7 }
 0x86f   : > { %p7340_p13 = por %p7339_p12, %p7338_p11 }
 0x871   : > { %p7341_p0 = pnand %p7340_p13, %p7334_p8 }
 0x873   : > { %7344 = shalt.err (!%p7341_p0)
}
 0x874   : > { %7140 = dma.vmem_to_hbm [thread:$0]  (%p7495_p5), %s10344_s12, 16, %s10342_s30, %s6481_s14  }
 0x875 PF: > { %p7146_p1 = scmp.ge.s32.totalorder %s7379_s20, 2  ;;  %s6505_s21 = sand.u32 1, %s7367_s17  }
 0x876   : > { %s6506_s1 = scalar_lea.sflag [#allocation3], %s6505_s21 }
 0x877   : > { %p7143_p2 = pnand %p7146_p1, %p7499_p6 }
 0x879   : > { %7362 = dma.done.wait (!%p7143_p2), %s6506_s1, 16  }
 0x87a   : > { %7364 = vsyncadd (!%p7143_p2), %s6506_s1, 4294967280  ;;  %p21_p3 = scmp.ge.s32.totalorder %s7482_s23, 4   ;;  %s10486_s17 = smov %s7371_s18 }
 0x87b   : > { %s10487_s18 = smov %s7375_s19  ;;  %s10488_s19 = smov %s7493_s26 }
 0x87c   : > { %s10489_s20 = smov %s7482_s23  ;;  %23 = sbr.rel (!%p21_p3) target bundleno = 6 (0x6), region = 99 }
 0x883   :  { %6510 = vsyncpa [#allocation3], 1 }
 0x884   :  { %6512 = vsyncpa [#allocation3 + $0x1], 1 }

</bundles_post_ra>
